<compile_context>
chip_gen: v7x
topology: tpu7x:2x2x1
jax: 0.10.0
libtpu: 0.0.40
codegen_flags: <defaults>
</compile_context>

<pallas_src>
import functools

import jax
import jax.numpy as jnp
from jax.experimental import pallas as pl
from jax.experimental.pallas import tpu as pltpu


# ---------------------------------------------------------------------------
# Pallas kernel: (batched) matmul tile with fused bias-add and optional ReLU.
# The whole K reduction fits one grid step (K <= 576 for every matmul in this
# model), so there is no accumulator scratch and no init/finalize phases.
# ---------------------------------------------------------------------------
def _matmul_bias_act_kernel(a_ref, b_ref, bias_ref, o_ref, *, relu):
    out = jnp.dot(a_ref[...], b_ref[...], preferred_element_type=jnp.float32)
    out = out + bias_ref[...]                      # bias (1, tn) broadcasts
    if relu:
        out = jnp.maximum(out, 0.0)
    o_ref[...] = out.astype(o_ref.dtype)


def _round_up(x, m):
    return (x + m - 1) // m * m


def pallas_matmul(a, b, bias=None, relu=False, out_dtype=jnp.float32):
    """out = act(a @ b + bias).

    a: (M, K) or (B, M, K); b: (K, N) or (B, K, N); bias: (N,) / (B, N) / None.
    Operands are cast to bf16 (f32 accumulation on the MXU).  Padding is
    shape-adaptive: M -> multiple of 8 (tile <= 512), K -> multiple of 8
    (single full-K block, no K grid axis), N -> multiple of 128 (lane-dense
    unmasked stores).
    """
    squeeze = a.ndim == 2
    if squeeze:
        a = a[None]
        b = b[None]
        if bias is not None:
            bias = bias[None]
    B, M, K = a.shape
    _, K2, N = b.shape
    assert K == K2
    if bias is None:
        bias = jnp.zeros((B, N), jnp.float32)

    tn = 128                       # lanes; v6e/v7x would prefer 256 at N >= 256
    tm = min(512, _round_up(M, 8))
    Mp = _round_up(M, tm)
    Kp = _round_up(K, 8)           # full-K single block
    Np = _round_up(N, tn)

    a_p = jnp.pad(a.astype(jnp.bfloat16), ((0, 0), (0, Mp - M), (0, Kp - K)))
    b_p = jnp.pad(b.astype(jnp.bfloat16), ((0, 0), (0, Kp - K), (0, Np - N)))
    bias_p = jnp.pad(bias.astype(jnp.float32),
                     ((0, 0), (0, Np - N))).reshape(B, 1, Np)

    out = pl.pallas_call(
        functools.partial(_matmul_bias_act_kernel, relu=relu),
        out_shape=jax.ShapeDtypeStruct((B, Mp, Np), out_dtype),
        grid_spec=pltpu.PrefetchScalarGridSpec(
            num_scalar_prefetch=0,
            grid=(B, Mp // tm, Np // tn),
            in_specs=[
                pl.BlockSpec((None, tm, Kp), lambda bb, i, j: (bb, i, 0)),
                pl.BlockSpec((None, Kp, tn), lambda bb, i, j: (bb, 0, j)),
                pl.BlockSpec((None, 1, tn), lambda bb, i, j: (bb, 0, j)),
            ],
            out_specs=pl.BlockSpec((None, tm, tn), lambda bb, i, j: (bb, i, j)),
        ),
        compiler_params=pltpu.CompilerParams(
            dimension_semantics=("parallel", "parallel", "parallel")),
    )(a_p, b_p, bias_p)

    out = out[:, :M, :N]
    return out[0] if squeeze else out


# ---------------------------------------------------------------------------
# Convolution = NHWC im2col (glue) + fused Pallas matmul (hot path).
# ---------------------------------------------------------------------------
def _im2col_nhwc(x, kh, kw, stride, dilation, padding):
    # TODO(synk): at production shapes, fuse this tap-gather into the matmul
    # kernel (loop the 9 taps over a VMEM-resident block) instead of expanding
    # kh*kw-fold in HBM; at these demo shapes the expansion is negligible.
    N, H, W, C = x.shape
    xp = jnp.pad(x, ((0, 0), (padding, padding), (padding, padding), (0, 0)))
    Hout = (H + 2 * padding - dilation * (kh - 1) - 1) // stride + 1
    Wout = (W + 2 * padding - dilation * (kw - 1) - 1) // stride + 1
    cols = []
    for i in range(kh):
        for j in range(kw):
            hs, ws = i * dilation, j * dilation
            cols.append(xp[:, hs: hs + stride * (Hout - 1) + 1: stride,
                              ws: ws + stride * (Wout - 1) + 1: stride, :])
    cols = jnp.concatenate(cols, axis=-1)            # (N, Ho, Wo, kh*kw*C)
    return cols.reshape(N * Hout * Wout, kh * kw * C), Hout, Wout


def conv2d(x, wb, k, stride=1, dilation=1, padding=0, relu=False,
           out_dtype=jnp.bfloat16):
    """x: (N,H,W,Cin) NHWC; wb = (wmat (k*k*Cin, Cout) bf16, bias (Cout,) f32)."""
    wmat, bias = wb
    N, H, W, C = x.shape
    if k == 1 and stride == 1 and padding == 0:
        cols, Ho, Wo = x.reshape(N * H * W, C), H, W
    else:
        cols, Ho, Wo = _im2col_nhwc(x, k, k, stride, dilation, padding)
    out = pallas_matmul(cols, wmat, bias, relu=relu, out_dtype=out_dtype)
    return out.reshape(N, Ho, Wo, -1)


# ---------------------------------------------------------------------------
# Bilinear resize (align_corners=False) as two batched Pallas matmuls.
# ---------------------------------------------------------------------------
def _bilinear_matrix(in_size, out_size):
    scale = in_size / out_size
    i = jnp.arange(out_size, dtype=jnp.float32)
    src = jnp.maximum((i + 0.5) * scale - 0.5, 0.0)     # PyTorch semantics
    x0 = jnp.minimum(jnp.floor(src).astype(jnp.int32), in_size - 1)
    x1 = jnp.minimum(x0 + 1, in_size - 1)
    w1 = src - x0.astype(jnp.float32)
    w0 = 1.0 - w1
    oh0 = jax.nn.one_hot(x0, in_size, dtype=jnp.float32)
    oh1 = jax.nn.one_hot(x1, in_size, dtype=jnp.float32)
    return w0[:, None] * oh0 + w1[:, None] * oh1        # (out, in)


def bilinear_resize(x, out_h, out_w, out_dtype=jnp.float32):
    """NHWC bilinear resize via two batched, transpose-free Pallas matmuls."""
    N, H, W, C = x.shape
    if H == 1 and W == 1:            # bilinear from a single pixel = replicate
        return jnp.broadcast_to(x, (N, out_h, out_w, C)).astype(out_dtype)
    Rw = _bilinear_matrix(W, out_w)                      # (out_w, W)
    Rh = _bilinear_matrix(H, out_h)                      # (out_h, H)
    # Width resize: per (n, h) block, (out_w, W) @ (W, C).
    t = pallas_matmul(jnp.broadcast_to(Rw, (N * H, out_w, W)),
                      x.reshape(N * H, W, C), out_dtype=jnp.bfloat16)
    # Height resize: per n, (out_h, H) @ (H, out_w*C).
    y = pallas_matmul(jnp.broadcast_to(Rh, (N, out_h, H)),
                      t.reshape(N, H, out_w * C), out_dtype=out_dtype)
    return y.reshape(N, out_h, out_w, C)


# ---------------------------------------------------------------------------
# Parameters (deterministic init, BatchNorm folded into conv weight/bias).
# ---------------------------------------------------------------------------
def _fold_bn(w, gamma, beta, mean, var, eps=1e-5):
    scale = gamma / jnp.sqrt(var + eps)
    return w * scale[:, None, None, None], beta - mean * scale


def _conv_bn_params(key, cin, cout, k):
    k1, k2, k3, k4, k5 = jax.random.split(key, 5)
    fan_in = cin * k * k
    w = jax.random.normal(k1, (cout, cin, k, k), jnp.float32) * jnp.sqrt(2.0 / fan_in)
    gamma = 1.0 + 0.1 * jax.random.normal(k2, (cout,), jnp.float32)
    beta = 0.1 * jax.random.normal(k3, (cout,), jnp.float32)
    mean = 0.1 * jax.random.normal(k4, (cout,), jnp.float32)
    var = jnp.abs(1.0 + 0.1 * jax.random.normal(k5, (cout,), jnp.float32))
    return _fold_bn(w, gamma, beta, mean, var)


def _conv_params(key, cin, cout, k):
    k1, k2 = jax.random.split(key)
    fan_in = cin * k * k
    w = jax.random.normal(k1, (cout, cin, k, k), jnp.float32) * jnp.sqrt(1.0 / fan_in)
    b = 0.01 * jax.random.normal(k2, (cout,), jnp.float32)
    return w, b


def init_params(key, num_classes=21, backbone_ch=48, aspp_ch=64):
    # TODO(synk): canonical ASPP width is 256; 64 used here for the small demo
    # (at 256, bump tn to 256 on v6e/v7x to fill the 256-wide MXU).
    ks = jax.random.split(key, 16)
    return {
        "backbone": {
            "c1": _conv_bn_params(ks[0], 3, 16, 3),
            "c2": _conv_bn_params(ks[1], 16, 24, 3),
            "c3": _conv_bn_params(ks[2], 24, 32, 3),
            "c4": _conv_bn_params(ks[3], 32, backbone_ch, 3),
        },
        "head": {
            "aspp0": _conv_bn_params(ks[4], backbone_ch, aspp_ch, 1),
            "aspp1": _conv_bn_params(ks[5], backbone_ch, aspp_ch, 3),
            "aspp2": _conv_bn_params(ks[6], backbone_ch, aspp_ch, 3),
            "aspp3": _conv_bn_params(ks[7], backbone_ch, aspp_ch, 3),
            "aspp_pool": _conv_bn_params(ks[8], backbone_ch, aspp_ch, 1),
            "proj": _conv_bn_params(ks[9], 5 * aspp_ch, aspp_ch, 1),
            "head3x3": _conv_bn_params(ks[10], aspp_ch, aspp_ch, 3),
            "cls": _conv_params(ks[11], aspp_ch, num_classes, 1),
        },
    }


def prepare_params(params):
    """One-time (outside jit) weight reshape to matmul layout + bf16 cast."""
    def prep(wb):
        w, b = wb
        cout, cin, kh, kw = w.shape
        # im2col column order is (tap_i, tap_j, cin) -> row (i*kw + j)*cin + c.
        wmat = w.transpose(2, 3, 1, 0).reshape(kh * kw * cin, cout)
        return wmat.astype(jnp.bfloat16), b.astype(jnp.float32)

    bb = {k: prep(v) for k, v in params["backbone"].items()}
    hd = {k: prep(v) for k, v in params["head"].items()}
    # Stack the three dilated ASPP branches so they run as one batched
    # pallas_call (leading 'parallel' grid axis -> both v7x TensorCores busy).
    hd["aspp_dil"] = (
        jnp.stack([hd["aspp1"][0], hd["aspp2"][0], hd["aspp3"][0]]),
        jnp.stack([hd["aspp1"][1], hd["aspp2"][1], hd["aspp3"][1]]),
    )
    for k in ("aspp1", "aspp2", "aspp3"):
        del hd[k]
    return {"backbone": bb, "head": hd}


# ---------------------------------------------------------------------------
# Forward pass.
# ---------------------------------------------------------------------------
def backbone_forward(x, p):
    # Simplified output_stride=16 feature extractor (see TODO at top of file).
    x = conv2d(x, p["c1"], k=3, stride=2, padding=1, relu=True)
    x = conv2d(x, p["c2"], k=3, stride=2, padding=1, relu=True)
    x = conv2d(x, p["c3"], k=3, stride=2, padding=1, relu=True)
    x = conv2d(x, p["c4"], k=3, stride=2, padding=1, relu=True)
    return x


def deeplab_head_forward(x, p):
    # DeepLabV3 ASPP head, atrous rates (6, 12, 18) for output_stride=16.
    N, fh, fw, _ = x.shape
    b0 = conv2d(x, p["aspp0"], k=1, relu=True)
    # Three dilated 3x3 branches batched into a single pallas_call.
    cols = [_im2col_nhwc(x, 3, 3, 1, r, r)[0] for r in (6, 12, 18)]
    w_dil, bias_dil = p["aspp_dil"]
    dil = pallas_matmul(jnp.stack(cols), w_dil, bias_dil, relu=True,
                        out_dtype=jnp.bfloat16)          # (3, N*fh*fw, aspp)
    b1, b2, b3 = (dil[i].reshape(N, fh, fw, -1) for i in range(3))
    # Image-pooling branch: GAP (plain jnp) -> 1x1 conv -> replicate
    # (bilinear upsample from a 1x1 source is exact replication).
    gp = jnp.mean(x, axis=(1, 2), keepdims=True)
    b4 = conv2d(gp, p["aspp_pool"], k=1, relu=True)
    b4 = jnp.broadcast_to(b4, (N, fh, fw, b4.shape[-1]))
    cat = jnp.concatenate([b0, b1, b2, b3, b4], axis=-1)
    y = conv2d(cat, p["proj"], k=1, relu=True)
    # Dropout(0.5) is identity in eval mode.
    y = conv2d(y, p["head3x3"], k=3, padding=1, relu=True)
    y = conv2d(y, p["cls"], k=1, relu=False, out_dtype=jnp.float32)
    return y


def deeplab3_forward(x, params):
    # x: NCHW (PyTorch convention); convert to NHWC once, back at the end.
    in_h, in_w = x.shape[-2], x.shape[-1]
    x = jnp.transpose(x, (0, 2, 3, 1))
    feat = backbone_forward(x, params["backbone"])
    logits = deeplab_head_forward(feat, params["head"])
    logits = bilinear_resize(logits, in_h, in_w, out_dtype=jnp.float32)
    return jnp.transpose(logits, (0, 3, 1, 2))


# ---------------------------------------------------------------------------
if __name__ == "__main__":
    key = jax.random.PRNGKey(0)
    k_param, k_input = jax.random.split(key)

    num_classes = 21
    raw_params = init_params(k_param, num_classes=num_classes)
    params = prepare_params(raw_params)   # weight reshape/bf16 cast, outside jit

    # Small NCHW input; output_stride=16 => 4x4 backbone features.
    x = jax.random.normal(k_input, (2, 3, 64, 64), jnp.float32)

    fwd = jax.jit(deeplab3_forward)
    out = jax.block_until_ready(fwd(x, params))

    assert out.shape == (2, num_classes, 64, 64), out.shape
    assert out.dtype == jnp.float32
    assert bool(jnp.all(jnp.isfinite(out)))
    print("KERNEL_OK")
</pallas_src>

<mosaic_0001>
module attributes {stable_mosaic.version = 11 : i64} {
  func.func @_matmul_bias_act_kernel(%arg0: i32, %arg1: i32, %arg2: i32, %arg3: memref<1x512x32xbf16, #tpu.memory_space<vmem>>, %arg4: memref<1x32x128xbf16, #tpu.memory_space<vmem>>, %arg5: memref<1x1x128xf32, #tpu.memory_space<vmem>>, %arg6: memref<1x512x128xbf16, #tpu.memory_space<vmem>>) attributes {dimension_semantics = [#tpu.dimension_semantics<parallel>, #tpu.dimension_semantics<parallel>, #tpu.dimension_semantics<parallel>], iteration_bounds = array<i64: 1, 4, 1>, scalar_prefetch = 0 : i64, scratch_operands = 0 : i64, tpu.core_type = #tpu.core_type<tc>, window_params = [{transform_indices = @transform_0, window_bounds = array<i64: 1, 512, 32>}, {transform_indices = @transform_1, window_bounds = array<i64: 1, 32, 128>}, {transform_indices = @transform_2, window_bounds = array<i64: 1, 1, 128>}, {transform_indices = @transform_3, window_bounds = array<i64: 1, 512, 128>}]} {
    %c0 = arith.constant 0 : index
    %c0_0 = arith.constant 0 : index
    %c0_1 = arith.constant 0 : index
    %0 = vector.load %arg3[%c0, %c0_0, %c0_1] : memref<1x512x32xbf16, #tpu.memory_space<vmem>>, vector<1x512x32xbf16>
    %1 = vector.shape_cast %0 : vector<1x512x32xbf16> to vector<512x32xbf16>
    %c0_2 = arith.constant 0 : index
    %c0_3 = arith.constant 0 : index
    %c0_4 = arith.constant 0 : index
    %2 = vector.load %arg4[%c0_2, %c0_3, %c0_4] : memref<1x32x128xbf16, #tpu.memory_space<vmem>>, vector<1x32x128xbf16>
    %3 = vector.shape_cast %2 : vector<1x32x128xbf16> to vector<32x128xbf16>
    %cst = arith.constant dense<0.000000e+00> : vector<512x128xf32>
    %4 = tpu.matmul %1, %3, %cst {dimension_numbers = #tpu.dot_dimension_numbers<[1], [0], [0], [1], [0, 0, 1, 1], [], []>} : vector<512x32xbf16>, vector<32x128xbf16>, vector<512x128xf32> -> vector<512x128xf32>
    %c0_5 = arith.constant 0 : index
    %c0_6 = arith.constant 0 : index
    %c0_7 = arith.constant 0 : index
    %5 = vector.load %arg5[%c0_5, %c0_6, %c0_7] : memref<1x1x128xf32, #tpu.memory_space<vmem>>, vector<1x1x128xf32>
    %6 = vector.shape_cast %5 : vector<1x1x128xf32> to vector<1x128xf32>
    %7 = vector.broadcast %6 : vector<1x128xf32> to vector<512x128xf32>
    %8 = arith.addf %4, %7 : vector<512x128xf32>
    %cst_8 = arith.constant 0.000000e+00 : f32
    %9 = vector.broadcast %cst_8 : f32 to vector<512x128xf32>
    %10 = arith.maximumf %8, %9 : vector<512x128xf32>
    %11 = arith.truncf %10 : vector<512x128xf32> to vector<512x128xbf16>
    %c0_9 = arith.constant 0 : index
    %c0_10 = arith.constant 0 : index
    %c0_11 = arith.constant 0 : index
    %12 = vector.load %arg6[%c0_9, %c0_10, %c0_11] : memref<1x512x128xbf16, #tpu.memory_space<vmem>>, vector<1x512x128xbf16>
    %13 = vector.shape_cast %12 : vector<1x512x128xbf16> to vector<512x128xbf16>
    %14 = vector.shape_cast %11 : vector<512x128xbf16> to vector<1x512x128xbf16>
    tpu.vector_store %arg6[%c0_9, %c0_10, %c0_11], %14 {strides = array<i32>} : memref<1x512x128xbf16, #tpu.memory_space<vmem>>, vector<1x512x128xbf16>,
    return
  }
  func.func @transform_0(%arg0: i32, %arg1: i32, %arg2: i32) -> (i32, i32, i32) {
    %c0_i32 = arith.constant 0 : i32
    %c0_i32_0 = arith.constant 0 : i32
    return %arg0, %arg1, %c0_i32 : i32, i32, i32
  }
  func.func @transform_1(%arg0: i32, %arg1: i32, %arg2: i32) -> (i32, i32, i32) {
    %c0_i32 = arith.constant 0 : i32
    %c0_i32_0 = arith.constant 0 : i32
    return %arg0, %c0_i32, %arg2 : i32, i32, i32
  }
  func.func @transform_2(%arg0: i32, %arg1: i32, %arg2: i32) -> (i32, i32, i32) {
    %c0_i32 = arith.constant 0 : i32
    %c0_i32_0 = arith.constant 0 : i32
    return %arg0, %c0_i32, %arg2 : i32, i32, i32
  }
  func.func @transform_3(%arg0: i32, %arg1: i32, %arg2: i32) -> (i32, i32, i32) {
    %c0_i32 = arith.constant 0 : i32
    return %arg0, %arg1, %arg2 : i32, i32, i32
  }
}

module attributes {stable_mosaic.version = 11 : i64} {
  func.func @_matmul_bias_act_kernel(%arg0: i32, %arg1: i32, %arg2: i32, %arg3: memref<1x512x144xbf16, #tpu.memory_space<vmem>>, %arg4: memref<1x144x128xbf16, #tpu.memory_space<vmem>>, %arg5: memref<1x1x128xf32, #tpu.memory_space<vmem>>, %arg6: memref<1x512x128xbf16, #tpu.memory_space<vmem>>) attributes {dimension_semantics = [#tpu.dimension_semantics<parallel>, #tpu.dimension_semantics<parallel>, #tpu.dimension_semantics<parallel>], iteration_bounds = array<i64: 1, 1, 1>, scalar_prefetch = 0 : i64, scratch_operands = 0 : i64, tpu.core_type = #tpu.core_type<tc>, window_params = [{transform_indices = @transform_0, window_bounds = array<i64: 1, 512, 144>}, {transform_indices = @transform_1, window_bounds = array<i64: 1, 144, 128>}, {transform_indices = @transform_2, window_bounds = array<i64: 1, 1, 128>}, {transform_indices = @transform_3, window_bounds = array<i64: 1, 512, 128>}]} {
    %c0 = arith.constant 0 : index
    %c0_0 = arith.constant 0 : index
    %c0_1 = arith.constant 0 : index
    %0 = vector.load %arg3[%c0, %c0_0, %c0_1] : memref<1x512x144xbf16, #tpu.memory_space<vmem>>, vector<1x512x144xbf16>
    %1 = vector.shape_cast %0 : vector<1x512x144xbf16> to vector<512x144xbf16>
    %c0_2 = arith.constant 0 : index
    %c0_3 = arith.constant 0 : index
    %c0_4 = arith.constant 0 : index
    %2 = vector.load %arg4[%c0_2, %c0_3, %c0_4] : memref<1x144x128xbf16, #tpu.memory_space<vmem>>, vector<1x144x128xbf16>
    %3 = vector.shape_cast %2 : vector<1x144x128xbf16> to vector<144x128xbf16>
    %cst = arith.constant dense<0.000000e+00> : vector<512x128xf32>
    %4 = tpu.matmul %1, %3, %cst {dimension_numbers = #tpu.dot_dimension_numbers<[1], [0], [0], [1], [0, 0, 1, 1], [], []>} : vector<512x144xbf16>, vector<144x128xbf16>, vector<512x128xf32> -> vector<512x128xf32>
    %c0_5 = arith.constant 0 : index
    %c0_6 = arith.constant 0 : index
    %c0_7 = arith.constant 0 : index
    %5 = vector.load %arg5[%c0_5, %c0_6, %c0_7] : memref<1x1x128xf32, #tpu.memory_space<vmem>>, vector<1x1x128xf32>
    %6 = vector.shape_cast %5 : vector<1x1x128xf32> to vector<1x128xf32>
    %7 = vector.broadcast %6 : vector<1x128xf32> to vector<512x128xf32>
    %8 = arith.addf %4, %7 : vector<512x128xf32>
    %cst_8 = arith.constant 0.000000e+00 : f32
    %9 = vector.broadcast %cst_8 : f32 to vector<512x128xf32>
    %10 = arith.maximumf %8, %9 : vector<512x128xf32>
    %11 = arith.truncf %10 : vector<512x128xf32> to vector<512x128xbf16>
    %c0_9 = arith.constant 0 : index
    %c0_10 = arith.constant 0 : index
    %c0_11 = arith.constant 0 : index
    %12 = vector.load %arg6[%c0_9, %c0_10, %c0_11] : memref<1x512x128xbf16, #tpu.memory_space<vmem>>, vector<1x512x128xbf16>
    %13 = vector.shape_cast %12 : vector<1x512x128xbf16> to vector<512x128xbf16>
    %14 = vector.shape_cast %11 : vector<512x128xbf16> to vector<1x512x128xbf16>
    tpu.vector_store %arg6[%c0_9, %c0_10, %c0_11], %14 {strides = array<i32>} : memref<1x512x128xbf16, #tpu.memory_space<vmem>>, vector<1x512x128xbf16>,
    return
  }
  func.func @transform_0(%arg0: i32, %arg1: i32, %arg2: i32) -> (i32, i32, i32) {
    %c0_i32 = arith.constant 0 : i32
    %c0_i32_0 = arith.constant 0 : i32
    return %arg0, %arg1, %c0_i32 : i32, i32, i32
  }
  func.func @transform_1(%arg0: i32, %arg1: i32, %arg2: i32) -> (i32, i32, i32) {
    %c0_i32 = arith.constant 0 : i32
    %c0_i32_0 = arith.constant 0 : i32
    return %arg0, %c0_i32, %arg2 : i32, i32, i32
  }
  func.func @transform_2(%arg0: i32, %arg1: i32, %arg2: i32) -> (i32, i32, i32) {
    %c0_i32 = arith.constant 0 : i32
    %c0_i32_0 = arith.constant 0 : i32
    return %arg0, %c0_i32, %arg2 : i32, i32, i32
  }
  func.func @transform_3(%arg0: i32, %arg1: i32, %arg2: i32) -> (i32, i32, i32) {
    %c0_i32 = arith.constant 0 : i32
    return %arg0, %arg1, %arg2 : i32, i32, i32
  }
}

module attributes {stable_mosaic.version = 11 : i64} {
  func.func @_matmul_bias_act_kernel(%arg0: i32, %arg1: i32, %arg2: i32, %arg3: memref<1x128x216xbf16, #tpu.memory_space<vmem>>, %arg4: memref<1x216x128xbf16, #tpu.memory_space<vmem>>, %arg5: memref<1x1x128xf32, #tpu.memory_space<vmem>>, %arg6: memref<1x128x128xbf16, #tpu.memory_space<vmem>>) attributes {dimension_semantics = [#tpu.dimension_semantics<parallel>, #tpu.dimension_semantics<parallel>, #tpu.dimension_semantics<parallel>], iteration_bounds = array<i64: 1, 1, 1>, scalar_prefetch = 0 : i64, scratch_operands = 0 : i64, tpu.core_type = #tpu.core_type<tc>, window_params = [{transform_indices = @transform_0, window_bounds = array<i64: 1, 128, 216>}, {transform_indices = @transform_1, window_bounds = array<i64: 1, 216, 128>}, {transform_indices = @transform_2, window_bounds = array<i64: 1, 1, 128>}, {transform_indices = @transform_3, window_bounds = array<i64: 1, 128, 128>}]} {
    %c0 = arith.constant 0 : index
    %c0_0 = arith.constant 0 : index
    %c0_1 = arith.constant 0 : index
    %0 = vector.load %arg3[%c0, %c0_0, %c0_1] : memref<1x128x216xbf16, #tpu.memory_space<vmem>>, vector<1x128x216xbf16>
    %1 = vector.shape_cast %0 : vector<1x128x216xbf16> to vector<128x216xbf16>
    %c0_2 = arith.constant 0 : index
    %c0_3 = arith.constant 0 : index
    %c0_4 = arith.constant 0 : index
    %2 = vector.load %arg4[%c0_2, %c0_3, %c0_4] : memref<1x216x128xbf16, #tpu.memory_space<vmem>>, vector<1x216x128xbf16>
    %3 = vector.shape_cast %2 : vector<1x216x128xbf16> to vector<216x128xbf16>
    %cst = arith.constant dense<0.000000e+00> : vector<128x128xf32>
    %4 = tpu.matmul %1, %3, %cst {dimension_numbers = #tpu.dot_dimension_numbers<[1], [0], [0], [1], [0, 0, 1, 1], [], []>} : vector<128x216xbf16>, vector<216x128xbf16>, vector<128x128xf32> -> vector<128x128xf32>
    %c0_5 = arith.constant 0 : index
    %c0_6 = arith.constant 0 : index
    %c0_7 = arith.constant 0 : index
    %5 = vector.load %arg5[%c0_5, %c0_6, %c0_7] : memref<1x1x128xf32, #tpu.memory_space<vmem>>, vector<1x1x128xf32>
    %6 = vector.shape_cast %5 : vector<1x1x128xf32> to vector<1x128xf32>
    %7 = vector.broadcast %6 : vector<1x128xf32> to vector<128x128xf32>
    %8 = arith.addf %4, %7 : vector<128x128xf32>
    %cst_8 = arith.constant 0.000000e+00 : f32
    %9 = vector.broadcast %cst_8 : f32 to vector<128x128xf32>
    %10 = arith.maximumf %8, %9 : vector<128x128xf32>
    %11 = arith.truncf %10 : vector<128x128xf32> to vector<128x128xbf16>
    %c0_9 = arith.constant 0 : index
    %c0_10 = arith.constant 0 : index
    %c0_11 = arith.constant 0 : index
    %12 = vector.load %arg6[%c0_9, %c0_10, %c0_11] : memref<1x128x128xbf16, #tpu.memory_space<vmem>>, vector<1x128x128xbf16>
    %13 = vector.shape_cast %12 : vector<1x128x128xbf16> to vector<128x128xbf16>
    %14 = vector.shape_cast %11 : vector<128x128xbf16> to vector<1x128x128xbf16>
    tpu.vector_store %arg6[%c0_9, %c0_10, %c0_11], %14 {strides = array<i32>} : memref<1x128x128xbf16, #tpu.memory_space<vmem>>, vector<1x128x128xbf16>,
    return
  }
  func.func @transform_0(%arg0: i32, %arg1: i32, %arg2: i32) -> (i32, i32, i32) {
    %c0_i32 = arith.constant 0 : i32
    %c0_i32_0 = arith.constant 0 : i32
    return %arg0, %arg1, %c0_i32 : i32, i32, i32
  }
  func.func @transform_1(%arg0: i32, %arg1: i32, %arg2: i32) -> (i32, i32, i32) {
    %c0_i32 = arith.constant 0 : i32
    %c0_i32_0 = arith.constant 0 : i32
    return %arg0, %c0_i32, %arg2 : i32, i32, i32
  }
  func.func @transform_2(%arg0: i32, %arg1: i32, %arg2: i32) -> (i32, i32, i32) {
    %c0_i32 = arith.constant 0 : i32
    %c0_i32_0 = arith.constant 0 : i32
    return %arg0, %c0_i32, %arg2 : i32, i32, i32
  }
  func.func @transform_3(%arg0: i32, %arg1: i32, %arg2: i32) -> (i32, i32, i32) {
    %c0_i32 = arith.constant 0 : i32
    return %arg0, %arg1, %arg2 : i32, i32, i32
  }
}

module attributes {stable_mosaic.version = 11 : i64} {
  func.func @_matmul_bias_act_kernel(%arg0: i32, %arg1: i32, %arg2: i32, %arg3: memref<1x32x288xbf16, #tpu.memory_space<vmem>>, %arg4: memref<1x288x128xbf16, #tpu.memory_space<vmem>>, %arg5: memref<1x1x128xf32, #tpu.memory_space<vmem>>, %arg6: memref<1x32x128xbf16, #tpu.memory_space<vmem>>) attributes {dimension_semantics = [#tpu.dimension_semantics<parallel>, #tpu.dimension_semantics<parallel>, #tpu.dimension_semantics<parallel>], iteration_bounds = array<i64: 1, 1, 1>, scalar_prefetch = 0 : i64, scratch_operands = 0 : i64, tpu.core_type = #tpu.core_type<tc>, window_params = [{transform_indices = @transform_0, window_bounds = array<i64: 1, 32, 288>}, {transform_indices = @transform_1, window_bounds = array<i64: 1, 288, 128>}, {transform_indices = @transform_2, window_bounds = array<i64: 1, 1, 128>}, {transform_indices = @transform_3, window_bounds = array<i64: 1, 32, 128>}]} {
    %c0 = arith.constant 0 : index
    %c0_0 = arith.constant 0 : index
    %c0_1 = arith.constant 0 : index
    %0 = vector.load %arg3[%c0, %c0_0, %c0_1] : memref<1x32x288xbf16, #tpu.memory_space<vmem>>, vector<1x32x288xbf16>
    %1 = vector.shape_cast %0 : vector<1x32x288xbf16> to vector<32x288xbf16>
    %c0_2 = arith.constant 0 : index
    %c0_3 = arith.constant 0 : index
    %c0_4 = arith.constant 0 : index
    %2 = vector.load %arg4[%c0_2, %c0_3, %c0_4] : memref<1x288x128xbf16, #tpu.memory_space<vmem>>, vector<1x288x128xbf16>
    %3 = vector.shape_cast %2 : vector<1x288x128xbf16> to vector<288x128xbf16>
    %cst = arith.constant dense<0.000000e+00> : vector<32x128xf32>
    %4 = tpu.matmul %1, %3, %cst {dimension_numbers = #tpu.dot_dimension_numbers<[1], [0], [0], [1], [0, 0, 1, 1], [], []>} : vector<32x288xbf16>, vector<288x128xbf16>, vector<32x128xf32> -> vector<32x128xf32>
    %c0_5 = arith.constant 0 : index
    %c0_6 = arith.constant 0 : index
    %c0_7 = arith.constant 0 : index
    %5 = vector.load %arg5[%c0_5, %c0_6, %c0_7] : memref<1x1x128xf32, #tpu.memory_space<vmem>>, vector<1x1x128xf32>
    %6 = vector.shape_cast %5 : vector<1x1x128xf32> to vector<1x128xf32>
    %7 = vector.broadcast %6 : vector<1x128xf32> to vector<32x128xf32>
    %8 = arith.addf %4, %7 : vector<32x128xf32>
    %cst_8 = arith.constant 0.000000e+00 : f32
    %9 = vector.broadcast %cst_8 : f32 to vector<32x128xf32>
    %10 = arith.maximumf %8, %9 : vector<32x128xf32>
    %11 = arith.truncf %10 : vector<32x128xf32> to vector<32x128xbf16>
    %c0_9 = arith.constant 0 : index
    %c0_10 = arith.constant 0 : index
    %c0_11 = arith.constant 0 : index
    %12 = vector.load %arg6[%c0_9, %c0_10, %c0_11] : memref<1x32x128xbf16, #tpu.memory_space<vmem>>, vector<1x32x128xbf16>
    %13 = vector.shape_cast %12 : vector<1x32x128xbf16> to vector<32x128xbf16>
    %14 = vector.shape_cast %11 : vector<32x128xbf16> to vector<1x32x128xbf16>
    tpu.vector_store %arg6[%c0_9, %c0_10, %c0_11], %14 {strides = array<i32>} : memref<1x32x128xbf16, #tpu.memory_space<vmem>>, vector<1x32x128xbf16>,
    return
  }
  func.func @transform_0(%arg0: i32, %arg1: i32, %arg2: i32) -> (i32, i32, i32) {
    %c0_i32 = arith.constant 0 : i32
    %c0_i32_0 = arith.constant 0 : i32
    return %arg0, %arg1, %c0_i32 : i32, i32, i32
  }
  func.func @transform_1(%arg0: i32, %arg1: i32, %arg2: i32) -> (i32, i32, i32) {
    %c0_i32 = arith.constant 0 : i32
    %c0_i32_0 = arith.constant 0 : i32
    return %arg0, %c0_i32, %arg2 : i32, i32, i32
  }
  func.func @transform_2(%arg0: i32, %arg1: i32, %arg2: i32) -> (i32, i32, i32) {
    %c0_i32 = arith.constant 0 : i32
    %c0_i32_0 = arith.constant 0 : i32
    return %arg0, %c0_i32, %arg2 : i32, i32, i32
  }
  func.func @transform_3(%arg0: i32, %arg1: i32, %arg2: i32) -> (i32, i32, i32) {
    %c0_i32 = arith.constant 0 : i32
    return %arg0, %arg1, %arg2 : i32, i32, i32
  }
}

module attributes {stable_mosaic.version = 11 : i64} {
  func.func @_matmul_bias_act_kernel(%arg0: i32, %arg1: i32, %arg2: i32, %arg3: memref<1x32x432xbf16, #tpu.memory_space<vmem>>, %arg4: memref<1x432x128xbf16, #tpu.memory_space<vmem>>, %arg5: memref<1x1x128xf32, #tpu.memory_space<vmem>>, %arg6: memref<1x32x128xbf16, #tpu.memory_space<vmem>>) attributes {dimension_semantics = [#tpu.dimension_semantics<parallel>, #tpu.dimension_semantics<parallel>, #tpu.dimension_semantics<parallel>], iteration_bounds = array<i64: 3, 1, 1>, scalar_prefetch = 0 : i64, scratch_operands = 0 : i64, tpu.core_type = #tpu.core_type<tc>, window_params = [{transform_indices = @transform_0, window_bounds = array<i64: 1, 32, 432>}, {transform_indices = @transform_1, window_bounds = array<i64: 1, 432, 128>}, {transform_indices = @transform_2, window_bounds = array<i64: 1, 1, 128>}, {transform_indices = @transform_3, window_bounds = array<i64: 1, 32, 128>}]} {
    %c0 = arith.constant 0 : index
    %c0_0 = arith.constant 0 : index
    %c0_1 = arith.constant 0 : index
    %0 = vector.load %arg3[%c0, %c0_0, %c0_1] : memref<1x32x432xbf16, #tpu.memory_space<vmem>>, vector<1x32x432xbf16>
    %1 = vector.shape_cast %0 : vector<1x32x432xbf16> to vector<32x432xbf16>
    %c0_2 = arith.constant 0 : index
    %c0_3 = arith.constant 0 : index
    %c0_4 = arith.constant 0 : index
    %2 = vector.load %arg4[%c0_2, %c0_3, %c0_4] : memref<1x432x128xbf16, #tpu.memory_space<vmem>>, vector<1x432x128xbf16>
    %3 = vector.shape_cast %2 : vector<1x432x128xbf16> to vector<432x128xbf16>
    %cst = arith.constant dense<0.000000e+00> : vector<32x128xf32>
    %4 = tpu.matmul %1, %3, %cst {dimension_numbers = #tpu.dot_dimension_numbers<[1], [0], [0], [1], [0, 0, 1, 1], [], []>} : vector<32x432xbf16>, vector<432x128xbf16>, vector<32x128xf32> -> vector<32x128xf32>
    %c0_5 = arith.constant 0 : index
    %c0_6 = arith.constant 0 : index
    %c0_7 = arith.constant 0 : index
    %5 = vector.load %arg5[%c0_5, %c0_6, %c0_7] : memref<1x1x128xf32, #tpu.memory_space<vmem>>, vector<1x1x128xf32>
    %6 = vector.shape_cast %5 : vector<1x1x128xf32> to vector<1x128xf32>
    %7 = vector.broadcast %6 : vector<1x128xf32> to vector<32x128xf32>
    %8 = arith.addf %4, %7 : vector<32x128xf32>
    %cst_8 = arith.constant 0.000000e+00 : f32
    %9 = vector.broadcast %cst_8 : f32 to vector<32x128xf32>
    %10 = arith.maximumf %8, %9 : vector<32x128xf32>
    %11 = arith.truncf %10 : vector<32x128xf32> to vector<32x128xbf16>
    %c0_9 = arith.constant 0 : index
    %c0_10 = arith.constant 0 : index
    %c0_11 = arith.constant 0 : index
    %12 = vector.load %arg6[%c0_9, %c0_10, %c0_11] : memref<1x32x128xbf16, #tpu.memory_space<vmem>>, vector<1x32x128xbf16>
    %13 = vector.shape_cast %12 : vector<1x32x128xbf16> to vector<32x128xbf16>
    %14 = vector.shape_cast %11 : vector<32x128xbf16> to vector<1x32x128xbf16>
    tpu.vector_store %arg6[%c0_9, %c0_10, %c0_11], %14 {strides = array<i32>} : memref<1x32x128xbf16, #tpu.memory_space<vmem>>, vector<1x32x128xbf16>,
    return
  }
  func.func @transform_0(%arg0: i32, %arg1: i32, %arg2: i32) -> (i32, i32, i32) {
    %c0_i32 = arith.constant 0 : i32
    %c0_i32_0 = arith.constant 0 : i32
    return %arg0, %arg1, %c0_i32 : i32, i32, i32
  }
  func.func @transform_1(%arg0: i32, %arg1: i32, %arg2: i32) -> (i32, i32, i32) {
    %c0_i32 = arith.constant 0 : i32
    %c0_i32_0 = arith.constant 0 : i32
    return %arg0, %c0_i32, %arg2 : i32, i32, i32
  }
  func.func @transform_2(%arg0: i32, %arg1: i32, %arg2: i32) -> (i32, i32, i32) {
    %c0_i32 = arith.constant 0 : i32
    %c0_i32_0 = arith.constant 0 : i32
    return %arg0, %c0_i32, %arg2 : i32, i32, i32
  }
  func.func @transform_3(%arg0: i32, %arg1: i32, %arg2: i32) -> (i32, i32, i32) {
    %c0_i32 = arith.constant 0 : i32
    return %arg0, %arg1, %arg2 : i32, i32, i32
  }
}

module attributes {stable_mosaic.version = 11 : i64} {
  func.func @_matmul_bias_act_kernel(%arg0: i32, %arg1: i32, %arg2: i32, %arg3: memref<1x8x48xbf16, #tpu.memory_space<vmem>>, %arg4: memref<1x48x128xbf16, #tpu.memory_space<vmem>>, %arg5: memref<1x1x128xf32, #tpu.memory_space<vmem>>, %arg6: memref<1x8x128xbf16, #tpu.memory_space<vmem>>) attributes {dimension_semantics = [#tpu.dimension_semantics<parallel>, #tpu.dimension_semantics<parallel>, #tpu.dimension_semantics<parallel>], iteration_bounds = array<i64: 1, 1, 1>, scalar_prefetch = 0 : i64, scratch_operands = 0 : i64, tpu.core_type = #tpu.core_type<tc>, window_params = [{transform_indices = @transform_0, window_bounds = array<i64: 1, 8, 48>}, {transform_indices = @transform_1, window_bounds = array<i64: 1, 48, 128>}, {transform_indices = @transform_2, window_bounds = array<i64: 1, 1, 128>}, {transform_indices = @transform_3, window_bounds = array<i64: 1, 8, 128>}]} {
    %c0 = arith.constant 0 : index
    %c0_0 = arith.constant 0 : index
    %c0_1 = arith.constant 0 : index
    %0 = vector.load %arg3[%c0, %c0_0, %c0_1] : memref<1x8x48xbf16, #tpu.memory_space<vmem>>, vector<1x8x48xbf16>
    %1 = vector.shape_cast %0 : vector<1x8x48xbf16> to vector<8x48xbf16>
    %c0_2 = arith.constant 0 : index
    %c0_3 = arith.constant 0 : index
    %c0_4 = arith.constant 0 : index
    %2 = vector.load %arg4[%c0_2, %c0_3, %c0_4] : memref<1x48x128xbf16, #tpu.memory_space<vmem>>, vector<1x48x128xbf16>
    %3 = vector.shape_cast %2 : vector<1x48x128xbf16> to vector<48x128xbf16>
    %cst = arith.constant dense<0.000000e+00> : vector<8x128xf32>
    %4 = tpu.matmul %1, %3, %cst {dimension_numbers = #tpu.dot_dimension_numbers<[1], [0], [0], [1], [0, 0, 1, 1], [], []>} : vector<8x48xbf16>, vector<48x128xbf16>, vector<8x128xf32> -> vector<8x128xf32>
    %c0_5 = arith.constant 0 : index
    %c0_6 = arith.constant 0 : index
    %c0_7 = arith.constant 0 : index
    %5 = vector.load %arg5[%c0_5, %c0_6, %c0_7] : memref<1x1x128xf32, #tpu.memory_space<vmem>>, vector<1x1x128xf32>
    %6 = vector.shape_cast %5 : vector<1x1x128xf32> to vector<1x128xf32>
    %7 = vector.broadcast %6 : vector<1x128xf32> to vector<8x128xf32>
    %8 = arith.addf %4, %7 : vector<8x128xf32>
    %cst_8 = arith.constant 0.000000e+00 : f32
    %9 = vector.broadcast %cst_8 : f32 to vector<8x128xf32>
    %10 = arith.maximumf %8, %9 : vector<8x128xf32>
    %11 = arith.truncf %10 : vector<8x128xf32> to vector<8x128xbf16>
    %c0_9 = arith.constant 0 : index
    %c0_10 = arith.constant 0 : index
    %c0_11 = arith.constant 0 : index
    %12 = vector.load %arg6[%c0_9, %c0_10, %c0_11] : memref<1x8x128xbf16, #tpu.memory_space<vmem>>, vector<1x8x128xbf16>
    %13 = vector.shape_cast %12 : vector<1x8x128xbf16> to vector<8x128xbf16>
    %14 = vector.shape_cast %11 : vector<8x128xbf16> to vector<1x8x128xbf16>
    tpu.vector_store %arg6[%c0_9, %c0_10, %c0_11], %14 {strides = array<i32>} : memref<1x8x128xbf16, #tpu.memory_space<vmem>>, vector<1x8x128xbf16>,
    return
  }
  func.func @transform_0(%arg0: i32, %arg1: i32, %arg2: i32) -> (i32, i32, i32) {
    %c0_i32 = arith.constant 0 : i32
    %c0_i32_0 = arith.constant 0 : i32
    return %arg0, %arg1, %c0_i32 : i32, i32, i32
  }
  func.func @transform_1(%arg0: i32, %arg1: i32, %arg2: i32) -> (i32, i32, i32) {
    %c0_i32 = arith.constant 0 : i32
    %c0_i32_0 = arith.constant 0 : i32
    return %arg0, %c0_i32, %arg2 : i32, i32, i32
  }
  func.func @transform_2(%arg0: i32, %arg1: i32, %arg2: i32) -> (i32, i32, i32) {
    %c0_i32 = arith.constant 0 : i32
    %c0_i32_0 = arith.constant 0 : i32
    return %arg0, %c0_i32, %arg2 : i32, i32, i32
  }
  func.func @transform_3(%arg0: i32, %arg1: i32, %arg2: i32) -> (i32, i32, i32) {
    %c0_i32 = arith.constant 0 : i32
    return %arg0, %arg1, %arg2 : i32, i32, i32
  }
}

module attributes {stable_mosaic.version = 11 : i64} {
  func.func @_matmul_bias_act_kernel(%arg0: i32, %arg1: i32, %arg2: i32, %arg3: memref<1x32x48xbf16, #tpu.memory_space<vmem>>, %arg4: memref<1x48x128xbf16, #tpu.memory_space<vmem>>, %arg5: memref<1x1x128xf32, #tpu.memory_space<vmem>>, %arg6: memref<1x32x128xbf16, #tpu.memory_space<vmem>>) attributes {dimension_semantics = [#tpu.dimension_semantics<parallel>, #tpu.dimension_semantics<parallel>, #tpu.dimension_semantics<parallel>], iteration_bounds = array<i64: 1, 1, 1>, scalar_prefetch = 0 : i64, scratch_operands = 0 : i64, tpu.core_type = #tpu.core_type<tc>, window_params = [{transform_indices = @transform_0, window_bounds = array<i64: 1, 32, 48>}, {transform_indices = @transform_1, window_bounds = array<i64: 1, 48, 128>}, {transform_indices = @transform_2, window_bounds = array<i64: 1, 1, 128>}, {transform_indices = @transform_3, window_bounds = array<i64: 1, 32, 128>}]} {
    %c0 = arith.constant 0 : index
    %c0_0 = arith.constant 0 : index
    %c0_1 = arith.constant 0 : index
    %0 = vector.load %arg3[%c0, %c0_0, %c0_1] : memref<1x32x48xbf16, #tpu.memory_space<vmem>>, vector<1x32x48xbf16>
    %1 = vector.shape_cast %0 : vector<1x32x48xbf16> to vector<32x48xbf16>
    %c0_2 = arith.constant 0 : index
    %c0_3 = arith.constant 0 : index
    %c0_4 = arith.constant 0 : index
    %2 = vector.load %arg4[%c0_2, %c0_3, %c0_4] : memref<1x48x128xbf16, #tpu.memory_space<vmem>>, vector<1x48x128xbf16>
    %3 = vector.shape_cast %2 : vector<1x48x128xbf16> to vector<48x128xbf16>
    %cst = arith.constant dense<0.000000e+00> : vector<32x128xf32>
    %4 = tpu.matmul %1, %3, %cst {dimension_numbers = #tpu.dot_dimension_numbers<[1], [0], [0], [1], [0, 0, 1, 1], [], []>} : vector<32x48xbf16>, vector<48x128xbf16>, vector<32x128xf32> -> vector<32x128xf32>
    %c0_5 = arith.constant 0 : index
    %c0_6 = arith.constant 0 : index
    %c0_7 = arith.constant 0 : index
    %5 = vector.load %arg5[%c0_5, %c0_6, %c0_7] : memref<1x1x128xf32, #tpu.memory_space<vmem>>, vector<1x1x128xf32>
    %6 = vector.shape_cast %5 : vector<1x1x128xf32> to vector<1x128xf32>
    %7 = vector.broadcast %6 : vector<1x128xf32> to vector<32x128xf32>
    %8 = arith.addf %4, %7 : vector<32x128xf32>
    %cst_8 = arith.constant 0.000000e+00 : f32
    %9 = vector.broadcast %cst_8 : f32 to vector<32x128xf32>
    %10 = arith.maximumf %8, %9 : vector<32x128xf32>
    %11 = arith.truncf %10 : vector<32x128xf32> to vector<32x128xbf16>
    %c0_9 = arith.constant 0 : index
    %c0_10 = arith.constant 0 : index
    %c0_11 = arith.constant 0 : index
    %12 = vector.load %arg6[%c0_9, %c0_10, %c0_11] : memref<1x32x128xbf16, #tpu.memory_space<vmem>>, vector<1x32x128xbf16>
    %13 = vector.shape_cast %12 : vector<1x32x128xbf16> to vector<32x128xbf16>
    %14 = vector.shape_cast %11 : vector<32x128xbf16> to vector<1x32x128xbf16>
    tpu.vector_store %arg6[%c0_9, %c0_10, %c0_11], %14 {strides = array<i32>} : memref<1x32x128xbf16, #tpu.memory_space<vmem>>, vector<1x32x128xbf16>,
    return
  }
  func.func @transform_0(%arg0: i32, %arg1: i32, %arg2: i32) -> (i32, i32, i32) {
    %c0_i32 = arith.constant 0 : i32
    %c0_i32_0 = arith.constant 0 : i32
    return %arg0, %arg1, %c0_i32 : i32, i32, i32
  }
  func.func @transform_1(%arg0: i32, %arg1: i32, %arg2: i32) -> (i32, i32, i32) {
    %c0_i32 = arith.constant 0 : i32
    %c0_i32_0 = arith.constant 0 : i32
    return %arg0, %c0_i32, %arg2 : i32, i32, i32
  }
  func.func @transform_2(%arg0: i32, %arg1: i32, %arg2: i32) -> (i32, i32, i32) {
    %c0_i32 = arith.constant 0 : i32
    %c0_i32_0 = arith.constant 0 : i32
    return %arg0, %c0_i32, %arg2 : i32, i32, i32
  }
  func.func @transform_3(%arg0: i32, %arg1: i32, %arg2: i32) -> (i32, i32, i32) {
    %c0_i32 = arith.constant 0 : i32
    return %arg0, %arg1, %arg2 : i32, i32, i32
  }
}

module attributes {stable_mosaic.version = 11 : i64} {
  func.func @_matmul_bias_act_kernel(%arg0: i32, %arg1: i32, %arg2: i32, %arg3: memref<1x32x320xbf16, #tpu.memory_space<vmem>>, %arg4: memref<1x320x128xbf16, #tpu.memory_space<vmem>>, %arg5: memref<1x1x128xf32, #tpu.memory_space<vmem>>, %arg6: memref<1x32x128xbf16, #tpu.memory_space<vmem>>) attributes {dimension_semantics = [#tpu.dimension_semantics<parallel>, #tpu.dimension_semantics<parallel>, #tpu.dimension_semantics<parallel>], iteration_bounds = array<i64: 1, 1, 1>, scalar_prefetch = 0 : i64, scratch_operands = 0 : i64, tpu.core_type = #tpu.core_type<tc>, window_params = [{transform_indices = @transform_0, window_bounds = array<i64: 1, 32, 320>}, {transform_indices = @transform_1, window_bounds = array<i64: 1, 320, 128>}, {transform_indices = @transform_2, window_bounds = array<i64: 1, 1, 128>}, {transform_indices = @transform_3, window_bounds = array<i64: 1, 32, 128>}]} {
    %c0 = arith.constant 0 : index
    %c0_0 = arith.constant 0 : index
    %c0_1 = arith.constant 0 : index
    %0 = vector.load %arg3[%c0, %c0_0, %c0_1] : memref<1x32x320xbf16, #tpu.memory_space<vmem>>, vector<1x32x320xbf16>
    %1 = vector.shape_cast %0 : vector<1x32x320xbf16> to vector<32x320xbf16>
    %c0_2 = arith.constant 0 : index
    %c0_3 = arith.constant 0 : index
    %c0_4 = arith.constant 0 : index
    %2 = vector.load %arg4[%c0_2, %c0_3, %c0_4] : memref<1x320x128xbf16, #tpu.memory_space<vmem>>, vector<1x320x128xbf16>
    %3 = vector.shape_cast %2 : vector<1x320x128xbf16> to vector<320x128xbf16>
    %cst = arith.constant dense<0.000000e+00> : vector<32x128xf32>
    %4 = tpu.matmul %1, %3, %cst {dimension_numbers = #tpu.dot_dimension_numbers<[1], [0], [0], [1], [0, 0, 1, 1], [], []>} : vector<32x320xbf16>, vector<320x128xbf16>, vector<32x128xf32> -> vector<32x128xf32>
    %c0_5 = arith.constant 0 : index
    %c0_6 = arith.constant 0 : index
    %c0_7 = arith.constant 0 : index
    %5 = vector.load %arg5[%c0_5, %c0_6, %c0_7] : memref<1x1x128xf32, #tpu.memory_space<vmem>>, vector<1x1x128xf32>
    %6 = vector.shape_cast %5 : vector<1x1x128xf32> to vector<1x128xf32>
    %7 = vector.broadcast %6 : vector<1x128xf32> to vector<32x128xf32>
    %8 = arith.addf %4, %7 : vector<32x128xf32>
    %cst_8 = arith.constant 0.000000e+00 : f32
    %9 = vector.broadcast %cst_8 : f32 to vector<32x128xf32>
    %10 = arith.maximumf %8, %9 : vector<32x128xf32>
    %11 = arith.truncf %10 : vector<32x128xf32> to vector<32x128xbf16>
    %c0_9 = arith.constant 0 : index
    %c0_10 = arith.constant 0 : index
    %c0_11 = arith.constant 0 : index
    %12 = vector.load %arg6[%c0_9, %c0_10, %c0_11] : memref<1x32x128xbf16, #tpu.memory_space<vmem>>, vector<1x32x128xbf16>
    %13 = vector.shape_cast %12 : vector<1x32x128xbf16> to vector<32x128xbf16>
    %14 = vector.shape_cast %11 : vector<32x128xbf16> to vector<1x32x128xbf16>
    tpu.vector_store %arg6[%c0_9, %c0_10, %c0_11], %14 {strides = array<i32>} : memref<1x32x128xbf16, #tpu.memory_space<vmem>>, vector<1x32x128xbf16>,
    return
  }
  func.func @transform_0(%arg0: i32, %arg1: i32, %arg2: i32) -> (i32, i32, i32) {
    %c0_i32 = arith.constant 0 : i32
    %c0_i32_0 = arith.constant 0 : i32
    return %arg0, %arg1, %c0_i32 : i32, i32, i32
  }
  func.func @transform_1(%arg0: i32, %arg1: i32, %arg2: i32) -> (i32, i32, i32) {
    %c0_i32 = arith.constant 0 : i32
    %c0_i32_0 = arith.constant 0 : i32
    return %arg0, %c0_i32, %arg2 : i32, i32, i32
  }
  func.func @transform_2(%arg0: i32, %arg1: i32, %arg2: i32) -> (i32, i32, i32) {
    %c0_i32 = arith.constant 0 : i32
    %c0_i32_0 = arith.constant 0 : i32
    return %arg0, %c0_i32, %arg2 : i32, i32, i32
  }
  func.func @transform_3(%arg0: i32, %arg1: i32, %arg2: i32) -> (i32, i32, i32) {
    %c0_i32 = arith.constant 0 : i32
    return %arg0, %arg1, %arg2 : i32, i32, i32
  }
}

module attributes {stable_mosaic.version = 11 : i64} {
  func.func @_matmul_bias_act_kernel(%arg0: i32, %arg1: i32, %arg2: i32, %arg3: memref<1x32x576xbf16, #tpu.memory_space<vmem>>, %arg4: memref<1x576x128xbf16, #tpu.memory_space<vmem>>, %arg5: memref<1x1x128xf32, #tpu.memory_space<vmem>>, %arg6: memref<1x32x128xbf16, #tpu.memory_space<vmem>>) attributes {dimension_semantics = [#tpu.dimension_semantics<parallel>, #tpu.dimension_semantics<parallel>, #tpu.dimension_semantics<parallel>], iteration_bounds = array<i64: 1, 1, 1>, scalar_prefetch = 0 : i64, scratch_operands = 0 : i64, tpu.core_type = #tpu.core_type<tc>, window_params = [{transform_indices = @transform_0, window_bounds = array<i64: 1, 32, 576>}, {transform_indices = @transform_1, window_bounds = array<i64: 1, 576, 128>}, {transform_indices = @transform_2, window_bounds = array<i64: 1, 1, 128>}, {transform_indices = @transform_3, window_bounds = array<i64: 1, 32, 128>}]} {
    %c0 = arith.constant 0 : index
    %c0_0 = arith.constant 0 : index
    %c0_1 = arith.constant 0 : index
    %0 = vector.load %arg3[%c0, %c0_0, %c0_1] : memref<1x32x576xbf16, #tpu.memory_space<vmem>>, vector<1x32x576xbf16>
    %1 = vector.shape_cast %0 : vector<1x32x576xbf16> to vector<32x576xbf16>
    %c0_2 = arith.constant 0 : index
    %c0_3 = arith.constant 0 : index
    %c0_4 = arith.constant 0 : index
    %2 = vector.load %arg4[%c0_2, %c0_3, %c0_4] : memref<1x576x128xbf16, #tpu.memory_space<vmem>>, vector<1x576x128xbf16>
    %3 = vector.shape_cast %2 : vector<1x576x128xbf16> to vector<576x128xbf16>
    %cst = arith.constant dense<0.000000e+00> : vector<32x128xf32>
    %4 = tpu.matmul %1, %3, %cst {dimension_numbers = #tpu.dot_dimension_numbers<[1], [0], [0], [1], [0, 0, 1, 1], [], []>} : vector<32x576xbf16>, vector<576x128xbf16>, vector<32x128xf32> -> vector<32x128xf32>
    %c0_5 = arith.constant 0 : index
    %c0_6 = arith.constant 0 : index
    %c0_7 = arith.constant 0 : index
    %5 = vector.load %arg5[%c0_5, %c0_6, %c0_7] : memref<1x1x128xf32, #tpu.memory_space<vmem>>, vector<1x1x128xf32>
    %6 = vector.shape_cast %5 : vector<1x1x128xf32> to vector<1x128xf32>
    %7 = vector.broadcast %6 : vector<1x128xf32> to vector<32x128xf32>
    %8 = arith.addf %4, %7 : vector<32x128xf32>
    %cst_8 = arith.constant 0.000000e+00 : f32
    %9 = vector.broadcast %cst_8 : f32 to vector<32x128xf32>
    %10 = arith.maximumf %8, %9 : vector<32x128xf32>
    %11 = arith.truncf %10 : vector<32x128xf32> to vector<32x128xbf16>
    %c0_9 = arith.constant 0 : index
    %c0_10 = arith.constant 0 : index
    %c0_11 = arith.constant 0 : index
    %12 = vector.load %arg6[%c0_9, %c0_10, %c0_11] : memref<1x32x128xbf16, #tpu.memory_space<vmem>>, vector<1x32x128xbf16>
    %13 = vector.shape_cast %12 : vector<1x32x128xbf16> to vector<32x128xbf16>
    %14 = vector.shape_cast %11 : vector<32x128xbf16> to vector<1x32x128xbf16>
    tpu.vector_store %arg6[%c0_9, %c0_10, %c0_11], %14 {strides = array<i32>} : memref<1x32x128xbf16, #tpu.memory_space<vmem>>, vector<1x32x128xbf16>,
    return
  }
  func.func @transform_0(%arg0: i32, %arg1: i32, %arg2: i32) -> (i32, i32, i32) {
    %c0_i32 = arith.constant 0 : i32
    %c0_i32_0 = arith.constant 0 : i32
    return %arg0, %arg1, %c0_i32 : i32, i32, i32
  }
  func.func @transform_1(%arg0: i32, %arg1: i32, %arg2: i32) -> (i32, i32, i32) {
    %c0_i32 = arith.constant 0 : i32
    %c0_i32_0 = arith.constant 0 : i32
    return %arg0, %c0_i32, %arg2 : i32, i32, i32
  }
  func.func @transform_2(%arg0: i32, %arg1: i32, %arg2: i32) -> (i32, i32, i32) {
    %c0_i32 = arith.constant 0 : i32
    %c0_i32_0 = arith.constant 0 : i32
    return %arg0, %c0_i32, %arg2 : i32, i32, i32
  }
  func.func @transform_3(%arg0: i32, %arg1: i32, %arg2: i32) -> (i32, i32, i32) {
    %c0_i32 = arith.constant 0 : i32
    return %arg0, %arg1, %arg2 : i32, i32, i32
  }
}

module attributes {stable_mosaic.version = 11 : i64} {
  func.func @_matmul_bias_act_kernel(%arg0: i32, %arg1: i32, %arg2: i32, %arg3: memref<1x32x64xbf16, #tpu.memory_space<vmem>>, %arg4: memref<1x64x128xbf16, #tpu.memory_space<vmem>>, %arg5: memref<1x1x128xf32, #tpu.memory_space<vmem>>, %arg6: memref<1x32x128xf32, #tpu.memory_space<vmem>>) attributes {dimension_semantics = [#tpu.dimension_semantics<parallel>, #tpu.dimension_semantics<parallel>, #tpu.dimension_semantics<parallel>], iteration_bounds = array<i64: 1, 1, 1>, scalar_prefetch = 0 : i64, scratch_operands = 0 : i64, tpu.core_type = #tpu.core_type<tc>, window_params = [{transform_indices = @transform_0, window_bounds = array<i64: 1, 32, 64>}, {transform_indices = @transform_1, window_bounds = array<i64: 1, 64, 128>}, {transform_indices = @transform_2, window_bounds = array<i64: 1, 1, 128>}, {transform_indices = @transform_3, window_bounds = array<i64: 1, 32, 128>}]} {
    %c0 = arith.constant 0 : index
    %c0_0 = arith.constant 0 : index
    %c0_1 = arith.constant 0 : index
    %0 = vector.load %arg3[%c0, %c0_0, %c0_1] : memref<1x32x64xbf16, #tpu.memory_space<vmem>>, vector<1x32x64xbf16>
    %1 = vector.shape_cast %0 : vector<1x32x64xbf16> to vector<32x64xbf16>
    %c0_2 = arith.constant 0 : index
    %c0_3 = arith.constant 0 : index
    %c0_4 = arith.constant 0 : index
    %2 = vector.load %arg4[%c0_2, %c0_3, %c0_4] : memref<1x64x128xbf16, #tpu.memory_space<vmem>>, vector<1x64x128xbf16>
    %3 = vector.shape_cast %2 : vector<1x64x128xbf16> to vector<64x128xbf16>
    %cst = arith.constant dense<0.000000e+00> : vector<32x128xf32>
    %4 = tpu.matmul %1, %3, %cst {dimension_numbers = #tpu.dot_dimension_numbers<[1], [0], [0], [1], [0, 0, 1, 1], [], []>} : vector<32x64xbf16>, vector<64x128xbf16>, vector<32x128xf32> -> vector<32x128xf32>
    %c0_5 = arith.constant 0 : index
    %c0_6 = arith.constant 0 : index
    %c0_7 = arith.constant 0 : index
    %5 = vector.load %arg5[%c0_5, %c0_6, %c0_7] : memref<1x1x128xf32, #tpu.memory_space<vmem>>, vector<1x1x128xf32>
    %6 = vector.shape_cast %5 : vector<1x1x128xf32> to vector<1x128xf32>
    %7 = vector.broadcast %6 : vector<1x128xf32> to vector<32x128xf32>
    %8 = arith.addf %4, %7 : vector<32x128xf32>
    %c0_8 = arith.constant 0 : index
    %c0_9 = arith.constant 0 : index
    %c0_10 = arith.constant 0 : index
    %9 = vector.load %arg6[%c0_8, %c0_9, %c0_10] : memref<1x32x128xf32, #tpu.memory_space<vmem>>, vector<1x32x128xf32>
    %10 = vector.shape_cast %9 : vector<1x32x128xf32> to vector<32x128xf32>
    %11 = vector.shape_cast %8 : vector<32x128xf32> to vector<1x32x128xf32>
    tpu.vector_store %arg6[%c0_8, %c0_9, %c0_10], %11 {strides = array<i32>} : memref<1x32x128xf32, #tpu.memory_space<vmem>>, vector<1x32x128xf32>,
    return
  }
  func.func @transform_0(%arg0: i32, %arg1: i32, %arg2: i32) -> (i32, i32, i32) {
    %c0_i32 = arith.constant 0 : i32
    %c0_i32_0 = arith.constant 0 : i32
    return %arg0, %arg1, %c0_i32 : i32, i32, i32
  }
  func.func @transform_1(%arg0: i32, %arg1: i32, %arg2: i32) -> (i32, i32, i32) {
    %c0_i32 = arith.constant 0 : i32
    %c0_i32_0 = arith.constant 0 : i32
    return %arg0, %c0_i32, %arg2 : i32, i32, i32
  }
  func.func @transform_2(%arg0: i32, %arg1: i32, %arg2: i32) -> (i32, i32, i32) {
    %c0_i32 = arith.constant 0 : i32
    %c0_i32_0 = arith.constant 0 : i32
    return %arg0, %c0_i32, %arg2 : i32, i32, i32
  }
  func.func @transform_3(%arg0: i32, %arg1: i32, %arg2: i32) -> (i32, i32, i32) {
    %c0_i32 = arith.constant 0 : i32
    return %arg0, %arg1, %arg2 : i32, i32, i32
  }
}

module attributes {stable_mosaic.version = 11 : i64} {
  func.func @_matmul_bias_act_kernel(%arg0: i32, %arg1: i32, %arg2: i32, %arg3: memref<1x64x8xbf16, #tpu.memory_space<vmem>>, %arg4: memref<1x8x128xbf16, #tpu.memory_space<vmem>>, %arg5: memref<1x1x128xf32, #tpu.memory_space<vmem>>, %arg6: memref<1x64x128xbf16, #tpu.memory_space<vmem>>) attributes {dimension_semantics = [#tpu.dimension_semantics<parallel>, #tpu.dimension_semantics<parallel>, #tpu.dimension_semantics<parallel>], iteration_bounds = array<i64: 8, 1, 1>, scalar_prefetch = 0 : i64, scratch_operands = 0 : i64, tpu.core_type = #tpu.core_type<tc>, window_params = [{transform_indices = @transform_0, window_bounds = array<i64: 1, 64, 8>}, {transform_indices = @transform_1, window_bounds = array<i64: 1, 8, 128>}, {transform_indices = @transform_2, window_bounds = array<i64: 1, 1, 128>}, {transform_indices = @transform_3, window_bounds = array<i64: 1, 64, 128>}]} {
    %c0 = arith.constant 0 : index
    %c0_0 = arith.constant 0 : index
    %c0_1 = arith.constant 0 : index
    %0 = vector.load %arg3[%c0, %c0_0, %c0_1] : memref<1x64x8xbf16, #tpu.memory_space<vmem>>, vector<1x64x8xbf16>
    %1 = vector.shape_cast %0 : vector<1x64x8xbf16> to vector<64x8xbf16>
    %c0_2 = arith.constant 0 : index
    %c0_3 = arith.constant 0 : index
    %c0_4 = arith.constant 0 : index
    %2 = vector.load %arg4[%c0_2, %c0_3, %c0_4] : memref<1x8x128xbf16, #tpu.memory_space<vmem>>, vector<1x8x128xbf16>
    %3 = vector.shape_cast %2 : vector<1x8x128xbf16> to vector<8x128xbf16>
    %cst = arith.constant dense<0.000000e+00> : vector<64x128xf32>
    %4 = tpu.matmul %1, %3, %cst {dimension_numbers = #tpu.dot_dimension_numbers<[1], [0], [0], [1], [0, 0, 1, 1], [], []>} : vector<64x8xbf16>, vector<8x128xbf16>, vector<64x128xf32> -> vector<64x128xf32>
    %c0_5 = arith.constant 0 : index
    %c0_6 = arith.constant 0 : index
    %c0_7 = arith.constant 0 : index
    %5 = vector.load %arg5[%c0_5, %c0_6, %c0_7] : memref<1x1x128xf32, #tpu.memory_space<vmem>>, vector<1x1x128xf32>
    %6 = vector.shape_cast %5 : vector<1x1x128xf32> to vector<1x128xf32>
    %7 = vector.broadcast %6 : vector<1x128xf32> to vector<64x128xf32>
    %8 = arith.addf %4, %7 : vector<64x128xf32>
    %9 = arith.truncf %8 : vector<64x128xf32> to vector<64x128xbf16>
    %c0_8 = arith.constant 0 : index
    %c0_9 = arith.constant 0 : index
    %c0_10 = arith.constant 0 : index
    %10 = vector.load %arg6[%c0_8, %c0_9, %c0_10] : memref<1x64x128xbf16, #tpu.memory_space<vmem>>, vector<1x64x128xbf16>
    %11 = vector.shape_cast %10 : vector<1x64x128xbf16> to vector<64x128xbf16>
    %12 = vector.shape_cast %9 : vector<64x128xbf16> to vector<1x64x128xbf16>
    tpu.vector_store %arg6[%c0_8, %c0_9, %c0_10], %12 {strides = array<i32>} : memref<1x64x128xbf16, #tpu.memory_space<vmem>>, vector<1x64x128xbf16>,
    return
  }
  func.func @transform_0(%arg0: i32, %arg1: i32, %arg2: i32) -> (i32, i32, i32) {
    %c0_i32 = arith.constant 0 : i32
    %c0_i32_0 = arith.constant 0 : i32
    return %arg0, %arg1, %c0_i32 : i32, i32, i32
  }
  func.func @transform_1(%arg0: i32, %arg1: i32, %arg2: i32) -> (i32, i32, i32) {
    %c0_i32 = arith.constant 0 : i32
    %c0_i32_0 = arith.constant 0 : i32
    return %arg0, %c0_i32, %arg2 : i32, i32, i32
  }
  func.func @transform_2(%arg0: i32, %arg1: i32, %arg2: i32) -> (i32, i32, i32) {
    %c0_i32 = arith.constant 0 : i32
    %c0_i32_0 = arith.constant 0 : i32
    return %arg0, %c0_i32, %arg2 : i32, i32, i32
  }
  func.func @transform_3(%arg0: i32, %arg1: i32, %arg2: i32) -> (i32, i32, i32) {
    %c0_i32 = arith.constant 0 : i32
    return %arg0, %arg1, %arg2 : i32, i32, i32
  }
}

module attributes {stable_mosaic.version = 11 : i64} {
  func.func @_matmul_bias_act_kernel(%arg0: i32, %arg1: i32, %arg2: i32, %arg3: memref<1x64x8xbf16, #tpu.memory_space<vmem>>, %arg4: memref<1x8x128xbf16, #tpu.memory_space<vmem>>, %arg5: memref<1x1x128xf32, #tpu.memory_space<vmem>>, %arg6: memref<1x64x128xf32, #tpu.memory_space<vmem>>) attributes {dimension_semantics = [#tpu.dimension_semantics<parallel>, #tpu.dimension_semantics<parallel>, #tpu.dimension_semantics<parallel>], iteration_bounds = array<i64: 2, 1, 11>, scalar_prefetch = 0 : i64, scratch_operands = 0 : i64, tpu.core_type = #tpu.core_type<tc>, window_params = [{transform_indices = @transform_0, window_bounds = array<i64: 1, 64, 8>}, {transform_indices = @transform_1, window_bounds = array<i64: 1, 8, 128>}, {transform_indices = @transform_2, window_bounds = array<i64: 1, 1, 128>}, {transform_indices = @transform_3, window_bounds = array<i64: 1, 64, 128>}]} {
    %c0 = arith.constant 0 : index
    %c0_0 = arith.constant 0 : index
    %c0_1 = arith.constant 0 : index
    %0 = vector.load %arg3[%c0, %c0_0, %c0_1] : memref<1x64x8xbf16, #tpu.memory_space<vmem>>, vector<1x64x8xbf16>
    %1 = vector.shape_cast %0 : vector<1x64x8xbf16> to vector<64x8xbf16>
    %c0_2 = arith.constant 0 : index
    %c0_3 = arith.constant 0 : index
    %c0_4 = arith.constant 0 : index
    %2 = vector.load %arg4[%c0_2, %c0_3, %c0_4] : memref<1x8x128xbf16, #tpu.memory_space<vmem>>, vector<1x8x128xbf16>
    %3 = vector.shape_cast %2 : vector<1x8x128xbf16> to vector<8x128xbf16>
    %cst = arith.constant dense<0.000000e+00> : vector<64x128xf32>
    %4 = tpu.matmul %1, %3, %cst {dimension_numbers = #tpu.dot_dimension_numbers<[1], [0], [0], [1], [0, 0, 1, 1], [], []>} : vector<64x8xbf16>, vector<8x128xbf16>, vector<64x128xf32> -> vector<64x128xf32>
    %c0_5 = arith.constant 0 : index
    %c0_6 = arith.constant 0 : index
    %c0_7 = arith.constant 0 : index
    %5 = vector.load %arg5[%c0_5, %c0_6, %c0_7] : memref<1x1x128xf32, #tpu.memory_space<vmem>>, vector<1x1x128xf32>
    %6 = vector.shape_cast %5 : vector<1x1x128xf32> to vector<1x128xf32>
    %7 = vector.broadcast %6 : vector<1x128xf32> to vector<64x128xf32>
    %8 = arith.addf %4, %7 : vector<64x128xf32>
    %c0_8 = arith.constant 0 : index
    %c0_9 = arith.constant 0 : index
    %c0_10 = arith.constant 0 : index
    %9 = vector.load %arg6[%c0_8, %c0_9, %c0_10] : memref<1x64x128xf32, #tpu.memory_space<vmem>>, vector<1x64x128xf32>
    %10 = vector.shape_cast %9 : vector<1x64x128xf32> to vector<64x128xf32>
    %11 = vector.shape_cast %8 : vector<64x128xf32> to vector<1x64x128xf32>
    tpu.vector_store %arg6[%c0_8, %c0_9, %c0_10], %11 {strides = array<i32>} : memref<1x64x128xf32, #tpu.memory_space<vmem>>, vector<1x64x128xf32>,
    return
  }
  func.func @transform_0(%arg0: i32, %arg1: i32, %arg2: i32) -> (i32, i32, i32) {
    %c0_i32 = arith.constant 0 : i32
    %c0_i32_0 = arith.constant 0 : i32
    return %arg0, %arg1, %c0_i32 : i32, i32, i32
  }
  func.func @transform_1(%arg0: i32, %arg1: i32, %arg2: i32) -> (i32, i32, i32) {
    %c0_i32 = arith.constant 0 : i32
    %c0_i32_0 = arith.constant 0 : i32
    return %arg0, %c0_i32, %arg2 : i32, i32, i32
  }
  func.func @transform_2(%arg0: i32, %arg1: i32, %arg2: i32) -> (i32, i32, i32) {
    %c0_i32 = arith.constant 0 : i32
    %c0_i32_0 = arith.constant 0 : i32
    return %arg0, %c0_i32, %arg2 : i32, i32, i32
  }
  func.func @transform_3(%arg0: i32, %arg1: i32, %arg2: i32) -> (i32, i32, i32) {
    %c0_i32 = arith.constant 0 : i32
    return %arg0, %arg1, %arg2 : i32, i32, i32
  }
}

</mosaic_0001>

<bundles_post_ra>
// kernel: deeplab3_forward.12
= control target key start
LH: loop header
LB: loop body
LE: loop exit
PB: predicated region body
PF: predicated region fallthrough
CT: control target
= control target key end

     0   :  { %s2042_s12 = smov 0   ;;  %s2044_s13 = smov 0   ;;  %s2257_s0 = inlined_call_operand.vmem [shape: bf16[1,2048,32], index: 0, kind: input, shape index: {}]   ;;  %s2258_s1 = inlined_call_operand.vmem [shape: bf16[1,32,128], index: 1, kind: input, shape index: {}]   ;;  %s2259_s2 = inlined_call_operand.vmem [shape: f32[1,1,128], index: 2, kind: input, shape index: {}]   ;;  %s2260_s3 = inlined_call_operand.vmem [shape: bf16[1,2048,128], index: 3, kind: output, shape index: {}]  }
   0x1   :  { %s2046_s14 = smov 0  }
   0x2 LB: > { %s28_s15 = sadd.s32 1, %s2016_s13  ;;  %p1441_p0 = scmp.ge.s32.totalorder %s2020_s14, 1  ;;  %s2020_s14 = sphi %s2046_s14, %s13_s14   ;;  %s2016_s13 = sphi %s2044_s13, %s2262_s13   ;;  %s2012_s12 = sphi %s2042_s12, %s2261_s12  }
   0x3   : > { %p30_p1 = scmp.ge.s32.totalorder %s28_s15, 4  ;;  %p195_p2 = scmp.lt.s32.totalorder %s2020_s14, 5 }
   0x5   : > { %s2264_s15 = smov (%p30_p1, %s28_s15), 0  ;;  %p196_p3 = pnand %p1441_p0, %p195_p2 }
   0x6   : > { %v1964_v0 = vld [vmem:[%s2258_s1] sm:$0xff] (!%p196_p3)   ;;  %s1442_s18 = sshll.u32 (!%p196_p3), %s2012_s12, 6  ;;  %v1965_v1 = vld [vmem:[%s2258_s1 + $0x8] sm:$0xff] (!%p196_p3)   ;;  %vm529_vm0 = vcmask (!%p196_p3), 261120  }
   0x7   : > { %199 = sbr.rel (%p196_p3) target bundleno = 298 (0x12a), region = 32  ;;  %p247_p4 = scmp.lt.s32.totalorder (!%p196_p3), %s1442_s18, 255  ;;  %1868 = vmatprep.subr.bf16.mxu0 (!%p196_p3), %v1964_v0  ;;  %1936 = vmatprep.subr.bf16.mxu1 (!%p196_p3), %v1964_v0  ;;  %v2143_v34 = vld [vmem:[%s2259_s2] ss:$0 sm:$0xff] (!%p196_p3) }
   0x8   : > { %1869 = vmatpush3.bf16.msra.mxu0 (!%p196_p3), %v1964_v0  ;;  %1938 = vmatpush3.bf16.msra.mxu1 (!%p196_p3), %v1964_v0 }
   0x9   : > { %1870 = vmatprep.subr.bf16.mxu0 (!%p196_p3), %v1965_v1  ;;  %1937 = vmatprep.subr.bf16.mxu1 (!%p196_p3), %v1965_v1 }
   0xc   : > { %1871 = vmatpush3.bf16.msra.mxu0 (!%p196_p3), %v1965_v1  ;;  %1939 = vmatpush3.bf16.msra.mxu1 (!%p196_p3), %v1965_v1 }
   0xe   : > { %s2266_s18 = smov (!%p247_p4, %s1442_s18), 255 }
   0xf   : > { %s1443_s21 = sshll.u32 %s2266_s18, 2 }
  0x10   : > { %s2074_s24 = scalar_lea.vmem %s2257_s0, %s1443_s21  ;;  %s2158_s29 = scalar_lea.vmem %s2260_s3, %s1443_s21 }
  0x11   : > { %v1966_v2 = vld [vmem:[%s2074_s24] sm:$0xff]   ;;  %v1968_v4 = vld [vmem:[%s2074_s24 + $0x8] sm:$0xff]   ;;  %v1970_v6 = vld [vmem:[%s2074_s24 + $0x10] sm:$0xff]  }
  0x12   : > { %v1967_v3 = vld [vmem:[%s2074_s24 + $0x80] sm:$0xff]   ;;  %1872 = vmatprep.mubr.msk.bf16.mxu0 %vm529_vm0, %v1966_v2  ;;  %v1969_v5 = vld [vmem:[%s2074_s24 + $0x88] sm:$0xff]   ;;  %v1971_v7 = vld [vmem:[%s2074_s24 + $0x90] sm:$0xff]  }
  0x13   : > { %1904 = vmatprep.mubr.msk.bf16.mxu1 %vm529_vm0, %v1967_v3  ;;  %1873 = vmatmul.mubr.msk.bf16.vlgmr.msra.gmra.mrb[0].mxu0 %vm529_vm0, %v1968_v4  ;;  %v1972_v8 = vld [vmem:[%s2074_s24 + $0x18] sm:$0xff]   ;;  %v1974_v10 = vld [vmem:[%s2074_s24 + $0x20] sm:$0xff]   ;;  %v1976_v12 = vld [vmem:[%s2074_s24 + $0x28] sm:$0xff]  }
  0x14   : > { %1905 = vmatmul.mubr.msk.bf16.vlgmr.msra.gmra.mrb[0].mxu1 %vm529_vm0, %v1969_v5  ;;  %1876 = vmatprep.mubr.msk.bf16.mxu0 %vm529_vm0, %v1970_v6  ;;  %v1973_v9 = vld [vmem:[%s2074_s24 + $0x98] sm:$0xff]   ;;  %v1975_v11 = vld [vmem:[%s2074_s24 + $0xa0] sm:$0xff]   ;;  %v1977_v13 = vld [vmem:[%s2074_s24 + $0xa8] sm:$0xff]  }
  0x15   : > { %1908 = vmatprep.mubr.msk.bf16.mxu1 %vm529_vm0, %v1971_v7  ;;  %v1978_v14 = vld [vmem:[%s2074_s24 + $0x30] sm:$0xff]   ;;  %v1980_v16 = vld [vmem:[%s2074_s24 + $0x38] sm:$0xff]   ;;  %v1982_v18 = vld [vmem:[%s2074_s24 + $0x40] sm:$0xff]  }
  0x16   : > { %v1979_v15 = vld [vmem:[%s2074_s24 + $0xb0] sm:$0xff]   ;;  %v1981_v17 = vld [vmem:[%s2074_s24 + $0xb8] sm:$0xff]   ;;  %v1983_v19 = vld [vmem:[%s2074_s24 + $0xc0] sm:$0xff]  }
  0x17   : > { %v1984_v20 = vld [vmem:[%s2074_s24 + $0x48] sm:$0xff]   ;;  %v1986_v22 = vld [vmem:[%s2074_s24 + $0x50] sm:$0xff]   ;;  %v1988_v24 = vld [vmem:[%s2074_s24 + $0x58] sm:$0xff]  }
  0x18   : > { %v1985_v21 = vld [vmem:[%s2074_s24 + $0xc8] sm:$0xff]   ;;  %v1987_v23 = vld [vmem:[%s2074_s24 + $0xd0] sm:$0xff]   ;;  %v1989_v25 = vld [vmem:[%s2074_s24 + $0xd8] sm:$0xff]  }
  0x19   : > { %v1990_v26 = vld [vmem:[%s2074_s24 + $0x60] sm:$0xff]   ;;  %v1992_v28 = vld [vmem:[%s2074_s24 + $0x68] sm:$0xff]   ;;  %v1994_v30 = vld [vmem:[%s2074_s24 + $0x70] sm:$0xff]  }
  0x1a   : > { %v1991_v27 = vld [vmem:[%s2074_s24 + $0xe0] sm:$0xff]   ;;  %v1993_v29 = vld [vmem:[%s2074_s24 + $0xe8] sm:$0xff]   ;;  %v1995_v31 = vld [vmem:[%s2074_s24 + $0xf0] sm:$0xff]  }
  0x1b   : > { %1877 = vmatmul.mubr.msk.bf16.gmra.mrb[4].mxu0 %vm529_vm0, %v1972_v8  ;;  %v1996_v32 = vld [vmem:[%s2074_s24 + $0x78] sm:$0xff]  }
  0x1c   : > { %1909 = vmatmul.mubr.msk.bf16.gmra.mrb[4].mxu1 %vm529_vm0, %v1973_v9  ;;  %1880 = vmatprep.mubr.msk.bf16.mxu0 %vm529_vm0, %v1974_v10  ;;  %v1997_v33 = vld [vmem:[%s2074_s24 + $0xf8] sm:$0xff]  }
  0x1d   : > { %1912 = vmatprep.mubr.msk.bf16.mxu1 %vm529_vm0, %v1975_v11 }
  0x23   : > { %1881 = vmatmul.mubr.msk.bf16.gmra.mrb[8].mxu0 %vm529_vm0, %v1976_v12 }
  0x24   : > { %1913 = vmatmul.mubr.msk.bf16.gmra.mrb[8].mxu1 %vm529_vm0, %v1977_v13  ;;  %1884 = vmatprep.mubr.msk.bf16.mxu0 %vm529_vm0, %v1978_v14 }
  0x25   : > { %1916 = vmatprep.mubr.msk.bf16.mxu1 %vm529_vm0, %v1979_v15 }
  0x2b   : > { %1885 = vmatmul.mubr.msk.bf16.gmra.mrb[12].mxu0 %vm529_vm0, %v1980_v16 }
  0x2c   : > { %1917 = vmatmul.mubr.msk.bf16.gmra.mrb[12].mxu1 %vm529_vm0, %v1981_v17  ;;  %1888 = vmatprep.mubr.msk.bf16.mxu0 %vm529_vm0, %v1982_v18 }
  0x2d   : > { %1920 = vmatprep.mubr.msk.bf16.mxu1 %vm529_vm0, %v1983_v19 }
  0x33   : > { %1889 = vmatmul.mubr.msk.bf16.gmra.mrb[16].mxu0 %vm529_vm0, %v1984_v20 }
  0x34   : > { %1921 = vmatmul.mubr.msk.bf16.gmra.mrb[16].mxu1 %vm529_vm0, %v1985_v21  ;;  %1892 = vmatprep.mubr.msk.bf16.mxu0 %vm529_vm0, %v1986_v22 }
  0x35   : > { %1924 = vmatprep.mubr.msk.bf16.mxu1 %vm529_vm0, %v1987_v23 }
  0x3b   : > { %1893 = vmatmul.mubr.msk.bf16.gmra.mrb[20].mxu0 %vm529_vm0, %v1988_v24 }
  0x3c   : > { %1925 = vmatmul.mubr.msk.bf16.gmra.mrb[20].mxu1 %vm529_vm0, %v1989_v25  ;;  %1896 = vmatprep.mubr.msk.bf16.mxu0 %vm529_vm0, %v1990_v26 }
  0x3d   : > { %1928 = vmatprep.mubr.msk.bf16.mxu1 %vm529_vm0, %v1991_v27 }
  0x43   : > { %1897 = vmatmul.mubr.msk.bf16.gmra.mrb[24].mxu0 %vm529_vm0, %v1992_v28 }
  0x44   : > { %1929 = vmatmul.mubr.msk.bf16.gmra.mrb[24].mxu1 %vm529_vm0, %v1993_v29  ;;  %1900 = vmatprep.mubr.msk.bf16.mxu0 %vm529_vm0, %v1994_v30 }
  0x45   : > { %1932 = vmatprep.mubr.msk.bf16.mxu1 %vm529_vm0, %v1995_v31 }
  0x4b   : > { %1901 = vmatmul.mubr.msk.bf16.gmra.mrb[28].mxu0 %vm529_vm0, %v1996_v32 }
  0x4c   : > { %1933 = vmatmul.mubr.msk.bf16.gmra.mrb[28].mxu1 %vm529_vm0, %v1997_v33 }
  0xe6   : > { %v1874_v35 = vpop.f32.mrb[0].mxu0 }
  0xe7   : > { %v669_v36 = vadd.f32 %v1874_v35, %v2143_v34  ;;  %v1906_v37 = vpop.f32.mrb[0].mxu1  ;;  %v660_v38 = vpop.f32.mrb[1].mxu0 }
  0xe8   : > { %v797_v39 = vadd.f32 %v1906_v37, %v2143_v34  ;;  %v661_v40 = vadd.f32 %v2143_v34, %v660_v38  ;;  %v788_v41 = vpop.f32.mrb[1].mxu1  ;;  %v1875_v42 = vpop.f32.mrb[2].mxu0 }
  0xe9   : > { %v789_v43 = vadd.f32 %v2143_v34, %v788_v41  ;;  %v672_v44 = vadd.f32 %v1875_v42, %v2143_v34  ;;  %v1907_v45 = vpop.f32.mrb[2].mxu1  ;;  %v663_v46 = vpop.f32.mrb[3].mxu0  ;;  %v917_v50 = vmax.f32 %v669_v36, 0.0 }
  0xea   : > { %v800_v47 = vadd.f32 %v1907_v45, %v2143_v34  ;;  %v664_v48 = vadd.f32 %v2143_v34, %v663_v46  ;;  %v791_v49 = vpop.f32.mrb[3].mxu1  ;;  %v949_v53 = vmax.f32 %v797_v39, 0.0  ;;  %v915_v54 = vmax.f32 %v661_v40, 0.0 }
  0xeb   : > { %v918_v51 = vmax.f32 %v672_v44, 0.0  ;;  %v792_v52 = vadd.f32 %v2143_v34, %v791_v49  ;;  %v947_v57 = vmax.f32 %v789_v43, 0.0 }
  0xec   : > { %v950_v55 = vmax.f32 %v800_v47, 0.0  ;;  %v916_v56 = vmax.f32 %v664_v48, 0.0 }
  0xed   : > { %v1651_v58 = vpack.c.bf16 %v918_v51, %v917_v50  ;;  %v948_v59 = vmax.f32 %v792_v52, 0.0 }
  0xee   : > { %v1731_v60 = vpack.c.bf16 %v950_v55, %v949_v53  ;;  %v1646_v61 = vpack.c.bf16 %v916_v56, %v915_v54  ;;  %v1878_v62 = vpop.f32.mrb[4].mxu0 }
  0xef   : > { %1803 = vst [vmem:[%s2158_s29 + $0x8] sm:$0xff] %v1651_v58   ;;  %v1726_v63 = vpack.c.bf16 %v948_v59, %v947_v57  ;;  %v685_v0 = vadd.f32 %v1878_v62, %v2143_v34  ;;  %v1910_v1 = vpop.f32.mrb[4].mxu1  ;;  %v676_v2 = vpop.f32.mrb[5].mxu0 }
  0xf0   : > { %1819 = vst [vmem:[%s2158_s29 + $0x88] sm:$0xff] %v1731_v60   ;;  %1647 = vst [vmem:[%s2158_s29] sm:$0xff] %v1646_v61   ;;  %v813_v3 = vadd.f32 %v1910_v1, %v2143_v34  ;;  %v677_v4 = vadd.f32 %v2143_v34, %v676_v2  ;;  %v804_v5 = vpop.f32.mrb[5].mxu1  ;;  %v1879_v6 = vpop.f32.mrb[6].mxu0 }
  0xf1   : > { %1818 = vst [vmem:[%s2158_s29 + $0x80] sm:$0xff] %v1726_v63   ;;  %v805_v7 = vadd.f32 %v2143_v34, %v804_v5  ;;  %v688_v8 = vadd.f32 %v1879_v6, %v2143_v34  ;;  %v1911_v9 = vpop.f32.mrb[6].mxu1  ;;  %v679_v10 = vpop.f32.mrb[7].mxu0  ;;  %v921_v14 = vmax.f32 %v685_v0, 0.0 }
  0xf2   : > { %v816_v11 = vadd.f32 %v1911_v9, %v2143_v34  ;;  %v680_v12 = vadd.f32 %v2143_v34, %v679_v10  ;;  %v807_v13 = vpop.f32.mrb[7].mxu1  ;;  %v953_v17 = vmax.f32 %v813_v3, 0.0  ;;  %v919_v18 = vmax.f32 %v677_v4, 0.0 }
  0xf3   : > { %v922_v15 = vmax.f32 %v688_v8, 0.0  ;;  %v808_v16 = vadd.f32 %v2143_v34, %v807_v13  ;;  %v951_v21 = vmax.f32 %v805_v7, 0.0 }
  0xf4   : > { %v954_v19 = vmax.f32 %v816_v11, 0.0  ;;  %v920_v20 = vmax.f32 %v680_v12, 0.0 }
  0xf5   : > { %v1661_v22 = vpack.c.bf16 %v922_v15, %v921_v14  ;;  %v952_v23 = vmax.f32 %v808_v16, 0.0 }
  0xf6   : > { %v1741_v24 = vpack.c.bf16 %v954_v19, %v953_v17  ;;  %v1656_v25 = vpack.c.bf16 %v920_v20, %v919_v18  ;;  %v1882_v26 = vpop.f32.mrb[8].mxu0 }
  0xf7   : > { %1805 = vst [vmem:[%s2158_s29 + $0x18] sm:$0xff] %v1661_v22   ;;  %v1736_v27 = vpack.c.bf16 %v952_v23, %v951_v21  ;;  %v701_v28 = vadd.f32 %v1882_v26, %v2143_v34  ;;  %v1914_v29 = vpop.f32.mrb[8].mxu1  ;;  %v692_v30 = vpop.f32.mrb[9].mxu0 }
  0xf8   : > { %1821 = vst [vmem:[%s2158_s29 + $0x98] sm:$0xff] %v1741_v24   ;;  %1804 = vst [vmem:[%s2158_s29 + $0x10] sm:$0xff] %v1656_v25   ;;  %v829_v31 = vadd.f32 %v1914_v29, %v2143_v34  ;;  %v693_v32 = vadd.f32 %v2143_v34, %v692_v30  ;;  %v820_v33 = vpop.f32.mrb[9].mxu1  ;;  %v1883_v35 = vpop.f32.mrb[10].mxu0 }
  0xf9   : > { %1820 = vst [vmem:[%s2158_s29 + $0x90] sm:$0xff] %v1736_v27   ;;  %v821_v36 = vadd.f32 %v2143_v34, %v820_v33  ;;  %v704_v37 = vadd.f32 %v1883_v35, %v2143_v34  ;;  %v1915_v38 = vpop.f32.mrb[10].mxu1  ;;  %v695_v39 = vpop.f32.mrb[11].mxu0  ;;  %v925_v43 = vmax.f32 %v701_v28, 0.0 }
  0xfa   : > { %v832_v40 = vadd.f32 %v1915_v38, %v2143_v34  ;;  %v696_v41 = vadd.f32 %v2143_v34, %v695_v39  ;;  %v823_v42 = vpop.f32.mrb[11].mxu1  ;;  %v957_v46 = vmax.f32 %v829_v31, 0.0  ;;  %v923_v47 = vmax.f32 %v693_v32, 0.0 }
  0xfb   : > { %v926_v44 = vmax.f32 %v704_v37, 0.0  ;;  %v824_v45 = vadd.f32 %v2143_v34, %v823_v42  ;;  %v955_v50 = vmax.f32 %v821_v36, 0.0 }
  0xfc   : > { %v958_v48 = vmax.f32 %v832_v40, 0.0  ;;  %v924_v49 = vmax.f32 %v696_v41, 0.0 }
  0xfd   : > { %v1671_v51 = vpack.c.bf16 %v926_v44, %v925_v43  ;;  %v956_v52 = vmax.f32 %v824_v45, 0.0 }
  0xfe   : > { %v1751_v53 = vpack.c.bf16 %v958_v48, %v957_v46  ;;  %v1666_v54 = vpack.c.bf16 %v924_v49, %v923_v47  ;;  %v1886_v55 = vpop.f32.mrb[12].mxu0 }
  0xff   : > { %1807 = vst [vmem:[%s2158_s29 + $0x28] sm:$0xff] %v1671_v51   ;;  %v1746_v56 = vpack.c.bf16 %v956_v52, %v955_v50  ;;  %v717_v57 = vadd.f32 %v1886_v55, %v2143_v34  ;;  %v1918_v58 = vpop.f32.mrb[12].mxu1  ;;  %v708_v59 = vpop.f32.mrb[13].mxu0 }
 0x100   : > { %1823 = vst [vmem:[%s2158_s29 + $0xa8] sm:$0xff] %v1751_v53   ;;  %1806 = vst [vmem:[%s2158_s29 + $0x20] sm:$0xff] %v1666_v54   ;;  %v845_v60 = vadd.f32 %v1918_v58, %v2143_v34  ;;  %v709_v61 = vadd.f32 %v2143_v34, %v708_v59  ;;  %v836_v62 = vpop.f32.mrb[13].mxu1  ;;  %v1887_v63 = vpop.f32.mrb[14].mxu0 }
 0x101   : > { %1822 = vst [vmem:[%s2158_s29 + $0xa0] sm:$0xff] %v1746_v56   ;;  %v837_v0 = vadd.f32 %v2143_v34, %v836_v62  ;;  %v720_v1 = vadd.f32 %v1887_v63, %v2143_v34  ;;  %v1919_v2 = vpop.f32.mrb[14].mxu1  ;;  %v711_v3 = vpop.f32.mrb[15].mxu0  ;;  %v929_v7 = vmax.f32 %v717_v57, 0.0 }
 0x102   : > { %v848_v4 = vadd.f32 %v1919_v2, %v2143_v34  ;;  %v712_v5 = vadd.f32 %v2143_v34, %v711_v3  ;;  %v839_v6 = vpop.f32.mrb[15].mxu1  ;;  %v961_v10 = vmax.f32 %v845_v60, 0.0  ;;  %v927_v11 = vmax.f32 %v709_v61, 0.0 }
 0x103   : > { %v930_v8 = vmax.f32 %v720_v1, 0.0  ;;  %v840_v9 = vadd.f32 %v2143_v34, %v839_v6  ;;  %v959_v14 = vmax.f32 %v837_v0, 0.0 }
 0x104   : > { %v962_v12 = vmax.f32 %v848_v4, 0.0  ;;  %v928_v13 = vmax.f32 %v712_v5, 0.0 }
 0x105   : > { %v1681_v15 = vpack.c.bf16 %v930_v8, %v929_v7  ;;  %v960_v16 = vmax.f32 %v840_v9, 0.0 }
 0x106   : > { %v1761_v17 = vpack.c.bf16 %v962_v12, %v961_v10  ;;  %v1676_v18 = vpack.c.bf16 %v928_v13, %v927_v11  ;;  %v1890_v19 = vpop.f32.mrb[16].mxu0 }
 0x107   : > { %1809 = vst [vmem:[%s2158_s29 + $0x38] sm:$0xff] %v1681_v15   ;;  %v1756_v20 = vpack.c.bf16 %v960_v16, %v959_v14  ;;  %v733_v21 = vadd.f32 %v1890_v19, %v2143_v34  ;;  %v1922_v22 = vpop.f32.mrb[16].mxu1  ;;  %v724_v23 = vpop.f32.mrb[17].mxu0 }
 0x108   : > { %1825 = vst [vmem:[%s2158_s29 + $0xb8] sm:$0xff] %v1761_v17   ;;  %1808 = vst [vmem:[%s2158_s29 + $0x30] sm:$0xff] %v1676_v18   ;;  %v861_v24 = vadd.f32 %v1922_v22, %v2143_v34  ;;  %v725_v25 = vadd.f32 %v2143_v34, %v724_v23  ;;  %v852_v26 = vpop.f32.mrb[17].mxu1  ;;  %v1891_v27 = vpop.f32.mrb[18].mxu0 }
 0x109   : > { %1824 = vst [vmem:[%s2158_s29 + $0xb0] sm:$0xff] %v1756_v20   ;;  %v853_v28 = vadd.f32 %v2143_v34, %v852_v26  ;;  %v736_v29 = vadd.f32 %v1891_v27, %v2143_v34  ;;  %v1923_v30 = vpop.f32.mrb[18].mxu1  ;;  %v727_v31 = vpop.f32.mrb[19].mxu0  ;;  %v933_v36 = vmax.f32 %v733_v21, 0.0 }
 0x10a   : > { %v864_v32 = vadd.f32 %v1923_v30, %v2143_v34  ;;  %v728_v33 = vadd.f32 %v2143_v34, %v727_v31  ;;  %v855_v35 = vpop.f32.mrb[19].mxu1  ;;  %v965_v39 = vmax.f32 %v861_v24, 0.0  ;;  %v931_v40 = vmax.f32 %v725_v25, 0.0 }
 0x10b   : > { %v934_v37 = vmax.f32 %v736_v29, 0.0  ;;  %v856_v38 = vadd.f32 %v2143_v34, %v855_v35  ;;  %v963_v43 = vmax.f32 %v853_v28, 0.0 }
 0x10c   : > { %v966_v41 = vmax.f32 %v864_v32, 0.0  ;;  %v932_v42 = vmax.f32 %v728_v33, 0.0 }
 0x10d   : > { %v1691_v44 = vpack.c.bf16 %v934_v37, %v933_v36  ;;  %v964_v45 = vmax.f32 %v856_v38, 0.0 }
 0x10e   : > { %v1771_v46 = vpack.c.bf16 %v966_v41, %v965_v39  ;;  %v1686_v47 = vpack.c.bf16 %v932_v42, %v931_v40  ;;  %v1894_v48 = vpop.f32.mrb[20].mxu0 }
 0x10f   : > { %1811 = vst [vmem:[%s2158_s29 + $0x48] sm:$0xff] %v1691_v44   ;;  %v1766_v49 = vpack.c.bf16 %v964_v45, %v963_v43  ;;  %v749_v50 = vadd.f32 %v1894_v48, %v2143_v34  ;;  %v1926_v51 = vpop.f32.mrb[20].mxu1  ;;  %v740_v52 = vpop.f32.mrb[21].mxu0 }
 0x110   : > { %1827 = vst [vmem:[%s2158_s29 + $0xc8] sm:$0xff] %v1771_v46   ;;  %1810 = vst [vmem:[%s2158_s29 + $0x40] sm:$0xff] %v1686_v47   ;;  %v877_v53 = vadd.f32 %v1926_v51, %v2143_v34  ;;  %v741_v54 = vadd.f32 %v2143_v34, %v740_v52  ;;  %v868_v55 = vpop.f32.mrb[21].mxu1  ;;  %v1895_v56 = vpop.f32.mrb[22].mxu0 }
 0x111   : > { %1826 = vst [vmem:[%s2158_s29 + $0xc0] sm:$0xff] %v1766_v49   ;;  %v869_v57 = vadd.f32 %v2143_v34, %v868_v55  ;;  %v752_v58 = vadd.f32 %v1895_v56, %v2143_v34  ;;  %v1927_v59 = vpop.f32.mrb[22].mxu1  ;;  %v743_v60 = vpop.f32.mrb[23].mxu0  ;;  %v937_v0 = vmax.f32 %v749_v50, 0.0 }
 0x112   : > { %v880_v61 = vadd.f32 %v1927_v59, %v2143_v34  ;;  %v744_v62 = vadd.f32 %v2143_v34, %v743_v60  ;;  %v871_v63 = vpop.f32.mrb[23].mxu1  ;;  %v969_v3 = vmax.f32 %v877_v53, 0.0  ;;  %v935_v4 = vmax.f32 %v741_v54, 0.0 }
 0x113   : > { %v938_v1 = vmax.f32 %v752_v58, 0.0  ;;  %v872_v2 = vadd.f32 %v2143_v34, %v871_v63  ;;  %v967_v7 = vmax.f32 %v869_v57, 0.0 }
 0x114   : > { %v970_v5 = vmax.f32 %v880_v61, 0.0  ;;  %v936_v6 = vmax.f32 %v744_v62, 0.0 }
 0x115   : > { %v1701_v8 = vpack.c.bf16 %v938_v1, %v937_v0  ;;  %v968_v9 = vmax.f32 %v872_v2, 0.0 }
 0x116   : > { %v1781_v10 = vpack.c.bf16 %v970_v5, %v969_v3  ;;  %v1696_v11 = vpack.c.bf16 %v936_v6, %v935_v4  ;;  %v1898_v12 = vpop.f32.mrb[24].mxu0 }
 0x117   : > { %1813 = vst [vmem:[%s2158_s29 + $0x58] sm:$0xff] %v1701_v8   ;;  %v1776_v13 = vpack.c.bf16 %v968_v9, %v967_v7  ;;  %v765_v14 = vadd.f32 %v1898_v12, %v2143_v34  ;;  %v1930_v15 = vpop.f32.mrb[24].mxu1  ;;  %v756_v16 = vpop.f32.mrb[25].mxu0 }
 0x118   : > { %1829 = vst [vmem:[%s2158_s29 + $0xd8] sm:$0xff] %v1781_v10   ;;  %1812 = vst [vmem:[%s2158_s29 + $0x50] sm:$0xff] %v1696_v11   ;;  %v893_v17 = vadd.f32 %v1930_v15, %v2143_v34  ;;  %v757_v18 = vadd.f32 %v2143_v34, %v756_v16  ;;  %v884_v19 = vpop.f32.mrb[25].mxu1  ;;  %v1899_v20 = vpop.f32.mrb[26].mxu0 }
 0x119   : > { %1828 = vst [vmem:[%s2158_s29 + $0xd0] sm:$0xff] %v1776_v13   ;;  %v885_v21 = vadd.f32 %v2143_v34, %v884_v19  ;;  %v768_v22 = vadd.f32 %v1899_v20, %v2143_v34  ;;  %v1931_v23 = vpop.f32.mrb[26].mxu1  ;;  %v759_v24 = vpop.f32.mrb[27].mxu0  ;;  %v941_v28 = vmax.f32 %v765_v14, 0.0 }
 0x11a   : > { %v896_v25 = vadd.f32 %v1931_v23, %v2143_v34  ;;  %v760_v26 = vadd.f32 %v2143_v34, %v759_v24  ;;  %v887_v27 = vpop.f32.mrb[27].mxu1  ;;  %v973_v31 = vmax.f32 %v893_v17, 0.0  ;;  %v939_v32 = vmax.f32 %v757_v18, 0.0 }
 0x11b   : > { %v942_v29 = vmax.f32 %v768_v22, 0.0  ;;  %v888_v30 = vadd.f32 %v2143_v34, %v887_v27  ;;  %v971_v36 = vmax.f32 %v885_v21, 0.0 }
 0x11c   : > { %v974_v33 = vmax.f32 %v896_v25, 0.0  ;;  %v940_v35 = vmax.f32 %v760_v26, 0.0 }
 0x11d   : > { %v1711_v37 = vpack.c.bf16 %v942_v29, %v941_v28  ;;  %v972_v38 = vmax.f32 %v888_v30, 0.0 }
 0x11e   : > { %v1791_v39 = vpack.c.bf16 %v974_v33, %v973_v31  ;;  %v1706_v40 = vpack.c.bf16 %v940_v35, %v939_v32  ;;  %v1902_v41 = vpop.f32.mrb[28].mxu0 }
 0x11f   : > { %1815 = vst [vmem:[%s2158_s29 + $0x68] sm:$0xff] %v1711_v37   ;;  %v1786_v42 = vpack.c.bf16 %v972_v38, %v971_v36  ;;  %v781_v43 = vadd.f32 %v1902_v41, %v2143_v34  ;;  %v1934_v44 = vpop.f32.mrb[28].mxu1  ;;  %v772_v45 = vpop.f32.mrb[29].mxu0 }
 0x120   : > { %1831 = vst [vmem:[%s2158_s29 + $0xe8] sm:$0xff] %v1791_v39   ;;  %1814 = vst [vmem:[%s2158_s29 + $0x60] sm:$0xff] %v1706_v40   ;;  %v909_v46 = vadd.f32 %v1934_v44, %v2143_v34  ;;  %v773_v47 = vadd.f32 %v2143_v34, %v772_v45  ;;  %v900_v48 = vpop.f32.mrb[29].mxu1  ;;  %v1903_v49 = vpop.f32.mrb[30].mxu0 }
 0x121   : > { %1830 = vst [vmem:[%s2158_s29 + $0xe0] sm:$0xff] %v1786_v42   ;;  %v901_v50 = vadd.f32 %v2143_v34, %v900_v48  ;;  %v784_v51 = vadd.f32 %v1903_v49, %v2143_v34  ;;  %v1935_v52 = vpop.f32.mrb[30].mxu1  ;;  %v775_v53 = vpop.f32.mrb[31].mxu0  ;;  %v945_v57 = vmax.f32 %v781_v43, 0.0 }
 0x122   : > { %v912_v54 = vadd.f32 %v1935_v52, %v2143_v34  ;;  %v776_v55 = vadd.f32 %v2143_v34, %v775_v53  ;;  %v903_v56 = vpop.f32.mrb[31].mxu1  ;;  %v977_v60 = vmax.f32 %v909_v46, 0.0  ;;  %v943_v61 = vmax.f32 %v773_v47, 0.0 }
 0x123   : > { %v946_v58 = vmax.f32 %v784_v51, 0.0  ;;  %v904_v59 = vadd.f32 %v2143_v34, %v903_v56  ;;  %v975_v0 = vmax.f32 %v901_v50, 0.0 }
 0x124   : > { %v978_v62 = vmax.f32 %v912_v54, 0.0  ;;  %v944_v63 = vmax.f32 %v776_v55, 0.0 }
 0x125   : > { %v1721_v1 = vpack.c.bf16 %v946_v58, %v945_v57  ;;  %v976_v2 = vmax.f32 %v904_v59, 0.0 }
 0x126   : > { %v1801_v3 = vpack.c.bf16 %v978_v62, %v977_v60  ;;  %v1716_v4 = vpack.c.bf16 %v944_v63, %v943_v61 }
 0x127   : > { %1817 = vst [vmem:[%s2158_s29 + $0x78] sm:$0xff] %v1721_v1   ;;  %v1796_v5 = vpack.c.bf16 %v976_v2, %v975_v0 }
 0x128   : > { %1833 = vst [vmem:[%s2158_s29 + $0xf8] sm:$0xff] %v1801_v3   ;;  %1816 = vst [vmem:[%s2158_s29 + $0x70] sm:$0xff] %v1716_v4  }
 0x129   : > { %1832 = vst [vmem:[%s2158_s29 + $0xf0] sm:$0xff] %v1796_v5  }
 0x12a PF: > { %s13_s14 = sadd.s32 1, %s2020_s14   ;;  %s2261_s12 = smov %s2016_s13 }
 0x12b   : > { %p10_p5 = scmp.ge.s32.totalorder %s13_s14, 6   ;;  %s2262_s13 = smov %s2264_s15 }
 0x12d   :  { %12 = sbr.rel (!%p10_p5) target bundleno = 2 (0x2), region = 68 }

// kernel: deeplab3_forward.13
= control target key start
LH: loop header
LB: loop body
LE: loop exit
PB: predicated region body
PF: predicated region fallthrough
CT: control target
= control target key end

     0   :  { %v1769_v0 = vmov 0   ;;  %vm446_vm0 = vcmask 130048   ;;  %s2206_s1 = inlined_call_operand.vmem [shape: bf16[1,144,128], index: 1, kind: input, shape index: {}]   ;;  %s2207_s0 = inlined_call_operand.vmem [shape: bf16[1,512,144], index: 0, kind: input, shape index: {}]   ;;  %s2208_s2 = inlined_call_operand.vmem [shape: f32[1,1,128], index: 2, kind: input, shape index: {}]   ;;  %s2209_s3 = inlined_call_operand.vmem [shape: bf16[1,512,128], index: 3, kind: output, shape index: {}]  }
   0x1   :  { %543 = vmatprep.subr.bf16.mxu0 %v1769_v0  ;;  %1645 = vmatprep.subr.bf16.mxu1 %v1769_v0  ;;  %v1664_v1 = vld [vmem:[%s2206_s1] sm:$0xff]   ;;  %v1665_v2 = vld [vmem:[%s2206_s1 + $0x8] sm:$0xff]   ;;  %v1666_v3 = vld [vmem:[%s2206_s1 + $0x10] sm:$0xff]  }
   0x2   :  { %544 = vmatpush1.bf16.msra.mxu0 %v1664_v1  ;;  %1654 = vmatpush1.bf16.msra.mxu1 %v1664_v1  ;;  %v1667_v4 = vld [vmem:[%s2206_s1 + $0x18] sm:$0xff]   ;;  %v1675_v5 = vld [vmem:[%s2207_s0 + $0x4] ss:$8 sps:$4 sm:$0xff]   ;;  %v1670_v9 = vld [vmem:[%s2206_s1 + $0x30] sm:$0xff]  }
   0x3   :  { %545 = vmatprep.subr.bf16.mxu0 %v1769_v0  ;;  %1646 = vmatprep.subr.bf16.mxu1 %v1769_v0  ;;  %v1678_v6 = vld [vmem:[%s2207_s0 + $0x104] ss:$8 sps:$4 sm:$0xff]   ;;  %v1671_v10 = vld [vmem:[%s2206_s1 + $0x38] sm:$0xff]   ;;  %v1673_v12 = vld [vmem:[%s2207_s0] ss:$8 sps:$4 sm:$0xff]  }
   0x4   :  { %1294 = vmatprep.mubr.msk.bf16.mxu0 %vm446_vm0, %v1675_v5  ;;  %1310 = vmatprep.mubr.msk.bf16.mxu1 %vm446_vm0, %v1678_v6  ;;  %v1668_v7 = vld [vmem:[%s2206_s1 + $0x20] sm:$0xff]   ;;  %v1669_v8 = vld [vmem:[%s2206_s1 + $0x28] sm:$0xff]   ;;  %v1679_v14 = vld [vmem:[%s2207_s0 + $0x14] ss:$8 sps:$4 sm:$0xff]  }
   0x5   :  { %v1672_v11 = vld [vmem:[%s2206_s1 + $0x40] sm:$0xff]   ;;  %v1681_v15 = vld [vmem:[%s2207_s0 + $0x114] ss:$8 sps:$4 sm:$0xff]   ;;  %v1683_v16 = vld [vmem:[%s2207_s0 + $0x10] ss:$8 sps:$4 sm:$0xff]  }
   0x6   :  { %546 = vmatpush1.bf16.msra.mxu0 %v1665_v2  ;;  %1655 = vmatpush1.bf16.msra.mxu1 %v1665_v2  ;;  %v1676_v13 = vld [vmem:[%s2207_s0 + $0x100] ss:$8 sps:$4 sm:$0xff]   ;;  %v1684_v17 = vld [vmem:[%s2207_s0 + $0x110] ss:$8 sps:$4 sm:$0xff]   ;;  %v1685_v18 = vld [vmem:[%s2207_s0 + $0x24] ss:$8 sps:$4 sm:$0xff]  }
   0x7   :  { %547 = vmatprep.subr.bf16.mxu0 %v1769_v0  ;;  %1647 = vmatprep.subr.bf16.mxu1 %v1769_v0  ;;  %v1687_v19 = vld [vmem:[%s2207_s0 + $0x124] ss:$8 sps:$4 sm:$0xff]   ;;  %v1689_v20 = vld [vmem:[%s2207_s0 + $0x20] ss:$8 sps:$4 sm:$0xff]   ;;  %v1691_v22 = vld [vmem:[%s2207_s0 + $0x34] ss:$8 sps:$4 sm:$0xff]  }
   0x8   :  { %v1690_v21 = vld [vmem:[%s2207_s0 + $0x120] ss:$8 sps:$4 sm:$0xff]   ;;  %v1693_v23 = vld [vmem:[%s2207_s0 + $0x134] ss:$8 sps:$4 sm:$0xff]   ;;  %v1695_v24 = vld [vmem:[%s2207_s0 + $0x30] ss:$8 sps:$4 sm:$0xff]  }
   0x9   :  { %v1696_v25 = vld [vmem:[%s2207_s0 + $0x130] ss:$8 sps:$4 sm:$0xff]   ;;  %v1697_v26 = vld [vmem:[%s2207_s0 + $0x44] ss:$8 sps:$4 sm:$0xff]   ;;  %v1701_v28 = vld [vmem:[%s2207_s0 + $0x40] ss:$8 sps:$4 sm:$0xff]  }
   0xa   :  { %548 = vmatpush1.bf16.msra.mxu0 %v1666_v3  ;;  %1656 = vmatpush1.bf16.msra.mxu1 %v1666_v3  ;;  %v1699_v27 = vld [vmem:[%s2207_s0 + $0x144] ss:$8 sps:$4 sm:$0xff]   ;;  %v1702_v29 = vld [vmem:[%s2207_s0 + $0x140] ss:$8 sps:$4 sm:$0xff]   ;;  %v1703_v30 = vld [vmem:[%s2207_s0 + $0x54] ss:$8 sps:$4 sm:$0xff]  }
   0xb   :  { %549 = vmatprep.subr.bf16.mxu0 %v1769_v0  ;;  %1648 = vmatprep.subr.bf16.mxu1 %v1769_v0  ;;  %v1705_v31 = vld [vmem:[%s2207_s0 + $0x154] ss:$8 sps:$4 sm:$0xff]   ;;  %v1707_v32 = vld [vmem:[%s2207_s0 + $0x50] ss:$8 sps:$4 sm:$0xff]   ;;  %v1709_v34 = vld [vmem:[%s2207_s0 + $0x64] ss:$8 sps:$4 sm:$0xff]  }
   0xc   :  { %v1708_v33 = vld [vmem:[%s2207_s0 + $0x150] ss:$8 sps:$4 sm:$0xff]   ;;  %v1711_v35 = vld [vmem:[%s2207_s0 + $0x164] ss:$8 sps:$4 sm:$0xff]   ;;  %v1713_v36 = vld [vmem:[%s2207_s0 + $0x60] ss:$8 sps:$4 sm:$0xff]  }
   0xd   :  { %v1714_v37 = vld [vmem:[%s2207_s0 + $0x160] ss:$8 sps:$4 sm:$0xff]   ;;  %v1715_v38 = vld [vmem:[%s2207_s0 + $0x74] ss:$8 sps:$4 sm:$0xff]   ;;  %v1719_v40 = vld [vmem:[%s2207_s0 + $0x70] ss:$8 sps:$4 sm:$0xff]  }
   0xe   :  { %550 = vmatpush1.bf16.msra.mxu0 %v1667_v4  ;;  %1657 = vmatpush1.bf16.msra.mxu1 %v1667_v4  ;;  %v1717_v39 = vld [vmem:[%s2207_s0 + $0x174] ss:$8 sps:$4 sm:$0xff]   ;;  %v1720_v41 = vld [vmem:[%s2207_s0 + $0x170] ss:$8 sps:$4 sm:$0xff]   ;;  %v1721_v42 = vld [vmem:[%s2207_s0 + $0x84] ss:$8 sps:$4 sm:$0xff]  }
   0xf   :  { %551 = vmatprep.subr.bf16.mxu0 %v1769_v0  ;;  %1649 = vmatprep.subr.bf16.mxu1 %v1769_v0  ;;  %v1723_v43 = vld [vmem:[%s2207_s0 + $0x184] ss:$8 sps:$4 sm:$0xff]   ;;  %v1725_v44 = vld [vmem:[%s2207_s0 + $0x80] ss:$8 sps:$4 sm:$0xff]   ;;  %v1727_v46 = vld [vmem:[%s2207_s0 + $0x94] ss:$8 sps:$4 sm:$0xff]  }
  0x10   :  { %v1726_v45 = vld [vmem:[%s2207_s0 + $0x180] ss:$8 sps:$4 sm:$0xff]   ;;  %v1729_v47 = vld [vmem:[%s2207_s0 + $0x194] ss:$8 sps:$4 sm:$0xff]   ;;  %v1731_v48 = vld [vmem:[%s2207_s0 + $0x90] ss:$8 sps:$4 sm:$0xff]  }
  0x11   :  { %v1732_v49 = vld [vmem:[%s2207_s0 + $0x190] ss:$8 sps:$4 sm:$0xff]   ;;  %v1733_v50 = vld [vmem:[%s2207_s0 + $0xa4] ss:$8 sps:$4 sm:$0xff]   ;;  %v1737_v52 = vld [vmem:[%s2207_s0 + $0xa0] ss:$8 sps:$4 sm:$0xff]  }
  0x12   :  { %552 = vmatpush1.bf16.msra.mxu0 %v1668_v7  ;;  %1658 = vmatpush1.bf16.msra.mxu1 %v1668_v7  ;;  %v1735_v51 = vld [vmem:[%s2207_s0 + $0x1a4] ss:$8 sps:$4 sm:$0xff]   ;;  %v1738_v53 = vld [vmem:[%s2207_s0 + $0x1a0] ss:$8 sps:$4 sm:$0xff]   ;;  %v1739_v54 = vld [vmem:[%s2207_s0 + $0xb4] ss:$8 sps:$4 sm:$0xff]  }
  0x13   :  { %553 = vmatprep.subr.bf16.mxu0 %v1769_v0  ;;  %1650 = vmatprep.subr.bf16.mxu1 %v1769_v0  ;;  %v1741_v55 = vld [vmem:[%s2207_s0 + $0x1b4] ss:$8 sps:$4 sm:$0xff]   ;;  %v1743_v56 = vld [vmem:[%s2207_s0 + $0xb0] ss:$8 sps:$4 sm:$0xff]   ;;  %v1745_v58 = vld [vmem:[%s2207_s0 + $0xc4] ss:$8 sps:$4 sm:$0xff]  }
  0x14   :  { %v1744_v57 = vld [vmem:[%s2207_s0 + $0x1b0] ss:$8 sps:$4 sm:$0xff]   ;;  %v1747_v59 = vld [vmem:[%s2207_s0 + $0x1c4] ss:$8 sps:$4 sm:$0xff]   ;;  %v1749_v60 = vld [vmem:[%s2207_s0 + $0xc0] ss:$8 sps:$4 sm:$0xff]  }
  0x15   :  { %v1750_v61 = vld [vmem:[%s2207_s0 + $0x1c0] ss:$8 sps:$4 sm:$0xff]   ;;  %v1751_v62 = vld [vmem:[%s2207_s0 + $0xd4] ss:$8 sps:$4 sm:$0xff]   ;;  %v1756_v1 = vld [vmem:[%s2207_s0 + $0x1d0] ss:$8 sps:$4 sm:$0xff]  }
  0x16   :  { %554 = vmatpush1.bf16.msra.mxu0 %v1669_v8  ;;  %1659 = vmatpush1.bf16.msra.mxu1 %v1669_v8  ;;  %v1753_v63 = vld [vmem:[%s2207_s0 + $0x1d4] ss:$8 sps:$4 sm:$0xff]   ;;  %v1757_v2 = vld [vmem:[%s2207_s0 + $0xe4] ss:$8 sps:$4 sm:$0xff]   ;;  %v1761_v4 = vld [vmem:[%s2207_s0 + $0xe0] ss:$8 sps:$4 sm:$0xff]  }
  0x17   :  { %555 = vmatprep.subr.bf16.mxu0 %v1769_v0  ;;  %1651 = vmatprep.subr.bf16.mxu1 %v1769_v0  ;;  %v1759_v3 = vld [vmem:[%s2207_s0 + $0x1e4] ss:$8 sps:$4 sm:$0xff]   ;;  %v1762_v5 = vld [vmem:[%s2207_s0 + $0x1e0] ss:$8 sps:$4 sm:$0xff]   ;;  %v1763_v6 = vld [vmem:[%s2207_s0 + $0xf4] ss:$8 sps:$4 sm:$0xff]  }
  0x18   :  { %v1765_v7 = vld [vmem:[%s2207_s0 + $0x1f4] ss:$8 sps:$4 sm:$0xff]   ;;  %v1767_v8 = vld [vmem:[%s2207_s0 + $0xf0] ss:$8 sps:$4 sm:$0xff]  }
  0x1a   :  { %556 = vmatpush1.bf16.msra.mxu0 %v1670_v9  ;;  %1660 = vmatpush1.bf16.msra.mxu1 %v1670_v9  ;;  %v1768_v9 = vld [vmem:[%s2207_s0 + $0x1f0] ss:$8 sps:$4 sm:$0xff]  }
  0x1b   :  { %557 = vmatprep.subr.bf16.mxu0 %v1769_v0  ;;  %1652 = vmatprep.subr.bf16.mxu1 %v1769_v0 }
  0x1e   :  { %558 = vmatpush1.bf16.msra.mxu0 %v1671_v10  ;;  %1661 = vmatpush1.bf16.msra.mxu1 %v1671_v10  ;;  %v2044_v10 = vld [vmem:[%s2208_s2] ss:$0 sm:$0xff] }
  0x1f   :  { %559 = vmatprep.subr.bf16.mxu0 %v1769_v0  ;;  %1653 = vmatprep.subr.bf16.mxu1 %v1769_v0  ;;  %v1755_v0 = vld [vmem:[%s2207_s0 + $0xd0] ss:$8 sps:$4 sm:$0xff]  }
  0x22   :  { %560 = vmatpush1.bf16.msra.mxu0 %v1672_v11  ;;  %1662 = vmatpush1.bf16.msra.mxu1 %v1672_v11 }
  0x25   :  { %576 = vmatmul.mubr.bf16.vlgmr.msra.gmra.mrb[0].mxu0 %v1673_v12  ;;  %704 = vmatmul.mubr.bf16.vlgmr.msra.gmra.mrb[0].mxu1 %v1676_v13 }
  0x26   :  { %1295 = vmatprep.mubr.msk.bf16.mxu0 %vm446_vm0, %v1679_v14  ;;  %1311 = vmatprep.mubr.msk.bf16.mxu1 %vm446_vm0, %v1681_v15 }
  0x2d   :  { %584 = vmatmul.mubr.bf16.gmra.mrb[4].mxu0 %v1683_v16  ;;  %712 = vmatmul.mubr.bf16.gmra.mrb[4].mxu1 %v1684_v17 }
  0x2e   :  { %1296 = vmatprep.mubr.msk.bf16.mxu0 %vm446_vm0, %v1685_v18  ;;  %1312 = vmatprep.mubr.msk.bf16.mxu1 %vm446_vm0, %v1687_v19 }
  0x35   :  { %592 = vmatmul.mubr.bf16.gmra.mrb[8].mxu0 %v1689_v20  ;;  %720 = vmatmul.mubr.bf16.gmra.mrb[8].mxu1 %v1690_v21 }
  0x36   :  { %1297 = vmatprep.mubr.msk.bf16.mxu0 %vm446_vm0, %v1691_v22  ;;  %1313 = vmatprep.mubr.msk.bf16.mxu1 %vm446_vm0, %v1693_v23 }
  0x3d   :  { %600 = vmatmul.mubr.bf16.gmra.mrb[12].mxu0 %v1695_v24  ;;  %728 = vmatmul.mubr.bf16.gmra.mrb[12].mxu1 %v1696_v25 }
  0x3e   :  { %1298 = vmatprep.mubr.msk.bf16.mxu0 %vm446_vm0, %v1697_v26  ;;  %1314 = vmatprep.mubr.msk.bf16.mxu1 %vm446_vm0, %v1699_v27 }
  0x45   :  { %608 = vmatmul.mubr.bf16.gmra.mrb[16].mxu0 %v1701_v28  ;;  %736 = vmatmul.mubr.bf16.gmra.mrb[16].mxu1 %v1702_v29 }
  0x46   :  { %1299 = vmatprep.mubr.msk.bf16.mxu0 %vm446_vm0, %v1703_v30  ;;  %1315 = vmatprep.mubr.msk.bf16.mxu1 %vm446_vm0, %v1705_v31 }
  0x4d   :  { %616 = vmatmul.mubr.bf16.gmra.mrb[20].mxu0 %v1707_v32  ;;  %744 = vmatmul.mubr.bf16.gmra.mrb[20].mxu1 %v1708_v33 }
  0x4e   :  { %1300 = vmatprep.mubr.msk.bf16.mxu0 %vm446_vm0, %v1709_v34  ;;  %1316 = vmatprep.mubr.msk.bf16.mxu1 %vm446_vm0, %v1711_v35 }
  0x55   :  { %624 = vmatmul.mubr.bf16.gmra.mrb[24].mxu0 %v1713_v36  ;;  %752 = vmatmul.mubr.bf16.gmra.mrb[24].mxu1 %v1714_v37 }
  0x56   :  { %1301 = vmatprep.mubr.msk.bf16.mxu0 %vm446_vm0, %v1715_v38  ;;  %1317 = vmatprep.mubr.msk.bf16.mxu1 %vm446_vm0, %v1717_v39 }
  0x5d   :  { %632 = vmatmul.mubr.bf16.gmra.mrb[28].mxu0 %v1719_v40  ;;  %760 = vmatmul.mubr.bf16.gmra.mrb[28].mxu1 %v1720_v41 }
  0x5e   :  { %1302 = vmatprep.mubr.msk.bf16.mxu0 %vm446_vm0, %v1721_v42  ;;  %1318 = vmatprep.mubr.msk.bf16.mxu1 %vm446_vm0, %v1723_v43 }
  0x65   :  { %640 = vmatmul.mubr.bf16.gmra.mrb[32].mxu0 %v1725_v44  ;;  %768 = vmatmul.mubr.bf16.gmra.mrb[32].mxu1 %v1726_v45 }
  0x66   :  { %1303 = vmatprep.mubr.msk.bf16.mxu0 %vm446_vm0, %v1727_v46  ;;  %1319 = vmatprep.mubr.msk.bf16.mxu1 %vm446_vm0, %v1729_v47 }
  0x6d   :  { %648 = vmatmul.mubr.bf16.gmra.mrb[36].mxu0 %v1731_v48  ;;  %776 = vmatmul.mubr.bf16.gmra.mrb[36].mxu1 %v1732_v49 }
  0x6e   :  { %1304 = vmatprep.mubr.msk.bf16.mxu0 %vm446_vm0, %v1733_v50  ;;  %1320 = vmatprep.mubr.msk.bf16.mxu1 %vm446_vm0, %v1735_v51 }
  0x75   :  { %656 = vmatmul.mubr.bf16.gmra.mrb[40].mxu0 %v1737_v52  ;;  %784 = vmatmul.mubr.bf16.gmra.mrb[40].mxu1 %v1738_v53 }
  0x76   :  { %1305 = vmatprep.mubr.msk.bf16.mxu0 %vm446_vm0, %v1739_v54  ;;  %1321 = vmatprep.mubr.msk.bf16.mxu1 %vm446_vm0, %v1741_v55 }
  0x7d   :  { %664 = vmatmul.mubr.bf16.gmra.mrb[44].mxu0 %v1743_v56  ;;  %792 = vmatmul.mubr.bf16.gmra.mrb[44].mxu1 %v1744_v57 }
  0x7e   :  { %1306 = vmatprep.mubr.msk.bf16.mxu0 %vm446_vm0, %v1745_v58  ;;  %1322 = vmatprep.mubr.msk.bf16.mxu1 %vm446_vm0, %v1747_v59 }
  0x85   :  { %672 = vmatmul.mubr.bf16.gmra.mrb[48].mxu0 %v1749_v60  ;;  %800 = vmatmul.mubr.bf16.gmra.mrb[48].mxu1 %v1750_v61 }
  0x86   :  { %1307 = vmatprep.mubr.msk.bf16.mxu0 %vm446_vm0, %v1751_v62  ;;  %1323 = vmatprep.mubr.msk.bf16.mxu1 %vm446_vm0, %v1753_v63 }
  0x8d   :  { %680 = vmatmul.mubr.bf16.gmra.mrb[52].mxu0 %v1755_v0  ;;  %808 = vmatmul.mubr.bf16.gmra.mrb[52].mxu1 %v1756_v1 }
  0x8e   :  { %1308 = vmatprep.mubr.msk.bf16.mxu0 %vm446_vm0, %v1757_v2  ;;  %1324 = vmatprep.mubr.msk.bf16.mxu1 %vm446_vm0, %v1759_v3 }
  0x95   :  { %688 = vmatmul.mubr.bf16.gmra.mrb[56].mxu0 %v1761_v4  ;;  %816 = vmatmul.mubr.bf16.gmra.mrb[56].mxu1 %v1762_v5 }
  0x96   :  { %1309 = vmatprep.mubr.msk.bf16.mxu0 %vm446_vm0, %v1763_v6  ;;  %1325 = vmatprep.mubr.msk.bf16.mxu1 %vm446_vm0, %v1765_v7 }
  0x9d   :  { %696 = vmatmul.mubr.bf16.gmra.mrb[60].mxu0 %v1767_v8  ;;  %824 = vmatmul.mubr.bf16.gmra.mrb[60].mxu1 %v1768_v9 }
  0xf8   :  { %v577_v11 = vpop.f32.mrb[0].mxu0  ;;  %v705_v12 = vpop.f32.mrb[0].mxu1 }
  0xf9   :  { %v578_v13 = vadd.f32 %v2044_v10, %v577_v11  ;;  %v706_v14 = vadd.f32 %v2044_v10, %v705_v12  ;;  %v579_v15 = vpop.f32.mrb[1].mxu0  ;;  %v707_v16 = vpop.f32.mrb[1].mxu1 }
  0xfa   :  { %v580_v17 = vpop.f32.mrb[2].mxu0  ;;  %v708_v18 = vpop.f32.mrb[2].mxu1 }
  0xfb   :  { %v581_v19 = vadd.f32 %v2044_v10, %v580_v17  ;;  %v709_v20 = vadd.f32 %v2044_v10, %v708_v18  ;;  %v582_v21 = vpop.f32.mrb[3].mxu0  ;;  %v710_v22 = vpop.f32.mrb[3].mxu1  ;;  %v832_v23 = vmax.f32 %v578_v13, 0.0  ;;  %v864_v24 = vmax.f32 %v706_v14, 0.0 }
  0xfd   :  { %v833_v25 = vmax.f32 %v581_v19, 0.0  ;;  %v865_v26 = vmax.f32 %v709_v20, 0.0 }
  0xff   :  { %v1457_v27 = vpack.c.bf16 %v833_v25, %v832_v23  ;;  %v1537_v28 = vpack.c.bf16 %v865_v26, %v864_v24 }
 0x100   :  { %v585_v29 = vpop.f32.mrb[4].mxu0  ;;  %v713_v30 = vpop.f32.mrb[4].mxu1 }
 0x101   :  { %1458 = vst [vmem:[%s2209_s3] sm:$0xff] %v1457_v27   ;;  %1629 = vst [vmem:[%s2209_s3 + $0x80] sm:$0xff] %v1537_v28   ;;  %v586_v31 = vadd.f32 %v2044_v10, %v585_v29  ;;  %v714_v32 = vadd.f32 %v2044_v10, %v713_v30  ;;  %v587_v33 = vpop.f32.mrb[5].mxu0  ;;  %v715_v34 = vpop.f32.mrb[5].mxu1 }
 0x102   :  { %v588_v35 = vpop.f32.mrb[6].mxu0  ;;  %v716_v36 = vpop.f32.mrb[6].mxu1 }
 0x103   :  { %v589_v37 = vadd.f32 %v2044_v10, %v588_v35  ;;  %v717_v38 = vadd.f32 %v2044_v10, %v716_v36  ;;  %v590_v39 = vpop.f32.mrb[7].mxu0  ;;  %v718_v40 = vpop.f32.mrb[7].mxu1  ;;  %v834_v41 = vmax.f32 %v586_v31, 0.0  ;;  %v866_v42 = vmax.f32 %v714_v32, 0.0 }
 0x105   :  { %v835_v43 = vmax.f32 %v589_v37, 0.0  ;;  %v867_v44 = vmax.f32 %v717_v38, 0.0 }
 0x107   :  { %v1462_v45 = vpack.c.bf16 %v835_v43, %v834_v41  ;;  %v1542_v46 = vpack.c.bf16 %v867_v44, %v866_v42 }
 0x108   :  { %v593_v47 = vpop.f32.mrb[8].mxu0  ;;  %v721_v48 = vpop.f32.mrb[8].mxu1 }
 0x109   :  { %1614 = vst [vmem:[%s2209_s3 + $0x8] sm:$0xff] %v1462_v45   ;;  %1630 = vst [vmem:[%s2209_s3 + $0x88] sm:$0xff] %v1542_v46   ;;  %v594_v49 = vadd.f32 %v2044_v10, %v593_v47  ;;  %v722_v50 = vadd.f32 %v2044_v10, %v721_v48  ;;  %v595_v51 = vpop.f32.mrb[9].mxu0  ;;  %v723_v52 = vpop.f32.mrb[9].mxu1 }
 0x10a   :  { %v596_v53 = vpop.f32.mrb[10].mxu0  ;;  %v724_v54 = vpop.f32.mrb[10].mxu1 }
 0x10b   :  { %v597_v55 = vadd.f32 %v2044_v10, %v596_v53  ;;  %v725_v56 = vadd.f32 %v2044_v10, %v724_v54  ;;  %v598_v57 = vpop.f32.mrb[11].mxu0  ;;  %v726_v58 = vpop.f32.mrb[11].mxu1  ;;  %v836_v59 = vmax.f32 %v594_v49, 0.0  ;;  %v868_v60 = vmax.f32 %v722_v50, 0.0 }
 0x10d   :  { %v837_v61 = vmax.f32 %v597_v55, 0.0  ;;  %v869_v62 = vmax.f32 %v725_v56, 0.0 }
 0x10f   :  { %v1467_v63 = vpack.c.bf16 %v837_v61, %v836_v59  ;;  %v1547_v0 = vpack.c.bf16 %v869_v62, %v868_v60 }
 0x110   :  { %v601_v1 = vpop.f32.mrb[12].mxu0  ;;  %v729_v2 = vpop.f32.mrb[12].mxu1 }
 0x111   :  { %1615 = vst [vmem:[%s2209_s3 + $0x10] sm:$0xff] %v1467_v63   ;;  %1631 = vst [vmem:[%s2209_s3 + $0x90] sm:$0xff] %v1547_v0   ;;  %v602_v3 = vadd.f32 %v2044_v10, %v601_v1  ;;  %v730_v4 = vadd.f32 %v2044_v10, %v729_v2  ;;  %v603_v5 = vpop.f32.mrb[13].mxu0  ;;  %v731_v6 = vpop.f32.mrb[13].mxu1 }
 0x112   :  { %v604_v7 = vpop.f32.mrb[14].mxu0  ;;  %v732_v8 = vpop.f32.mrb[14].mxu1 }
 0x113   :  { %v605_v9 = vadd.f32 %v2044_v10, %v604_v7  ;;  %v733_v11 = vadd.f32 %v2044_v10, %v732_v8  ;;  %v606_v12 = vpop.f32.mrb[15].mxu0  ;;  %v734_v13 = vpop.f32.mrb[15].mxu1  ;;  %v838_v14 = vmax.f32 %v602_v3, 0.0  ;;  %v870_v15 = vmax.f32 %v730_v4, 0.0 }
 0x115   :  { %v839_v16 = vmax.f32 %v605_v9, 0.0  ;;  %v871_v17 = vmax.f32 %v733_v11, 0.0 }
 0x117   :  { %v1472_v18 = vpack.c.bf16 %v839_v16, %v838_v14  ;;  %v1552_v19 = vpack.c.bf16 %v871_v17, %v870_v15 }
 0x118   :  { %v609_v20 = vpop.f32.mrb[16].mxu0  ;;  %v737_v21 = vpop.f32.mrb[16].mxu1 }
 0x119   :  { %1616 = vst [vmem:[%s2209_s3 + $0x18] sm:$0xff] %v1472_v18   ;;  %1632 = vst [vmem:[%s2209_s3 + $0x98] sm:$0xff] %v1552_v19   ;;  %v610_v22 = vadd.f32 %v2044_v10, %v609_v20  ;;  %v738_v23 = vadd.f32 %v2044_v10, %v737_v21  ;;  %v611_v24 = vpop.f32.mrb[17].mxu0  ;;  %v739_v25 = vpop.f32.mrb[17].mxu1 }
 0x11a   :  { %v612_v26 = vpop.f32.mrb[18].mxu0  ;;  %v740_v27 = vpop.f32.mrb[18].mxu1 }
 0x11b   :  { %v613_v28 = vadd.f32 %v2044_v10, %v612_v26  ;;  %v741_v29 = vadd.f32 %v2044_v10, %v740_v27  ;;  %v614_v30 = vpop.f32.mrb[19].mxu0  ;;  %v742_v31 = vpop.f32.mrb[19].mxu1  ;;  %v840_v32 = vmax.f32 %v610_v22, 0.0  ;;  %v872_v33 = vmax.f32 %v738_v23, 0.0 }
 0x11d   :  { %v841_v34 = vmax.f32 %v613_v28, 0.0  ;;  %v873_v35 = vmax.f32 %v741_v29, 0.0 }
 0x11f   :  { %v1477_v36 = vpack.c.bf16 %v841_v34, %v840_v32  ;;  %v1557_v37 = vpack.c.bf16 %v873_v35, %v872_v33 }
 0x120   :  { %v617_v38 = vpop.f32.mrb[20].mxu0  ;;  %v745_v39 = vpop.f32.mrb[20].mxu1 }
 0x121   :  { %1617 = vst [vmem:[%s2209_s3 + $0x20] sm:$0xff] %v1477_v36   ;;  %1633 = vst [vmem:[%s2209_s3 + $0xa0] sm:$0xff] %v1557_v37   ;;  %v618_v40 = vadd.f32 %v2044_v10, %v617_v38  ;;  %v746_v41 = vadd.f32 %v2044_v10, %v745_v39  ;;  %v619_v42 = vpop.f32.mrb[21].mxu0  ;;  %v747_v43 = vpop.f32.mrb[21].mxu1 }
 0x122   :  { %v620_v44 = vpop.f32.mrb[22].mxu0  ;;  %v748_v45 = vpop.f32.mrb[22].mxu1 }
 0x123   :  { %v621_v46 = vadd.f32 %v2044_v10, %v620_v44  ;;  %v749_v47 = vadd.f32 %v2044_v10, %v748_v45  ;;  %v622_v48 = vpop.f32.mrb[23].mxu0  ;;  %v750_v49 = vpop.f32.mrb[23].mxu1  ;;  %v842_v50 = vmax.f32 %v618_v40, 0.0  ;;  %v874_v51 = vmax.f32 %v746_v41, 0.0 }
 0x125   :  { %v843_v52 = vmax.f32 %v621_v46, 0.0  ;;  %v875_v53 = vmax.f32 %v749_v47, 0.0 }
 0x127   :  { %v1482_v54 = vpack.c.bf16 %v843_v52, %v842_v50  ;;  %v1562_v55 = vpack.c.bf16 %v875_v53, %v874_v51 }
 0x128   :  { %v625_v56 = vpop.f32.mrb[24].mxu0  ;;  %v753_v57 = vpop.f32.mrb[24].mxu1 }
 0x129   :  { %1618 = vst [vmem:[%s2209_s3 + $0x28] sm:$0xff] %v1482_v54   ;;  %1634 = vst [vmem:[%s2209_s3 + $0xa8] sm:$0xff] %v1562_v55   ;;  %v626_v58 = vadd.f32 %v2044_v10, %v625_v56  ;;  %v754_v59 = vadd.f32 %v2044_v10, %v753_v57  ;;  %v627_v60 = vpop.f32.mrb[25].mxu0  ;;  %v755_v61 = vpop.f32.mrb[25].mxu1 }
 0x12a   :  { %v628_v62 = vpop.f32.mrb[26].mxu0  ;;  %v756_v63 = vpop.f32.mrb[26].mxu1 }
 0x12b   :  { %v629_v0 = vadd.f32 %v2044_v10, %v628_v62  ;;  %v757_v1 = vadd.f32 %v2044_v10, %v756_v63  ;;  %v630_v2 = vpop.f32.mrb[27].mxu0  ;;  %v758_v3 = vpop.f32.mrb[27].mxu1  ;;  %v844_v4 = vmax.f32 %v626_v58, 0.0  ;;  %v876_v5 = vmax.f32 %v754_v59, 0.0 }
 0x12d   :  { %v845_v6 = vmax.f32 %v629_v0, 0.0  ;;  %v877_v7 = vmax.f32 %v757_v1, 0.0 }
 0x12f   :  { %v1487_v8 = vpack.c.bf16 %v845_v6, %v844_v4  ;;  %v1567_v9 = vpack.c.bf16 %v877_v7, %v876_v5 }
 0x130   :  { %v633_v11 = vpop.f32.mrb[28].mxu0  ;;  %v761_v12 = vpop.f32.mrb[28].mxu1 }
 0x131   :  { %1619 = vst [vmem:[%s2209_s3 + $0x30] sm:$0xff] %v1487_v8   ;;  %1635 = vst [vmem:[%s2209_s3 + $0xb0] sm:$0xff] %v1567_v9   ;;  %v634_v13 = vadd.f32 %v2044_v10, %v633_v11  ;;  %v762_v14 = vadd.f32 %v2044_v10, %v761_v12  ;;  %v635_v15 = vpop.f32.mrb[29].mxu0  ;;  %v763_v16 = vpop.f32.mrb[29].mxu1 }
 0x132   :  { %v636_v17 = vpop.f32.mrb[30].mxu0  ;;  %v764_v18 = vpop.f32.mrb[30].mxu1 }
 0x133   :  { %v637_v19 = vadd.f32 %v2044_v10, %v636_v17  ;;  %v765_v20 = vadd.f32 %v2044_v10, %v764_v18  ;;  %v638_v21 = vpop.f32.mrb[31].mxu0  ;;  %v766_v22 = vpop.f32.mrb[31].mxu1  ;;  %v846_v23 = vmax.f32 %v634_v13, 0.0  ;;  %v878_v24 = vmax.f32 %v762_v14, 0.0 }
 0x135   :  { %v847_v25 = vmax.f32 %v637_v19, 0.0  ;;  %v879_v26 = vmax.f32 %v765_v20, 0.0 }
 0x137   :  { %v1492_v27 = vpack.c.bf16 %v847_v25, %v846_v23  ;;  %v1572_v28 = vpack.c.bf16 %v879_v26, %v878_v24 }
 0x138   :  { %v641_v29 = vpop.f32.mrb[32].mxu0  ;;  %v769_v30 = vpop.f32.mrb[32].mxu1 }
 0x139   :  { %1620 = vst [vmem:[%s2209_s3 + $0x38] sm:$0xff] %v1492_v27   ;;  %1636 = vst [vmem:[%s2209_s3 + $0xb8] sm:$0xff] %v1572_v28   ;;  %v642_v31 = vadd.f32 %v2044_v10, %v641_v29  ;;  %v770_v32 = vadd.f32 %v2044_v10, %v769_v30  ;;  %v643_v33 = vpop.f32.mrb[33].mxu0  ;;  %v771_v34 = vpop.f32.mrb[33].mxu1 }
 0x13a   :  { %v644_v35 = vpop.f32.mrb[34].mxu0  ;;  %v772_v36 = vpop.f32.mrb[34].mxu1 }
 0x13b   :  { %v645_v37 = vadd.f32 %v2044_v10, %v644_v35  ;;  %v773_v38 = vadd.f32 %v2044_v10, %v772_v36  ;;  %v646_v39 = vpop.f32.mrb[35].mxu0  ;;  %v774_v40 = vpop.f32.mrb[35].mxu1  ;;  %v848_v41 = vmax.f32 %v642_v31, 0.0  ;;  %v880_v42 = vmax.f32 %v770_v32, 0.0 }
 0x13d   :  { %v849_v43 = vmax.f32 %v645_v37, 0.0  ;;  %v881_v44 = vmax.f32 %v773_v38, 0.0 }
 0x13f   :  { %v1497_v45 = vpack.c.bf16 %v849_v43, %v848_v41  ;;  %v1577_v46 = vpack.c.bf16 %v881_v44, %v880_v42 }
 0x140   :  { %v649_v47 = vpop.f32.mrb[36].mxu0  ;;  %v777_v48 = vpop.f32.mrb[36].mxu1 }
 0x141   :  { %1621 = vst [vmem:[%s2209_s3 + $0x40] sm:$0xff] %v1497_v45   ;;  %1637 = vst [vmem:[%s2209_s3 + $0xc0] sm:$0xff] %v1577_v46   ;;  %v650_v49 = vadd.f32 %v2044_v10, %v649_v47  ;;  %v778_v50 = vadd.f32 %v2044_v10, %v777_v48  ;;  %v651_v51 = vpop.f32.mrb[37].mxu0  ;;  %v779_v52 = vpop.f32.mrb[37].mxu1 }
 0x142   :  { %v652_v53 = vpop.f32.mrb[38].mxu0  ;;  %v780_v54 = vpop.f32.mrb[38].mxu1 }
 0x143   :  { %v653_v55 = vadd.f32 %v2044_v10, %v652_v53  ;;  %v781_v56 = vadd.f32 %v2044_v10, %v780_v54  ;;  %v654_v57 = vpop.f32.mrb[39].mxu0  ;;  %v782_v58 = vpop.f32.mrb[39].mxu1  ;;  %v850_v59 = vmax.f32 %v650_v49, 0.0  ;;  %v882_v60 = vmax.f32 %v778_v50, 0.0 }
 0x145   :  { %v851_v61 = vmax.f32 %v653_v55, 0.0  ;;  %v883_v62 = vmax.f32 %v781_v56, 0.0 }
 0x147   :  { %v1502_v63 = vpack.c.bf16 %v851_v61, %v850_v59  ;;  %v1582_v0 = vpack.c.bf16 %v883_v62, %v882_v60 }
 0x148   :  { %v657_v1 = vpop.f32.mrb[40].mxu0  ;;  %v785_v2 = vpop.f32.mrb[40].mxu1 }
 0x149   :  { %1622 = vst [vmem:[%s2209_s3 + $0x48] sm:$0xff] %v1502_v63   ;;  %1638 = vst [vmem:[%s2209_s3 + $0xc8] sm:$0xff] %v1582_v0   ;;  %v658_v3 = vadd.f32 %v2044_v10, %v657_v1  ;;  %v786_v4 = vadd.f32 %v2044_v10, %v785_v2  ;;  %v659_v5 = vpop.f32.mrb[41].mxu0  ;;  %v787_v6 = vpop.f32.mrb[41].mxu1 }
 0x14a   :  { %v660_v7 = vpop.f32.mrb[42].mxu0  ;;  %v788_v8 = vpop.f32.mrb[42].mxu1 }
 0x14b   :  { %v661_v9 = vadd.f32 %v2044_v10, %v660_v7  ;;  %v789_v11 = vadd.f32 %v2044_v10, %v788_v8  ;;  %v662_v12 = vpop.f32.mrb[43].mxu0  ;;  %v790_v13 = vpop.f32.mrb[43].mxu1  ;;  %v852_v14 = vmax.f32 %v658_v3, 0.0  ;;  %v884_v15 = vmax.f32 %v786_v4, 0.0 }
 0x14d   :  { %v853_v16 = vmax.f32 %v661_v9, 0.0  ;;  %v885_v17 = vmax.f32 %v789_v11, 0.0 }
 0x14f   :  { %v1507_v18 = vpack.c.bf16 %v853_v16, %v852_v14  ;;  %v1587_v19 = vpack.c.bf16 %v885_v17, %v884_v15 }
 0x150   :  { %v665_v20 = vpop.f32.mrb[44].mxu0  ;;  %v793_v21 = vpop.f32.mrb[44].mxu1 }
 0x151   :  { %1623 = vst [vmem:[%s2209_s3 + $0x50] sm:$0xff] %v1507_v18   ;;  %1639 = vst [vmem:[%s2209_s3 + $0xd0] sm:$0xff] %v1587_v19   ;;  %v666_v22 = vadd.f32 %v2044_v10, %v665_v20  ;;  %v794_v23 = vadd.f32 %v2044_v10, %v793_v21  ;;  %v667_v24 = vpop.f32.mrb[45].mxu0  ;;  %v795_v25 = vpop.f32.mrb[45].mxu1 }
 0x152   :  { %v668_v26 = vpop.f32.mrb[46].mxu0  ;;  %v796_v27 = vpop.f32.mrb[46].mxu1 }
 0x153   :  { %v669_v28 = vadd.f32 %v2044_v10, %v668_v26  ;;  %v797_v29 = vadd.f32 %v2044_v10, %v796_v27  ;;  %v670_v30 = vpop.f32.mrb[47].mxu0  ;;  %v798_v31 = vpop.f32.mrb[47].mxu1  ;;  %v854_v32 = vmax.f32 %v666_v22, 0.0  ;;  %v886_v33 = vmax.f32 %v794_v23, 0.0 }
 0x155   :  { %v855_v34 = vmax.f32 %v669_v28, 0.0  ;;  %v887_v35 = vmax.f32 %v797_v29, 0.0 }
 0x157   :  { %v1512_v36 = vpack.c.bf16 %v855_v34, %v854_v32  ;;  %v1592_v37 = vpack.c.bf16 %v887_v35, %v886_v33 }
 0x158   :  { %v673_v38 = vpop.f32.mrb[48].mxu0  ;;  %v801_v39 = vpop.f32.mrb[48].mxu1 }
 0x159   :  { %1624 = vst [vmem:[%s2209_s3 + $0x58] sm:$0xff] %v1512_v36   ;;  %1640 = vst [vmem:[%s2209_s3 + $0xd8] sm:$0xff] %v1592_v37   ;;  %v674_v40 = vadd.f32 %v2044_v10, %v673_v38  ;;  %v802_v41 = vadd.f32 %v2044_v10, %v801_v39  ;;  %v675_v42 = vpop.f32.mrb[49].mxu0  ;;  %v803_v43 = vpop.f32.mrb[49].mxu1 }
 0x15a   :  { %v676_v44 = vpop.f32.mrb[50].mxu0  ;;  %v804_v45 = vpop.f32.mrb[50].mxu1 }
 0x15b   :  { %v677_v46 = vadd.f32 %v2044_v10, %v676_v44  ;;  %v805_v47 = vadd.f32 %v2044_v10, %v804_v45  ;;  %v678_v48 = vpop.f32.mrb[51].mxu0  ;;  %v806_v49 = vpop.f32.mrb[51].mxu1  ;;  %v856_v50 = vmax.f32 %v674_v40, 0.0  ;;  %v888_v51 = vmax.f32 %v802_v41, 0.0 }
 0x15d   :  { %v857_v52 = vmax.f32 %v677_v46, 0.0  ;;  %v889_v53 = vmax.f32 %v805_v47, 0.0 }
 0x15f   :  { %v1517_v54 = vpack.c.bf16 %v857_v52, %v856_v50  ;;  %v1597_v55 = vpack.c.bf16 %v889_v53, %v888_v51 }
 0x160   :  { %v681_v56 = vpop.f32.mrb[52].mxu0  ;;  %v809_v57 = vpop.f32.mrb[52].mxu1 }
 0x161   :  { %1625 = vst [vmem:[%s2209_s3 + $0x60] sm:$0xff] %v1517_v54   ;;  %1641 = vst [vmem:[%s2209_s3 + $0xe0] sm:$0xff] %v1597_v55   ;;  %v682_v58 = vadd.f32 %v2044_v10, %v681_v56  ;;  %v810_v59 = vadd.f32 %v2044_v10, %v809_v57  ;;  %v683_v60 = vpop.f32.mrb[53].mxu0  ;;  %v811_v61 = vpop.f32.mrb[53].mxu1 }
 0x162   :  { %v684_v62 = vpop.f32.mrb[54].mxu0  ;;  %v812_v63 = vpop.f32.mrb[54].mxu1 }
 0x163   :  { %v685_v0 = vadd.f32 %v2044_v10, %v684_v62  ;;  %v813_v1 = vadd.f32 %v2044_v10, %v812_v63  ;;  %v686_v2 = vpop.f32.mrb[55].mxu0  ;;  %v814_v3 = vpop.f32.mrb[55].mxu1  ;;  %v858_v4 = vmax.f32 %v682_v58, 0.0  ;;  %v890_v5 = vmax.f32 %v810_v59, 0.0 }
 0x165   :  { %v859_v6 = vmax.f32 %v685_v0, 0.0  ;;  %v891_v7 = vmax.f32 %v813_v1, 0.0 }
 0x167   :  { %v1522_v8 = vpack.c.bf16 %v859_v6, %v858_v4  ;;  %v1602_v9 = vpack.c.bf16 %v891_v7, %v890_v5 }
 0x168   :  { %v689_v11 = vpop.f32.mrb[56].mxu0  ;;  %v817_v12 = vpop.f32.mrb[56].mxu1 }
 0x169   :  { %1626 = vst [vmem:[%s2209_s3 + $0x68] sm:$0xff] %v1522_v8   ;;  %1642 = vst [vmem:[%s2209_s3 + $0xe8] sm:$0xff] %v1602_v9   ;;  %v690_v13 = vadd.f32 %v2044_v10, %v689_v11  ;;  %v818_v14 = vadd.f32 %v2044_v10, %v817_v12  ;;  %v691_v15 = vpop.f32.mrb[57].mxu0  ;;  %v819_v16 = vpop.f32.mrb[57].mxu1 }
 0x16a   :  { %v692_v17 = vpop.f32.mrb[58].mxu0  ;;  %v820_v18 = vpop.f32.mrb[58].mxu1 }
 0x16b   :  { %v693_v19 = vadd.f32 %v2044_v10, %v692_v17  ;;  %v821_v20 = vadd.f32 %v2044_v10, %v820_v18  ;;  %v694_v21 = vpop.f32.mrb[59].mxu0  ;;  %v822_v22 = vpop.f32.mrb[59].mxu1  ;;  %v860_v23 = vmax.f32 %v690_v13, 0.0  ;;  %v892_v24 = vmax.f32 %v818_v14, 0.0 }
 0x16d   :  { %v861_v25 = vmax.f32 %v693_v19, 0.0  ;;  %v893_v26 = vmax.f32 %v821_v20, 0.0 }
 0x16f   :  { %v1527_v27 = vpack.c.bf16 %v861_v25, %v860_v23  ;;  %v1607_v28 = vpack.c.bf16 %v893_v26, %v892_v24 }
 0x170   :  { %v697_v29 = vpop.f32.mrb[60].mxu0  ;;  %v825_v30 = vpop.f32.mrb[60].mxu1 }
 0x171   :  { %1627 = vst [vmem:[%s2209_s3 + $0x70] sm:$0xff] %v1527_v27   ;;  %1643 = vst [vmem:[%s2209_s3 + $0xf0] sm:$0xff] %v1607_v28   ;;  %v698_v31 = vadd.f32 %v2044_v10, %v697_v29  ;;  %v826_v32 = vadd.f32 %v2044_v10, %v825_v30  ;;  %v699_v33 = vpop.f32.mrb[61].mxu0  ;;  %v827_v34 = vpop.f32.mrb[61].mxu1 }
 0x172   :  { %v700_v35 = vpop.f32.mrb[62].mxu0  ;;  %v828_v36 = vpop.f32.mrb[62].mxu1 }
 0x173   :  { %v701_v37 = vadd.f32 %v2044_v10, %v700_v35  ;;  %v829_v38 = vadd.f32 %v2044_v10, %v828_v36  ;;  %v702_v39 = vpop.f32.mrb[63].mxu0  ;;  %v830_v40 = vpop.f32.mrb[63].mxu1  ;;  %v862_v41 = vmax.f32 %v698_v31, 0.0  ;;  %v894_v42 = vmax.f32 %v826_v32, 0.0 }
 0x175   :  { %v863_v43 = vmax.f32 %v701_v37, 0.0  ;;  %v895_v44 = vmax.f32 %v829_v38, 0.0 }
 0x177   :  { %v1532_v45 = vpack.c.bf16 %v863_v43, %v862_v41  ;;  %v1612_v46 = vpack.c.bf16 %v895_v44, %v894_v42 }
 0x179   :  { %1628 = vst [vmem:[%s2209_s3 + $0x78] sm:$0xff] %v1532_v45   ;;  %1644 = vst [vmem:[%s2209_s3 + $0xf8] sm:$0xff] %v1612_v46  }

// kernel: deeplab3_forward.14
= control target key start
LH: loop header
LB: loop body
LE: loop exit
PB: predicated region body
PF: predicated region fallthrough
CT: control target
= control target key end

     0   :  { %v629_v0 = vmov 0   ;;  %vm218_vm0 = vcmask 719872   ;;  %vm243_vm1 = vcmask 1043456   ;;  %s821_s1 = inlined_call_operand.vmem [shape: bf16[1,216,128], index: 1, kind: input, shape index: {}]   ;;  %s822_s0 = inlined_call_operand.vmem [shape: bf16[1,128,216], index: 0, kind: input, shape index: {}]   ;;  %s823_s2 = inlined_call_operand.vmem [shape: f32[1,1,128], index: 2, kind: input, shape index: {}]   ;;  %s824_s3 = inlined_call_operand.vmem [shape: bf16[1,128,128], index: 3, kind: output, shape index: {}]  }
   0x1   :  { %247 = vmatprep.subr.bf16.mxu0 %v629_v0  ;;  %562 = vmatprep.subr.bf16.mxu1 %v629_v0  ;;  %v591_v1 = vld [vmem:[%s821_s1] sm:$0xff]   ;;  %v592_v2 = vld [vmem:[%s821_s1 + $0x8] sm:$0xff]   ;;  %v593_v3 = vld [vmem:[%s821_s1 + $0x10] sm:$0xff]  }
   0x2   :  { %248 = vmatpush1.bf16.msra.mxu0 %v591_v1  ;;  %576 = vmatpush1.bf16.msra.mxu1 %v591_v1  ;;  %v594_v4 = vld [vmem:[%s821_s1 + $0x18] sm:$0xff]   ;;  %v595_v5 = vld [vmem:[%s821_s1 + $0x20] sm:$0xff]   ;;  %v596_v8 = vld [vmem:[%s821_s1 + $0x28] sm:$0xff]  }
   0x3   :  { %249 = vmatprep.subr.bf16.mxu0 %v629_v0  ;;  %563 = vmatprep.subr.bf16.mxu1 %v629_v0  ;;  %v607_v6 = vld [vmem:[%s822_s0 + $0x4] ss:$8 sps:$4 sm:$0xff]   ;;  %v597_v9 = vld [vmem:[%s821_s1 + $0x30] sm:$0xff]   ;;  %v598_v10 = vld [vmem:[%s821_s1 + $0x38] sm:$0xff]  }
   0x4   :  { %475 = vmatprep.mubr.msk.bf16.mxu0 %vm218_vm0, %v607_v6  ;;  %v610_v7 = vld [vmem:[%s822_s0 + $0x44] ss:$8 sps:$4 sm:$0xff]   ;;  %v601_v13 = vld [vmem:[%s821_s1 + $0x50] sm:$0xff]   ;;  %v602_v14 = vld [vmem:[%s821_s1 + $0x58] sm:$0xff]  }
   0x5   :  { %479 = vmatprep.mubr.msk.bf16.mxu1 %vm218_vm0, %v610_v7  ;;  %v599_v11 = vld [vmem:[%s821_s1 + $0x40] sm:$0xff]   ;;  %v600_v12 = vld [vmem:[%s821_s1 + $0x48] sm:$0xff]   ;;  %v611_v20 = vld [vmem:[%s822_s0 + $0x14] ss:$8 sps:$4 sm:$0xff]  }
   0x6   :  { %250 = vmatpush1.bf16.msra.mxu0 %v592_v2  ;;  %577 = vmatpush1.bf16.msra.mxu1 %v592_v2  ;;  %v603_v15 = vld [vmem:[%s821_s1 + $0x60] sm:$0xff]   ;;  %v604_v16 = vld [vmem:[%s821_s1 + $0x68] ss:$0 sps:$4 sm:$0xff]   ;;  %v613_v21 = vld [vmem:[%s822_s0 + $0x54] ss:$8 sps:$4 sm:$0xff]  }
   0x7   :  { %251 = vmatprep.subr.bf16.mxu0 %v629_v0  ;;  %564 = vmatprep.subr.bf16.mxu1 %v629_v0  ;;  %v245_v17 = vsel %vm243_vm1, %v604_v16, 0  ;;  %v605_v18 = vld [vmem:[%s822_s0] ss:$8 sps:$4 sm:$0xff]   ;;  %v615_v22 = vld [vmem:[%s822_s0 + $0x10] ss:$8 sps:$4 sm:$0xff]  }
   0x8   :  { %v608_v19 = vld [vmem:[%s822_s0 + $0x40] ss:$8 sps:$4 sm:$0xff]   ;;  %v616_v23 = vld [vmem:[%s822_s0 + $0x50] ss:$8 sps:$4 sm:$0xff]   ;;  %v617_v24 = vld [vmem:[%s822_s0 + $0x24] ss:$8 sps:$4 sm:$0xff]  }
   0x9   :  { %v619_v25 = vld [vmem:[%s822_s0 + $0x64] ss:$8 sps:$4 sm:$0xff]   ;;  %v621_v26 = vld [vmem:[%s822_s0 + $0x20] ss:$8 sps:$4 sm:$0xff]   ;;  %v623_v28 = vld [vmem:[%s822_s0 + $0x34] ss:$8 sps:$4 sm:$0xff]  }
   0xa   :  { %252 = vmatpush1.bf16.msra.mxu0 %v593_v3  ;;  %578 = vmatpush1.bf16.msra.mxu1 %v593_v3  ;;  %v622_v27 = vld [vmem:[%s822_s0 + $0x60] ss:$8 sps:$4 sm:$0xff]   ;;  %v625_v29 = vld [vmem:[%s822_s0 + $0x74] ss:$8 sps:$4 sm:$0xff]   ;;  %v627_v30 = vld [vmem:[%s822_s0 + $0x30] ss:$8 sps:$4 sm:$0xff]  }
   0xb   :  { %253 = vmatprep.subr.bf16.mxu0 %v629_v0  ;;  %565 = vmatprep.subr.bf16.mxu1 %v629_v0  ;;  %v628_v31 = vld [vmem:[%s822_s0 + $0x70] ss:$8 sps:$4 sm:$0xff]   ;;  %v779_v32 = vld [vmem:[%s823_s2] ss:$0 sm:$0xff] }
   0xe   :  { %254 = vmatpush1.bf16.msra.mxu0 %v594_v4  ;;  %579 = vmatpush1.bf16.msra.mxu1 %v594_v4 }
   0xf   :  { %255 = vmatprep.subr.bf16.mxu0 %v629_v0  ;;  %566 = vmatprep.subr.bf16.mxu1 %v629_v0 }
  0x12   :  { %256 = vmatpush1.bf16.msra.mxu0 %v595_v5  ;;  %580 = vmatpush1.bf16.msra.mxu1 %v595_v5 }
  0x13   :  { %257 = vmatprep.subr.bf16.mxu0 %v629_v0  ;;  %567 = vmatprep.subr.bf16.mxu1 %v629_v0 }
  0x16   :  { %258 = vmatpush1.bf16.msra.mxu0 %v596_v8  ;;  %581 = vmatpush1.bf16.msra.mxu1 %v596_v8 }
  0x17   :  { %259 = vmatprep.subr.bf16.mxu0 %v629_v0  ;;  %568 = vmatprep.subr.bf16.mxu1 %v629_v0 }
  0x1a   :  { %260 = vmatpush1.bf16.msra.mxu0 %v597_v9  ;;  %582 = vmatpush1.bf16.msra.mxu1 %v597_v9 }
  0x1b   :  { %261 = vmatprep.subr.bf16.mxu0 %v629_v0  ;;  %569 = vmatprep.subr.bf16.mxu1 %v629_v0 }
  0x1e   :  { %262 = vmatpush1.bf16.msra.mxu0 %v598_v10  ;;  %583 = vmatpush1.bf16.msra.mxu1 %v598_v10 }
  0x1f   :  { %263 = vmatprep.subr.bf16.mxu0 %v629_v0  ;;  %570 = vmatprep.subr.bf16.mxu1 %v629_v0 }
  0x22   :  { %264 = vmatpush1.bf16.msra.mxu0 %v599_v11  ;;  %584 = vmatpush1.bf16.msra.mxu1 %v599_v11 }
  0x23   :  { %265 = vmatprep.subr.bf16.mxu0 %v629_v0  ;;  %571 = vmatprep.subr.bf16.mxu1 %v629_v0 }
  0x26   :  { %266 = vmatpush1.bf16.msra.mxu0 %v600_v12  ;;  %585 = vmatpush1.bf16.msra.mxu1 %v600_v12 }
  0x27   :  { %267 = vmatprep.subr.bf16.mxu0 %v629_v0  ;;  %572 = vmatprep.subr.bf16.mxu1 %v629_v0 }
  0x2a   :  { %268 = vmatpush1.bf16.msra.mxu0 %v601_v13  ;;  %586 = vmatpush1.bf16.msra.mxu1 %v601_v13 }
  0x2b   :  { %269 = vmatprep.subr.bf16.mxu0 %v629_v0  ;;  %573 = vmatprep.subr.bf16.mxu1 %v629_v0 }
  0x2e   :  { %270 = vmatpush1.bf16.msra.mxu0 %v602_v14  ;;  %587 = vmatpush1.bf16.msra.mxu1 %v602_v14 }
  0x2f   :  { %271 = vmatprep.subr.bf16.mxu0 %v629_v0  ;;  %574 = vmatprep.subr.bf16.mxu1 %v629_v0 }
  0x32   :  { %272 = vmatpush1.bf16.msra.mxu0 %v603_v15  ;;  %588 = vmatpush1.bf16.msra.mxu1 %v603_v15 }
  0x33   :  { %273 = vmatprep.subr.bf16.mxu0 %v629_v0  ;;  %575 = vmatprep.subr.bf16.mxu1 %v629_v0 }
  0x36   :  { %274 = vmatpush1.bf16.msra.mxu0 %v245_v17  ;;  %589 = vmatpush1.bf16.msra.mxu1 %v245_v17 }
  0x39   :  { %280 = vmatmul.mubr.bf16.vlgmr.msra.gmra.mrb[0].mxu0 %v605_v18  ;;  %312 = vmatmul.mubr.bf16.vlgmr.msra.gmra.mrb[0].mxu1 %v608_v19 }
  0x3a   :  { %476 = vmatprep.mubr.msk.bf16.mxu0 %vm218_vm0, %v611_v20  ;;  %480 = vmatprep.mubr.msk.bf16.mxu1 %vm218_vm0, %v613_v21 }
  0x41   :  { %288 = vmatmul.mubr.bf16.gmra.mrb[4].mxu0 %v615_v22  ;;  %320 = vmatmul.mubr.bf16.gmra.mrb[4].mxu1 %v616_v23 }
  0x42   :  { %477 = vmatprep.mubr.msk.bf16.mxu0 %vm218_vm0, %v617_v24  ;;  %481 = vmatprep.mubr.msk.bf16.mxu1 %vm218_vm0, %v619_v25 }
  0x49   :  { %296 = vmatmul.mubr.bf16.gmra.mrb[8].mxu0 %v621_v26  ;;  %328 = vmatmul.mubr.bf16.gmra.mrb[8].mxu1 %v622_v27 }
  0x4a   :  { %478 = vmatprep.mubr.msk.bf16.mxu0 %vm218_vm0, %v623_v28  ;;  %482 = vmatprep.mubr.msk.bf16.mxu1 %vm218_vm0, %v625_v29 }
  0x51   :  { %304 = vmatmul.mubr.bf16.gmra.mrb[12].mxu0 %v627_v30  ;;  %336 = vmatmul.mubr.bf16.gmra.mrb[12].mxu1 %v628_v31 }
 0x10c   :  { %v281_v33 = vpop.f32.mrb[0].mxu0  ;;  %v313_v34 = vpop.f32.mrb[0].mxu1 }
 0x10d   :  { %v282_v35 = vadd.f32 %v779_v32, %v281_v33  ;;  %v314_v36 = vadd.f32 %v779_v32, %v313_v34  ;;  %v283_v37 = vpop.f32.mrb[1].mxu0  ;;  %v315_v38 = vpop.f32.mrb[1].mxu1 }
 0x10e   :  { %v284_v39 = vpop.f32.mrb[2].mxu0  ;;  %v316_v40 = vpop.f32.mrb[2].mxu1 }
 0x10f   :  { %v285_v41 = vadd.f32 %v779_v32, %v284_v39  ;;  %v317_v42 = vadd.f32 %v779_v32, %v316_v40  ;;  %v286_v43 = vpop.f32.mrb[3].mxu0  ;;  %v318_v44 = vpop.f32.mrb[3].mxu1  ;;  %v344_v45 = vmax.f32 %v282_v35, 0.0  ;;  %v352_v46 = vmax.f32 %v314_v36, 0.0 }
 0x111   :  { %v345_v47 = vmax.f32 %v285_v41, 0.0  ;;  %v353_v48 = vmax.f32 %v317_v42, 0.0 }
 0x113   :  { %v518_v49 = vpack.c.bf16 %v345_v47, %v344_v45  ;;  %v538_v50 = vpack.c.bf16 %v353_v48, %v352_v46 }
 0x114   :  { %v289_v51 = vpop.f32.mrb[4].mxu0  ;;  %v321_v52 = vpop.f32.mrb[4].mxu1 }
 0x115   :  { %519 = vst [vmem:[%s824_s3] sm:$0xff] %v518_v49   ;;  %558 = vst [vmem:[%s824_s3 + $0x20] sm:$0xff] %v538_v50   ;;  %v290_v53 = vadd.f32 %v779_v32, %v289_v51  ;;  %v322_v54 = vadd.f32 %v779_v32, %v321_v52  ;;  %v291_v55 = vpop.f32.mrb[5].mxu0  ;;  %v323_v56 = vpop.f32.mrb[5].mxu1 }
 0x116   :  { %v292_v57 = vpop.f32.mrb[6].mxu0  ;;  %v324_v58 = vpop.f32.mrb[6].mxu1 }
 0x117   :  { %v293_v59 = vadd.f32 %v779_v32, %v292_v57  ;;  %v325_v60 = vadd.f32 %v779_v32, %v324_v58  ;;  %v294_v61 = vpop.f32.mrb[7].mxu0  ;;  %v326_v62 = vpop.f32.mrb[7].mxu1  ;;  %v346_v63 = vmax.f32 %v290_v53, 0.0  ;;  %v354_v0 = vmax.f32 %v322_v54, 0.0 }
 0x119   :  { %v347_v1 = vmax.f32 %v293_v59, 0.0  ;;  %v355_v2 = vmax.f32 %v325_v60, 0.0 }
 0x11b   :  { %v523_v3 = vpack.c.bf16 %v347_v1, %v346_v63  ;;  %v543_v4 = vpack.c.bf16 %v355_v2, %v354_v0 }
 0x11c   :  { %v297_v5 = vpop.f32.mrb[8].mxu0  ;;  %v329_v6 = vpop.f32.mrb[8].mxu1 }
 0x11d   :  { %555 = vst [vmem:[%s824_s3 + $0x8] sm:$0xff] %v523_v3   ;;  %559 = vst [vmem:[%s824_s3 + $0x28] sm:$0xff] %v543_v4   ;;  %v298_v7 = vadd.f32 %v779_v32, %v297_v5  ;;  %v330_v8 = vadd.f32 %v779_v32, %v329_v6  ;;  %v299_v9 = vpop.f32.mrb[9].mxu0  ;;  %v331_v10 = vpop.f32.mrb[9].mxu1 }
 0x11e   :  { %v300_v11 = vpop.f32.mrb[10].mxu0  ;;  %v332_v12 = vpop.f32.mrb[10].mxu1 }
 0x11f   :  { %v301_v13 = vadd.f32 %v779_v32, %v300_v11  ;;  %v333_v14 = vadd.f32 %v779_v32, %v332_v12  ;;  %v302_v15 = vpop.f32.mrb[11].mxu0  ;;  %v334_v16 = vpop.f32.mrb[11].mxu1  ;;  %v348_v17 = vmax.f32 %v298_v7, 0.0  ;;  %v356_v18 = vmax.f32 %v330_v8, 0.0 }
 0x121   :  { %v349_v19 = vmax.f32 %v301_v13, 0.0  ;;  %v357_v20 = vmax.f32 %v333_v14, 0.0 }
 0x123   :  { %v528_v21 = vpack.c.bf16 %v349_v19, %v348_v17  ;;  %v548_v22 = vpack.c.bf16 %v357_v20, %v356_v18 }
 0x124   :  { %v305_v23 = vpop.f32.mrb[12].mxu0  ;;  %v337_v24 = vpop.f32.mrb[12].mxu1 }
 0x125   :  { %556 = vst [vmem:[%s824_s3 + $0x10] sm:$0xff] %v528_v21   ;;  %560 = vst [vmem:[%s824_s3 + $0x30] sm:$0xff] %v548_v22   ;;  %v306_v25 = vadd.f32 %v779_v32, %v305_v23  ;;  %v338_v26 = vadd.f32 %v779_v32, %v337_v24  ;;  %v307_v27 = vpop.f32.mrb[13].mxu0  ;;  %v339_v28 = vpop.f32.mrb[13].mxu1 }
 0x126   :  { %v308_v29 = vpop.f32.mrb[14].mxu0  ;;  %v340_v30 = vpop.f32.mrb[14].mxu1 }
 0x127   :  { %v309_v31 = vadd.f32 %v779_v32, %v308_v29  ;;  %v341_v33 = vadd.f32 %v779_v32, %v340_v30  ;;  %v310_v34 = vpop.f32.mrb[15].mxu0  ;;  %v342_v35 = vpop.f32.mrb[15].mxu1  ;;  %v350_v36 = vmax.f32 %v306_v25, 0.0  ;;  %v358_v37 = vmax.f32 %v338_v26, 0.0 }
 0x129   :  { %v351_v38 = vmax.f32 %v309_v31, 0.0  ;;  %v359_v39 = vmax.f32 %v341_v33, 0.0 }
 0x12b   :  { %v533_v40 = vpack.c.bf16 %v351_v38, %v350_v36  ;;  %v553_v41 = vpack.c.bf16 %v359_v39, %v358_v37 }
 0x12d   :  { %557 = vst [vmem:[%s824_s3 + $0x18] sm:$0xff] %v533_v40   ;;  %561 = vst [vmem:[%s824_s3 + $0x38] sm:$0xff] %v553_v41  }

// kernel: deeplab3_forward.15
= control target key start
LH: loop header
LB: loop body
LE: loop exit
PB: predicated region body
PF: predicated region fallthrough
CT: control target
= control target key end

     0   :  { %vm204_vm0 = vcmask 261120   ;;  %s550_s1 = inlined_call_operand.vmem [shape: bf16[1,288,128], index: 1, kind: input, shape index: {}]   ;;  %s551_s0 = inlined_call_operand.vmem [shape: bf16[1,32,288], index: 0, kind: input, shape index: {}]   ;;  %s552_s2 = inlined_call_operand.vmem [shape: f32[1,1,128], index: 2, kind: input, shape index: {}]   ;;  %s553_s3 = inlined_call_operand.vmem [shape: bf16[1,32,128], index: 3, kind: output, shape index: {}]  }
   0x1   :  { %v423_v0 = vld [vmem:[%s550_s1 + $0x40] sm:$0xff]   ;;  %v425_v2 = vld [vmem:[%s550_s1 + $0x48] sm:$0xff]   ;;  %v427_v4 = vld [vmem:[%s550_s1 + $0x50] sm:$0xff]  }
   0x2   :  { %v424_v1 = vld [vmem:[%s550_s1] sm:$0xff]   ;;  %383 = vmatprep.subr.bf16.mxu0 %v423_v0  ;;  %v426_v3 = vld [vmem:[%s550_s1 + $0x8] sm:$0xff]   ;;  %v428_v5 = vld [vmem:[%s550_s1 + $0x10] sm:$0xff]  }
   0x3   :  { %384 = vmatpush3.bf16.msra.mxu0 %v424_v1  ;;  %v429_v6 = vld [vmem:[%s550_s1 + $0x58] sm:$0xff]   ;;  %v431_v8 = vld [vmem:[%s550_s1 + $0x60] sm:$0xff]   ;;  %v433_v11 = vld [vmem:[%s550_s1 + $0x68] sm:$0xff]  }
   0x4   :  { %385 = vmatprep.subr.bf16.mxu0 %v425_v2  ;;  %v430_v7 = vld [vmem:[%s550_s1 + $0x18] sm:$0xff]   ;;  %v432_v9 = vld [vmem:[%s550_s1 + $0x20] sm:$0xff]   ;;  %v434_v12 = vld [vmem:[%s550_s1 + $0x28] sm:$0xff]  }
   0x5   :  { %v438_v10 = vld [vmem:[%s550_s1 + $0x80] sm:$0xff]   ;;  %v435_v13 = vld [vmem:[%s550_s1 + $0x70] sm:$0xff]   ;;  %v443_v15 = vld [vmem:[%s550_s1 + $0x88] sm:$0xff]  }
   0x6   :  { %415 = vmatprep.subr.bf16.mxu1 %v438_v10  ;;  %v442_v14 = vld [vmem:[%s551_s0 + $0x4] ss:$12 sps:$4 sm:$0xff]   ;;  %v444_v16 = vld [vmem:[%s551_s0 + $0x8] ss:$12 sps:$4 sm:$0xff]   ;;  %v445_v17 = vld [vmem:[%s551_s0 + $0x20] ss:$12 sps:$4 sm:$0xff]  }
   0x7   :  { %386 = vmatpush3.bf16.msra.mxu0 %v426_v3  ;;  %416 = vmatpush3.bf16.msra.mxu1 %v438_v10  ;;  %v436_v18 = vld [vmem:[%s550_s1 + $0x30] sm:$0xff]   ;;  %v437_v19 = vld [vmem:[%s550_s1 + $0x78] sm:$0xff]   ;;  %v440_v21 = vld [vmem:[%s551_s0] ss:$12 sps:$4 sm:$0xff]  }
   0x8   :  { %387 = vmatprep.subr.bf16.mxu0 %v427_v4  ;;  %243 = vmatprep.mubr.bf16.mxu0 %v442_v14  ;;  %v439_v20 = vld [vmem:[%s550_s1 + $0x38] sm:$0xff]   ;;  %v337_v30 = vld [vmem:[%s552_s2] ss:$0 sm:$0xff] }
   0x9   :  { %417 = vmatprep.subr.bf16.mxu1 %v443_v15  ;;  %419 = vmatprep.mubr.msk.bf16.mxu1 %vm204_vm0, %v444_v16  ;;  %v446_v22 = vld [vmem:[%s551_s0 + $0x1c] ss:$12 sps:$4 sm:$0xff]   ;;  %v448_v23 = vld [vmem:[%s551_s0 + $0x18] ss:$12 sps:$4 sm:$0xff]  }
   0xb   :  { %388 = vmatpush3.bf16.msra.mxu0 %v428_v5  ;;  %418 = vmatpush3.bf16.msra.mxu1 %v443_v15 }
   0xc   :  { %389 = vmatprep.subr.bf16.mxu0 %v429_v6 }
   0xe   :  { %420 = vmatmul.mubr.msk.bf16.vlgmr.msra.gmra.mrb[0].mxu1 %vm204_vm0, %v445_v17 }
   0xf   :  { %390 = vmatpush3.bf16.msra.mxu0 %v430_v7 }
  0x10   :  { %391 = vmatprep.subr.bf16.mxu0 %v431_v8 }
  0x13   :  { %392 = vmatpush3.bf16.msra.mxu0 %v432_v9 }
  0x14   :  { %393 = vmatprep.subr.bf16.mxu0 %v433_v11 }
  0x17   :  { %394 = vmatpush3.bf16.msra.mxu0 %v434_v12 }
  0x18   :  { %395 = vmatprep.subr.bf16.mxu0 %v435_v13 }
  0x1b   :  { %396 = vmatpush3.bf16.msra.mxu0 %v436_v18 }
  0x1c   :  { %397 = vmatprep.subr.bf16.mxu0 %v437_v19 }
  0x1f   :  { %398 = vmatpush3.bf16.msra.mxu0 %v439_v20 }
  0x22   :  { %244 = vmatmul.mubr.bf16.vlgmr.msra.gmra.mrb[0].mxu0 %v440_v21 }
  0x23   :  { %251 = vmatprep.mubr.bf16.mxu0 %v446_v22 }
  0x2a   :  { %252 = vmatmul.mubr.bf16.gmra.mrb[4].mxu0 %v448_v23 }
  0xe1   :  { %v421_v24 = vpop.f32.mrb[0].mxu1 }
  0xe2   :  { %v294_v25 = vpop.f32.mrb[1].mxu1 }
  0xe3   :  { %v422_v26 = vpop.f32.mrb[2].mxu1 }
  0xe4   :  { %v297_v27 = vpop.f32.mrb[3].mxu1 }
  0xf5   :  { %v399_v28 = vpop.f32.mrb[0].mxu0 }
  0xf6   :  { %v400_v29 = vpop.f32.mrb[1].mxu0 }
  0xf7   :  { %v401_v31 = vadd.f32 %v400_v29, %v399_v28  ;;  %v402_v32 = vpop.f32.mrb[2].mxu0 }
  0xf8   :  { %v403_v33 = vpop.f32.mrb[3].mxu0 }
  0xf9   :  { %v404_v34 = vadd.f32 %v403_v33, %v402_v32  ;;  %v246_v35 = vadd.f32 %v401_v31, %v337_v30 }
  0xfb   :  { %v295_v36 = vadd.f32 %v294_v25, %v246_v35  ;;  %v249_v37 = vadd.f32 %v404_v34, %v337_v30 }
  0xfd   :  { %v298_v38 = vadd.f32 %v297_v27, %v249_v37  ;;  %v405_v39 = vpop.f32.mrb[4].mxu0  ;;  %v309_v41 = vmax.f32 %v295_v36, 0.0 }
  0xfe   :  { %v406_v40 = vpop.f32.mrb[5].mxu0 }
  0xff   :  { %v310_v42 = vmax.f32 %v298_v38, 0.0  ;;  %v407_v43 = vadd.f32 %v406_v40, %v405_v39  ;;  %v408_v44 = vpop.f32.mrb[6].mxu0 }
 0x100   :  { %v409_v45 = vpop.f32.mrb[7].mxu0 }
 0x101   :  { %v375_v46 = vpack.c.bf16 %v310_v42, %v309_v41  ;;  %v254_v47 = vadd.f32 %v407_v43, %v337_v30  ;;  %v410_v48 = vadd.f32 %v409_v45, %v408_v44 }
 0x103   :  { %376 = vst [vmem:[%s553_s3] sm:$0xff] %v375_v46   ;;  %v303_v49 = vadd.f32 %v421_v24, %v254_v47  ;;  %v257_v50 = vadd.f32 %v410_v48, %v337_v30 }
 0x105   :  { %v306_v51 = vadd.f32 %v422_v26, %v257_v50  ;;  %v311_v52 = vmax.f32 %v303_v49, 0.0 }
 0x107   :  { %v312_v53 = vmax.f32 %v306_v51, 0.0 }
 0x109   :  { %v380_v54 = vpack.c.bf16 %v312_v53, %v311_v52 }
 0x10b   :  { %382 = vst [vmem:[%s553_s3 + $0x8] sm:$0xff] %v380_v54  }

// kernel: deeplab3_forward.17
= control target key start
LH: loop header
LB: loop body
LE: loop exit
PB: predicated region body
PF: predicated region fallthrough
CT: control target
= control target key end

     0   :  { %s1025_s12 = smov 0   ;;  %s1027_s13 = smov 0   ;;  %s1122_s0 = inlined_call_operand.vmem [shape: bf16[3,32,432], index: 0, kind: input, shape index: {}]   ;;  %s1123_s1 = inlined_call_operand.vmem [shape: bf16[3,432,128], index: 1, kind: input, shape index: {}]   ;;  %s1124_s2 = inlined_call_operand.vmem [shape: f32[3,1,128], index: 2, kind: input, shape index: {}]   ;;  %s1125_s3 = inlined_call_operand.vmem [shape: bf16[3,32,128], index: 3, kind: output, shape index: {}]  }
   0x1   :  { %s1029_s14 = smov 0  }
   0x2 LB: > { %s32_s15 = sadd.s32 1, %s998_s13  ;;  %p820_p0 = scmp.ge.s32.totalorder %s1002_s14, 1  ;;  %s1002_s14 = sphi %s1029_s14, %s13_s14   ;;  %s998_s13 = sphi %s1027_s13, %s1127_s13   ;;  %s994_s12 = sphi %s1025_s12, %s1126_s12  }
   0x3   : > { %p34_p1 = scmp.ge.s32.totalorder %s32_s15, 3  ;;  %p196_p2 = scmp.lt.s32.totalorder %s1002_s14, 4 }
   0x5   : > { %s1129_s15 = smov (%p34_p1, %s32_s15), 0  ;;  %p197_p3 = pnand %p820_p0, %p196_p2 }
   0x6   : > { %p247_p4 = scmp.lt.s32.totalorder (!%p197_p3), %s994_s12, 2  ;;  %v1004_v0 = vmov (!%p197_p3), 0   ;;  %vm554_vm0 = vcmask (!%p197_p3), 392192  }
   0x7   : > { %200 = sbr.rel (%p197_p3) target bundleno = 291 (0x123), region = 32  ;;  %610 = vmatprep.subr.bf16.mxu1 (!%p197_p3), %v1004_v0 }
   0xe   : > { %s1131_s12 = smov (!%p247_p4, %s994_s12), 2 }
   0xf   : > { %s915_s16 = smul.u32 216, %s1131_s12  ;;  %s870_s17 = sshll.u32 %s1131_s12, 6 }
  0x10   : > { %s1051_s20 = scalar_lea.vmem %s1122_s0, %s870_s17  ;;  %s270_s26 = scalar_lea.vmem %s1124_s2, %s1131_s12 }
  0x11   : > { %s1056_s23 = scalar_lea.vmem %s1123_s1, %s915_s16  ;;  %v968_v23 = vld [vmem:[%s1051_s20 + $0x4] ss:$16 sps:$4 sm:$0xff]   ;;  %v975_v26 = vld [vmem:[%s1051_s20 + $0xc] ss:$16 sps:$4 sm:$0xff]   ;;  %v966_v28 = vld [vmem:[%s1051_s20] ss:$16 sps:$4 sm:$0xff]  }
  0x12   : > { %v941_v1 = vld [vmem:[%s1056_s23 + $0x80] sm:$0xff]   ;;  %v944_v4 = vld [vmem:[%s1056_s23 + $0x88] sm:$0xff]   ;;  %v947_v7 = vld [vmem:[%s1056_s23 + $0x90] sm:$0xff]   ;;  %593 = vmatprep.mubr.bf16.mxu0 %v968_v23  ;;  %862 = vmatprep.mubr.msk.bf16.mxu1 %vm554_vm0, %v975_v26  ;;  %s871_s27 = sshll.u32 %s1131_s12, 4 }
  0x13   : > { %v942_v2 = vld [vmem:[%s1056_s23 + $0x40] sm:$0xff]   ;;  %611 = vmatpush1.bf16.msra.mxu1 %v941_v1  ;;  %v945_v5 = vld [vmem:[%s1056_s23 + $0x48] sm:$0xff]   ;;  %v948_v8 = vld [vmem:[%s1056_s23 + $0x50] sm:$0xff]   ;;  %s282_s30 = scalar_lea.vmem %s1125_s3, %s871_s27 }
  0x14   : > { %v943_v3 = vld [vmem:[%s1056_s23] sm:$0xff]   ;;  %887 = vmatprep.subr.bf16.mxu0 %v942_v2  ;;  %612 = vmatprep.subr.bf16.mxu1 %v1004_v0  ;;  %v946_v6 = vld [vmem:[%s1056_s23 + $0x8] sm:$0xff]   ;;  %v949_v9 = vld [vmem:[%s1056_s23 + $0x10] sm:$0xff]  }
  0x15   : > { %888 = vmatpush3.bf16.msra.mxu0 %v943_v3  ;;  %v950_v10 = vld [vmem:[%s1056_s23 + $0x98] sm:$0xff]   ;;  %v954_v13 = vld [vmem:[%s1056_s23 + $0x60] sm:$0xff]   ;;  %v957_v16 = vld [vmem:[%s1056_s23 + $0x68] sm:$0xff]  }
  0x16   : > { %889 = vmatprep.subr.bf16.mxu0 %v945_v5  ;;  %v951_v11 = vld [vmem:[%s1056_s23 + $0x58] sm:$0xff]   ;;  %v953_v14 = vld [vmem:[%s1056_s23 + $0xa0] sm:$0xff]   ;;  %v956_v17 = vld [vmem:[%s1056_s23 + $0xa8] sm:$0xff]  }
  0x17   : > { %613 = vmatpush1.bf16.msra.mxu1 %v944_v4  ;;  %v952_v12 = vld [vmem:[%s1056_s23 + $0x18] sm:$0xff]   ;;  %v955_v15 = vld [vmem:[%s1056_s23 + $0x20] sm:$0xff]   ;;  %v958_v18 = vld [vmem:[%s1056_s23 + $0x28] sm:$0xff]  }
  0x18   : > { %614 = vmatprep.subr.bf16.mxu1 %v1004_v0  ;;  %v960_v19 = vld [vmem:[%s1056_s23 + $0x70] sm:$0xff]   ;;  %v963_v22 = vld [vmem:[%s1056_s23 + $0x78] sm:$0xff]   ;;  %v965_v27 = vld [vmem:[%s1056_s23 + $0xc0] sm:$0xff]  }
  0x19   : > { %890 = vmatpush3.bf16.msra.mxu0 %v946_v6  ;;  %v959_v20 = vld [vmem:[%s1056_s23 + $0xb0] sm:$0xff]   ;;  %v962_v24 = vld [vmem:[%s1056_s23 + $0xb8] sm:$0xff]   ;;  %v969_v30 = vld [vmem:[%s1056_s23 + $0xc8] sm:$0xff]  }
  0x1a   : > { %891 = vmatprep.subr.bf16.mxu0 %v948_v8  ;;  %v961_v21 = vld [vmem:[%s1056_s23 + $0x30] sm:$0xff]   ;;  %v964_v25 = vld [vmem:[%s1056_s23 + $0x38] sm:$0xff]   ;;  %v826_v42 = vld [vmem:[%s270_s26] ss:$0 sm:$0xff] }
  0x1b   : > { %615 = vmatpush1.bf16.msra.mxu1 %v947_v7  ;;  %v971_v29 = vld [vmem:[%s1051_s20 + $0x24] ss:$16 sps:$4 sm:$0xff]   ;;  %v976_v32 = vld [vmem:[%s1051_s20 + $0x20] ss:$16 sps:$4 sm:$0xff]   ;;  %v973_v33 = vld [vmem:[%s1051_s20 + $0x8] ss:$16 sps:$4 sm:$0xff]  }
  0x1c   : > { %616 = vmatprep.subr.bf16.mxu1 %v1004_v0  ;;  %v970_v31 = vld [vmem:[%s1056_s23 + $0xd0] sm:$0xff]   ;;  %v977_v34 = vld [vmem:[%s1051_s20 + $0x2c] ss:$16 sps:$4 sm:$0xff]   ;;  %v979_v35 = vld [vmem:[%s1051_s20 + $0x28] ss:$16 sps:$4 sm:$0xff]  }
  0x1d   : > { %892 = vmatpush3.bf16.msra.mxu0 %v949_v9 }
  0x1e   : > { %893 = vmatprep.subr.bf16.mxu0 %v951_v11 }
  0x1f   : > { %617 = vmatpush1.bf16.msra.mxu1 %v950_v10 }
  0x20   : > { %618 = vmatprep.subr.bf16.mxu1 %v1004_v0 }
  0x21   : > { %894 = vmatpush3.bf16.msra.mxu0 %v952_v12 }
  0x22   : > { %895 = vmatprep.subr.bf16.mxu0 %v954_v13 }
  0x23   : > { %619 = vmatpush1.bf16.msra.mxu1 %v953_v14 }
  0x24   : > { %620 = vmatprep.subr.bf16.mxu1 %v1004_v0 }
  0x25   : > { %896 = vmatpush3.bf16.msra.mxu0 %v955_v15 }
  0x26   : > { %897 = vmatprep.subr.bf16.mxu0 %v957_v16 }
  0x27   : > { %621 = vmatpush1.bf16.msra.mxu1 %v956_v17 }
  0x28   : > { %622 = vmatprep.subr.bf16.mxu1 %v1004_v0 }
  0x29   : > { %898 = vmatpush3.bf16.msra.mxu0 %v958_v18 }
  0x2a   : > { %899 = vmatprep.subr.bf16.mxu0 %v960_v19 }
  0x2b   : > { %623 = vmatpush1.bf16.msra.mxu1 %v959_v20 }
  0x2c   : > { %624 = vmatprep.subr.bf16.mxu1 %v1004_v0 }
  0x2d   : > { %900 = vmatpush3.bf16.msra.mxu0 %v961_v21 }
  0x2e   : > { %901 = vmatprep.subr.bf16.mxu0 %v963_v22 }
  0x2f   : > { %625 = vmatpush1.bf16.msra.mxu1 %v962_v24 }
  0x30   : > { %626 = vmatprep.subr.bf16.mxu1 %v1004_v0 }
  0x31   : > { %902 = vmatpush3.bf16.msra.mxu0 %v964_v25 }
  0x33   : > { %627 = vmatpush1.bf16.msra.mxu1 %v965_v27 }
  0x34   : > { %594 = vmatmul.mubr.bf16.vlgmr.msra.gmra.mrb[0].mxu0 %v966_v28  ;;  %628 = vmatprep.subr.bf16.mxu1 %v1004_v0 }
  0x35   : > { %601 = vmatprep.mubr.bf16.mxu0 %v971_v29 }
  0x37   : > { %629 = vmatpush1.bf16.msra.mxu1 %v969_v30 }
  0x38   : > { %630 = vmatprep.subr.bf16.mxu1 %v1004_v0 }
  0x3b   : > { %631 = vmatpush1.bf16.msra.mxu1 %v970_v31 }
  0x3c   : > { %602 = vmatmul.mubr.bf16.gmra.mrb[4].mxu0 %v976_v32 }
  0x3e   : > { %643 = vmatmul.mubr.bf16.vlgmr.msra.gmra.mrb[0].mxu1 %v973_v33 }
  0x3f   : > { %863 = vmatprep.mubr.msk.bf16.mxu1 %vm554_vm0, %v977_v34 }
  0x46   : > { %651 = vmatmul.mubr.bf16.gmra.mrb[4].mxu1 %v979_v35 }
 0x107   : > { %v903_v36 = vpop.f32.mrb[0].mxu0 }
 0x108   : > { %v904_v37 = vpop.f32.mrb[1].mxu0 }
 0x109   : > { %v905_v38 = vadd.f32 %v904_v37, %v903_v36  ;;  %v906_v39 = vpop.f32.mrb[2].mxu0 }
 0x10a   : > { %v907_v40 = vpop.f32.mrb[3].mxu0 }
 0x10b   : > { %v908_v41 = vadd.f32 %v907_v40, %v906_v39  ;;  %v596_v43 = vadd.f32 %v905_v38, %v826_v42 }
 0x10d   : > { %v599_v51 = vadd.f32 %v908_v41, %v826_v42 }
 0x10f   : > { %v909_v44 = vpop.f32.mrb[4].mxu0 }
 0x110   : > { %v910_v45 = vpop.f32.mrb[5].mxu0 }
 0x111   : > { %v644_v46 = vpop.f32.mrb[0].mxu1  ;;  %v911_v47 = vadd.f32 %v910_v45, %v909_v44  ;;  %v912_v48 = vpop.f32.mrb[6].mxu0 }
 0x112   : > { %v645_v49 = vadd.f32 %v644_v46, %v596_v43  ;;  %v646_v50 = vpop.f32.mrb[1].mxu1  ;;  %v913_v52 = vpop.f32.mrb[7].mxu0 }
 0x113   : > { %v647_v53 = vpop.f32.mrb[2].mxu1  ;;  %v914_v54 = vadd.f32 %v913_v52, %v912_v48  ;;  %v604_v59 = vadd.f32 %v911_v47, %v826_v42 }
 0x114   : > { %v648_v55 = vadd.f32 %v647_v53, %v599_v51  ;;  %v649_v56 = vpop.f32.mrb[3].mxu1  ;;  %v659_v57 = vmax.f32 %v645_v49, 0.0 }
 0x115   : > { %v607_v0 = vadd.f32 %v914_v54, %v826_v42 }
 0x116   : > { %v660_v58 = vmax.f32 %v648_v55, 0.0 }
 0x118   : > { %v879_v60 = vpack.c.bf16 %v660_v58, %v659_v57 }
 0x119   : > { %v652_v61 = vpop.f32.mrb[4].mxu1 }
 0x11a   : > { %880 = vst [vmem:[%s282_s30] sm:$0xff] %v879_v60   ;;  %v653_v62 = vadd.f32 %v652_v61, %v604_v59  ;;  %v654_v63 = vpop.f32.mrb[5].mxu1 }
 0x11b   : > { %v655_v1 = vpop.f32.mrb[6].mxu1 }
 0x11c   : > { %v656_v2 = vadd.f32 %v655_v1, %v607_v0  ;;  %v657_v3 = vpop.f32.mrb[7].mxu1  ;;  %v661_v4 = vmax.f32 %v653_v62, 0.0 }
 0x11e   : > { %v662_v5 = vmax.f32 %v656_v2, 0.0 }
 0x120   : > { %v884_v6 = vpack.c.bf16 %v662_v5, %v661_v4 }
 0x122   : > { %886 = vst [vmem:[%s282_s30 + $0x8] sm:$0xff] %v884_v6  }
 0x123 PF: > { %s13_s14 = sadd.s32 1, %s1002_s14   ;;  %s1126_s12 = smov %s998_s13 }
 0x124   : > { %p10_p5 = scmp.ge.s32.totalorder %s13_s14, 5   ;;  %s1127_s13 = smov %s1129_s15 }
 0x126   :  { %12 = sbr.rel (!%p10_p5) target bundleno = 2 (0x2), region = 68 }

// kernel: deeplab3_forward.18
= control target key start
LH: loop header
LB: loop body
LE: loop exit
PB: predicated region body
PF: predicated region fallthrough
CT: control target
= control target key end

     0   :  { %v122_v0 = vmov 0.0   ;;  %vm123_vm0 = vmmov 0   ;;  %vm47_vm1 = vcmask 392192   ;;  %s162_s1 = inlined_call_operand.vmem [shape: bf16[1,48,128], index: 1, kind: input, shape index: {}]   ;;  %s163_s0 = inlined_call_operand.vmem [shape: bf16[1,8,48], index: 0, kind: input, shape index: {}]   ;;  %s164_s2 = inlined_call_operand.vmem [shape: f32[1,1,128], index: 2, kind: input, shape index: {}]   ;;  %s165_s3 = inlined_call_operand.vmem [shape: bf16[1,8,128], index: 3, kind: output, shape index: {}]  }
   0x1   :  { %107 = vmatprep.subr.bf16.mxu0 %v122_v0  ;;  %v119_v1 = vld [vmem:[%s162_s1] sm:$0xff]   ;;  %113 = vmatprep.mubr.msk.bf16.mxu0 %vm123_vm0, %v122_v0  ;;  %v120_v2 = vld [vmem:[%s162_s1 + $0x8] sm:$0xff]   ;;  %v121_v3 = vld [vmem:[%s162_s1 + $0x10] sm:$0xff]  }
   0x2   :  { %108 = vmatpush3.bf16.msra.mxu0 %v119_v1  ;;  %v15_v4 = vld [vmem:[%s163_s0] sm:$0xf] }
   0x3   :  { %109 = vmatprep.subr.bf16.mxu0 %v122_v0  ;;  %v98_v5 = vld [vmem:[%s164_s2] ss:$0 sm:$0xff] }
   0x6   :  { %110 = vmatpush3.bf16.msra.mxu0 %v120_v2 }
   0x7   :  { %111 = vmatprep.subr.bf16.mxu0 %v122_v0 }
   0xa   :  { %112 = vmatpush3.bf16.msra.mxu0 %v121_v3 }
   0xd   :  { %114 = vmatmul.mubr.msk.bf16.vlgmr.msra.gmra.mrb[0].mxu0 %vm47_vm1, %v15_v4 }
  0xe0   :  { %v85_v6 = vpop.f32.mrb[0].mxu0 }
  0xe1   :  { %v86_v7 = vadd.f32 %v98_v5, %v85_v6  ;;  %v115_v8 = vpop.f32.mrb[1].mxu0 }
  0xe2   :  { %v88_v9 = vpop.f32.mrb[2].mxu0 }
  0xe3   :  { %v91_v10 = vmax.f32 %v86_v7, 0.0  ;;  %v116_v11 = vpop.f32.mrb[3].mxu0 }
  0xe5   :  { %v92_v12 = vpack.c.bf16 %v91_v10, %v91_v10 }
  0xe7   :  { %93 = vst [vmem:[%s165_s3] sm:$0xf] %v92_v12 }

// kernel: deeplab3_forward.16
= control target key start
LH: loop header
LB: loop body
LE: loop exit
PB: predicated region body
PF: predicated region fallthrough
CT: control target
= control target key end

     0   :  { %vm60_vm0 = vcmask 392192   ;;  %s235_s1 = inlined_call_operand.vmem [shape: bf16[1,48,128], index: 1, kind: input, shape index: {}]   ;;  %s236_s0 = inlined_call_operand.vmem [shape: bf16[1,32,48], index: 0, kind: input, shape index: {}]   ;;  %s237_s2 = inlined_call_operand.vmem [shape: f32[1,1,128], index: 2, kind: input, shape index: {}]   ;;  %s238_s3 = inlined_call_operand.vmem [shape: bf16[1,32,128], index: 3, kind: output, shape index: {}]  }
   0x1   :  { %v186_v0 = vld [vmem:[%s235_s1] sm:$0xff]   ;;  %v187_v1 = vld [vmem:[%s235_s1 + $0x8] sm:$0xff]   ;;  %v188_v3 = vld [vmem:[%s235_s1 + $0x10] sm:$0xff]  }
   0x2   :  { %176 = vmatprep.subr.bf16.mxu0 %v186_v0  ;;  %v189_v2 = vld [vmem:[%s236_s0] sm:$0xff]   ;;  %v190_v4 = vld [vmem:[%s236_s0 + $0x8] sm:$0xff]  }
   0x3   :  { %177 = vmatpush3.bf16.msra.mxu0 %v186_v0  ;;  %182 = vmatprep.mubr.msk.bf16.mxu0 %vm60_vm0, %v189_v2  ;;  %v144_v5 = vld [vmem:[%s237_s2] ss:$0 sm:$0xff] }
   0x4   :  { %178 = vmatprep.subr.bf16.mxu0 %v187_v1 }
   0x7   :  { %179 = vmatpush3.bf16.msra.mxu0 %v187_v1 }
   0x8   :  { %180 = vmatprep.subr.bf16.mxu0 %v188_v3 }
   0xb   :  { %181 = vmatpush3.bf16.msra.mxu0 %v188_v3 }
   0xe   :  { %183 = vmatmul.mubr.msk.bf16.vlgmr.msra.gmra.mrb[0].mxu0 %vm60_vm0, %v190_v4 }
  0xe1   :  { %v184_v6 = vpop.f32.mrb[0].mxu0 }
  0xe2   :  { %v110_v7 = vadd.f32 %v184_v6, %v144_v5  ;;  %v101_v8 = vpop.f32.mrb[1].mxu0 }
  0xe3   :  { %v102_v9 = vadd.f32 %v144_v5, %v101_v8  ;;  %v185_v10 = vpop.f32.mrb[2].mxu0 }
  0xe4   :  { %v113_v11 = vadd.f32 %v185_v10, %v144_v5  ;;  %v104_v12 = vpop.f32.mrb[3].mxu0  ;;  %v118_v14 = vmax.f32 %v110_v7, 0.0 }
  0xe5   :  { %v105_v13 = vadd.f32 %v144_v5, %v104_v12  ;;  %v116_v16 = vmax.f32 %v102_v9, 0.0 }
  0xe6   :  { %v119_v15 = vmax.f32 %v113_v11, 0.0 }
  0xe7   :  { %v117_v17 = vmax.f32 %v105_v13, 0.0 }
  0xe8   :  { %v168_v18 = vpack.c.bf16 %v119_v15, %v118_v14 }
  0xe9   :  { %v163_v19 = vpack.c.bf16 %v117_v17, %v116_v16 }
  0xea   :  { %170 = vst [vmem:[%s238_s3 + $0x8] sm:$0xff] %v168_v18  }
  0xeb   :  { %164 = vst [vmem:[%s238_s3] sm:$0xff] %v163_v19  }

// kernel: deeplab3_forward.19
= control target key start
LH: loop header
LB: loop body
LE: loop exit
PB: predicated region body
PF: predicated region fallthrough
CT: control target
= control target key end

     0   :  { %vm220_vm0 = vcmask 523264   ;;  %s582_s1 = inlined_call_operand.vmem [shape: bf16[1,320,128], index: 1, kind: input, shape index: {}]   ;;  %s583_s0 = inlined_call_operand.vmem [shape: bf16[1,32,320], index: 0, kind: input, shape index: {}]   ;;  %s584_s2 = inlined_call_operand.vmem [shape: f32[1,1,128], index: 2, kind: input, shape index: {}]   ;;  %s585_s3 = inlined_call_operand.vmem [shape: bf16[1,32,128], index: 3, kind: output, shape index: {}]  }
   0x1   :  { %v447_v0 = vld [vmem:[%s582_s1 + $0x40] sm:$0xff]   ;;  %v449_v2 = vld [vmem:[%s582_s1 + $0x48] sm:$0xff]   ;;  %v451_v4 = vld [vmem:[%s582_s1 + $0x50] sm:$0xff]  }
   0x2   :  { %v448_v1 = vld [vmem:[%s582_s1] sm:$0xff]   ;;  %401 = vmatprep.subr.bf16.mxu0 %v447_v0  ;;  %v450_v3 = vld [vmem:[%s582_s1 + $0x8] sm:$0xff]   ;;  %v452_v5 = vld [vmem:[%s582_s1 + $0x10] sm:$0xff]  }
   0x3   :  { %402 = vmatpush3.bf16.msra.mxu0 %v448_v1  ;;  %v453_v6 = vld [vmem:[%s582_s1 + $0x58] sm:$0xff]   ;;  %v458_v8 = vld [vmem:[%s582_s1 + $0x80] sm:$0xff]   ;;  %v461_v10 = vld [vmem:[%s582_s1 + $0x88] sm:$0xff]  }
   0x4   :  { %403 = vmatprep.subr.bf16.mxu0 %v449_v2  ;;  %v454_v7 = vld [vmem:[%s582_s1 + $0x18] sm:$0xff]   ;;  %v455_v9 = vld [vmem:[%s582_s1 + $0x60] sm:$0xff]   ;;  %435 = vmatprep.subr.bf16.mxu1 %v458_v8  ;;  %v457_v12 = vld [vmem:[%s582_s1 + $0x68] sm:$0xff]  }
   0x5   :  { %436 = vmatpush3.bf16.msra.mxu1 %v458_v8  ;;  %v456_v11 = vld [vmem:[%s582_s1 + $0x20] sm:$0xff]   ;;  %v464_v13 = vld [vmem:[%s582_s1 + $0x90] sm:$0xff]   ;;  %v459_v14 = vld [vmem:[%s582_s1 + $0x28] sm:$0xff]  }
   0x6   :  { %437 = vmatprep.subr.bf16.mxu1 %v461_v10  ;;  %v460_v15 = vld [vmem:[%s582_s1 + $0x70] sm:$0xff]   ;;  %v469_v17 = vld [vmem:[%s582_s1 + $0x98] sm:$0xff]   ;;  %v471_v21 = vld [vmem:[%s583_s0 + $0x20] ss:$12 sps:$4 sm:$0xff]  }
   0x7   :  { %404 = vmatpush3.bf16.msra.mxu0 %v450_v3  ;;  %v468_v16 = vld [vmem:[%s583_s0 + $0x4] ss:$12 sps:$4 sm:$0xff]   ;;  %v470_v18 = vld [vmem:[%s583_s0 + $0x8] ss:$12 sps:$4 sm:$0xff]   ;;  %v463_v20 = vld [vmem:[%s582_s1 + $0x78] sm:$0xff]  }
   0x8   :  { %405 = vmatprep.subr.bf16.mxu0 %v451_v4  ;;  %259 = vmatprep.mubr.bf16.mxu0 %v468_v16  ;;  %v462_v19 = vld [vmem:[%s582_s1 + $0x30] sm:$0xff]   ;;  %v465_v22 = vld [vmem:[%s582_s1 + $0x38] sm:$0xff]   ;;  %v466_v23 = vld [vmem:[%s583_s0] ss:$12 sps:$4 sm:$0xff]  }
   0x9   :  { %438 = vmatpush3.bf16.msra.mxu1 %v461_v10  ;;  %443 = vmatprep.mubr.msk.bf16.mxu1 %vm220_vm0, %v470_v18  ;;  %v472_v24 = vld [vmem:[%s583_s0 + $0x1c] ss:$12 sps:$4 sm:$0xff]   ;;  %v474_v25 = vld [vmem:[%s583_s0 + $0x18] ss:$12 sps:$4 sm:$0xff]   ;;  %v353_v32 = vld [vmem:[%s584_s2] ss:$0 sm:$0xff] }
   0xa   :  { %439 = vmatprep.subr.bf16.mxu1 %v464_v13 }
   0xb   :  { %406 = vmatpush3.bf16.msra.mxu0 %v452_v5 }
   0xc   :  { %407 = vmatprep.subr.bf16.mxu0 %v453_v6 }
   0xd   :  { %440 = vmatpush3.bf16.msra.mxu1 %v464_v13 }
   0xe   :  { %441 = vmatprep.subr.bf16.mxu1 %v469_v17 }
   0xf   :  { %408 = vmatpush3.bf16.msra.mxu0 %v454_v7 }
  0x10   :  { %409 = vmatprep.subr.bf16.mxu0 %v455_v9 }
  0x11   :  { %442 = vmatpush3.bf16.msra.mxu1 %v469_v17 }
  0x13   :  { %410 = vmatpush3.bf16.msra.mxu0 %v456_v11 }
  0x14   :  { %411 = vmatprep.subr.bf16.mxu0 %v457_v12  ;;  %444 = vmatmul.mubr.msk.bf16.vlgmr.msra.gmra.mrb[0].mxu1 %vm220_vm0, %v471_v21 }
  0x17   :  { %412 = vmatpush3.bf16.msra.mxu0 %v459_v14 }
  0x18   :  { %413 = vmatprep.subr.bf16.mxu0 %v460_v15 }
  0x1b   :  { %414 = vmatpush3.bf16.msra.mxu0 %v462_v19 }
  0x1c   :  { %415 = vmatprep.subr.bf16.mxu0 %v463_v20 }
  0x1f   :  { %416 = vmatpush3.bf16.msra.mxu0 %v465_v22 }
  0x22   :  { %260 = vmatmul.mubr.bf16.vlgmr.msra.gmra.mrb[0].mxu0 %v466_v23 }
  0x23   :  { %267 = vmatprep.mubr.bf16.mxu0 %v472_v24 }
  0x2a   :  { %268 = vmatmul.mubr.bf16.gmra.mrb[4].mxu0 %v474_v25 }
  0xe7   :  { %v445_v26 = vpop.f32.mrb[0].mxu1 }
  0xe8   :  { %v310_v27 = vpop.f32.mrb[1].mxu1 }
  0xe9   :  { %v446_v28 = vpop.f32.mrb[2].mxu1 }
  0xea   :  { %v313_v29 = vpop.f32.mrb[3].mxu1 }
  0xf5   :  { %v417_v30 = vpop.f32.mrb[0].mxu0 }
  0xf6   :  { %v418_v31 = vpop.f32.mrb[1].mxu0 }
  0xf7   :  { %v419_v33 = vadd.f32 %v418_v31, %v417_v30  ;;  %v420_v34 = vpop.f32.mrb[2].mxu0 }
  0xf8   :  { %v421_v35 = vpop.f32.mrb[3].mxu0 }
  0xf9   :  { %v422_v36 = vadd.f32 %v421_v35, %v420_v34  ;;  %v262_v37 = vadd.f32 %v419_v33, %v353_v32 }
  0xfb   :  { %v311_v38 = vadd.f32 %v310_v27, %v262_v37  ;;  %v265_v39 = vadd.f32 %v422_v36, %v353_v32 }
  0xfd   :  { %v314_v40 = vadd.f32 %v313_v29, %v265_v39  ;;  %v423_v41 = vpop.f32.mrb[4].mxu0  ;;  %v325_v43 = vmax.f32 %v311_v38, 0.0 }
  0xfe   :  { %v424_v42 = vpop.f32.mrb[5].mxu0 }
  0xff   :  { %v326_v44 = vmax.f32 %v314_v40, 0.0  ;;  %v425_v45 = vadd.f32 %v424_v42, %v423_v41  ;;  %v426_v46 = vpop.f32.mrb[6].mxu0 }
 0x100   :  { %v427_v47 = vpop.f32.mrb[7].mxu0 }
 0x101   :  { %v393_v48 = vpack.c.bf16 %v326_v44, %v325_v43  ;;  %v270_v49 = vadd.f32 %v425_v45, %v353_v32  ;;  %v428_v50 = vadd.f32 %v427_v47, %v426_v46 }
 0x103   :  { %394 = vst [vmem:[%s585_s3] sm:$0xff] %v393_v48   ;;  %v319_v51 = vadd.f32 %v445_v26, %v270_v49  ;;  %v273_v52 = vadd.f32 %v428_v50, %v353_v32 }
 0x105   :  { %v322_v53 = vadd.f32 %v446_v28, %v273_v52  ;;  %v327_v54 = vmax.f32 %v319_v51, 0.0 }
 0x107   :  { %v328_v55 = vmax.f32 %v322_v53, 0.0 }
 0x109   :  { %v398_v56 = vpack.c.bf16 %v328_v55, %v327_v54 }
 0x10b   :  { %400 = vst [vmem:[%s585_s3 + $0x8] sm:$0xff] %v398_v56  }

// kernel: deeplab3_forward.21
= control target key start
LH: loop header
LB: loop body
LE: loop exit
PB: predicated region body
PF: predicated region fallthrough
CT: control target
= control target key end

     0   :  { %vm68_vm0 = vcmask 523264   ;;  %s218_s1 = inlined_call_operand.vmem [shape: bf16[1,64,128], index: 1, kind: input, shape index: {}]   ;;  %s219_s0 = inlined_call_operand.vmem [shape: bf16[1,32,64], index: 0, kind: input, shape index: {}]   ;;  %s220_s2 = inlined_call_operand.vmem [shape: f32[1,1,128], index: 2, kind: input, shape index: {}]   ;;  %s221_s3 = inlined_call_operand.vmem [shape: f32[1,32,128], index: 3, kind: output, shape index: {}]  }
   0x1   :  { %v159_v0 = vld [vmem:[%s218_s1] sm:$0xff]   ;;  %v160_v1 = vld [vmem:[%s218_s1 + $0x8] sm:$0xff]   ;;  %v161_v2 = vld [vmem:[%s218_s1 + $0x10] sm:$0xff]  }
   0x2   :  { %147 = vmatprep.subr.bf16.mxu0 %v159_v0  ;;  %v163_v3 = vld [vmem:[%s219_s0] sm:$0xff]   ;;  %v162_v4 = vld [vmem:[%s218_s1 + $0x18] sm:$0xff]   ;;  %v164_v5 = vld [vmem:[%s219_s0 + $0x8] sm:$0xff]  }
   0x3   :  { %148 = vmatpush3.bf16.msra.mxu0 %v159_v0  ;;  %155 = vmatprep.mubr.msk.bf16.mxu0 %vm68_vm0, %v163_v3  ;;  %v132_v6 = vld [vmem:[%s220_s2] ss:$0 sm:$0xff] }
   0x4   :  { %149 = vmatprep.subr.bf16.mxu0 %v160_v1 }
   0x7   :  { %150 = vmatpush3.bf16.msra.mxu0 %v160_v1 }
   0x8   :  { %151 = vmatprep.subr.bf16.mxu0 %v161_v2 }
   0xb   :  { %152 = vmatpush3.bf16.msra.mxu0 %v161_v2 }
   0xc   :  { %153 = vmatprep.subr.bf16.mxu0 %v162_v4 }
   0xf   :  { %154 = vmatpush3.bf16.msra.mxu0 %v162_v4 }
  0x12   :  { %156 = vmatmul.mubr.msk.bf16.vlgmr.msra.gmra.mrb[0].mxu0 %vm68_vm0, %v164_v5 }
  0xe5   :  { %v157_v7 = vpop.f32.mrb[0].mxu0 }
  0xe6   :  { %v118_v8 = vadd.f32 %v157_v7, %v132_v6  ;;  %v109_v9 = vpop.f32.mrb[1].mxu0 }
  0xe7   :  { %v110_v10 = vadd.f32 %v132_v6, %v109_v9  ;;  %v158_v11 = vpop.f32.mrb[2].mxu0 }
  0xe8   :  { %126 = vst [vmem:[%s221_s3 + $0x10] sm:$0xff] %v118_v8  ;;  %v121_v12 = vadd.f32 %v158_v11, %v132_v6  ;;  %v112_v13 = vpop.f32.mrb[3].mxu0 }
  0xe9   :  { %124 = vst [vmem:[%s221_s3] sm:$0xff] %v110_v10  ;;  %v113_v14 = vadd.f32 %v132_v6, %v112_v13 }
  0xea   :  { %127 = vst [vmem:[%s221_s3 + $0x18] sm:$0xff] %v121_v12 }
  0xeb   :  { %125 = vst [vmem:[%s221_s3 + $0x8] sm:$0xff] %v113_v14 }

// kernel: deeplab3_forward.22
= control target key start
LH: loop header
LB: loop body
LE: loop exit
PB: predicated region body
PF: predicated region fallthrough
CT: control target
= control target key end

     0   :  { %s717_s12 = smov 0   ;;  %s719_s13 = smov 0   ;;  %s765_s0 = inlined_call_operand.vmem [shape: bf16[8,64,8], index: 0, kind: input, shape index: {}]   ;;  %s766_s1 = inlined_call_operand.vmem [shape: bf16[8,8,128], index: 1, kind: input, shape index: {}]   ;;  %s767_s2 = inlined_call_operand.vmem [shape: f32[8,1,128], index: 2, kind: input, shape index: {}]   ;;  %s768_s3 = inlined_call_operand.vmem [shape: bf16[8,64,128], index: 3, kind: output, shape index: {}]  }
   0x1   :  { %s721_s14 = smov 0  }
   0x2 LB: > { %s32_s15 = sadd.s32 1, %s691_s13  ;;  %p568_p0 = scmp.ge.s32.totalorder %s695_s14, 1  ;;  %s695_s14 = sphi %s721_s14, %s13_s14   ;;  %s691_s13 = sphi %s719_s13, %s770_s13   ;;  %s687_s12 = sphi %s717_s12, %s769_s12  }
   0x3   : > { %p34_p1 = scmp.ge.s32.totalorder %s32_s15, 8  ;;  %p194_p2 = scmp.lt.s32.totalorder %s695_s14, 9 }
   0x5   : > { %s772_s15 = smov (%p34_p1, %s32_s15), 0  ;;  %p195_p3 = pnand %p568_p0, %p194_p2 }
   0x6   : > { %p243_p4 = scmp.lt.s32.totalorder (!%p195_p3), %s687_s12, 7  ;;  %vm328_vm0 = vcmask (!%p195_p3), 1043456   ;;  %vm315_vm1 = vcmask (!%p195_p3), 64512  }
   0x7   : > { %198 = sbr.rel (%p195_p3) target bundleno = 242 (0xf2), region = 32 }
   0xe   : > { %s774_s12 = smov (!%p243_p4, %s687_s12), 7 }
   0xf   : > { %s593_s16 = sshll.u32 %s774_s12, 5  ;;  %s571_s17 = sshll.u32 %s774_s12, 2 }
  0x10   : > { %s250_s20 = scalar_lea.vmem %s765_s0, %s593_s16  ;;  %s258_s23 = scalar_lea.vmem %s766_s1, %s571_s17 }
  0x11   : > { %v287_v0 = vld [vmem:[%s258_s23] sm:$0xf]  ;;  %v670_v3 = vld [vmem:[%s250_s20 + $0x10] sm:$0xff]   ;;  %v671_v4 = vld [vmem:[%s250_s20 + $0x8] sm:$0xff]   ;;  %s264_s26 = scalar_lea.vmem %s767_s2, %s774_s12  ;;  %s276_s29 = scalar_lea.vmem %s768_s3, %s593_s16 }
  0x12   : > { %643 = vmatprep.subr.msk.bf16.mxu0 %vm328_vm0, %v287_v0  ;;  %644 = vmatprep.subr.msk.bf16.mxu1 %vm328_vm0, %v287_v0  ;;  %v330_v1 = vsel %vm328_vm0, %v287_v0, 0  ;;  %v669_v2 = vld [vmem:[%s250_s20] sm:$0xff]   ;;  %v672_v5 = vld [vmem:[%s250_s20 + $0x18] sm:$0xff]  }
  0x13   : > { %632 = vmatpush3.bf16.msra.mxu0 %v330_v1  ;;  %642 = vmatpush3.bf16.msra.mxu1 %v330_v1  ;;  %v574_v6 = vld [vmem:[%s264_s26] ss:$0 sm:$0xff] }
  0x14   : > { %633 = vmatprep.mubr.msk.bf16.mxu0 %vm315_vm1, %v669_v2  ;;  %637 = vmatprep.mubr.msk.bf16.mxu1 %vm315_vm1, %v670_v3 }
  0x16   : > { %634 = vmatmul.mubr.msk.bf16.vlgmr.msra.gmra.mrb[0].mxu0 %vm315_vm1, %v671_v4  ;;  %638 = vmatmul.mubr.msk.bf16.vlgmr.msra.gmra.mrb[0].mxu1 %vm315_vm1, %v672_v5 }
  0xe9   : > { %v635_v7 = vpop.f32.mrb[0].mxu0  ;;  %v639_v9 = vpop.f32.mrb[0].mxu1 }
  0xea   : > { %v375_v8 = vadd.f32 %v635_v7, %v574_v6  ;;  %v366_v10 = vpop.f32.mrb[1].mxu0  ;;  %v391_v11 = vadd.f32 %v639_v9, %v574_v6  ;;  %v382_v13 = vpop.f32.mrb[1].mxu1 }
  0xeb   : > { %v367_v12 = vadd.f32 %v574_v6, %v366_v10  ;;  %v636_v14 = vpop.f32.mrb[2].mxu0  ;;  %v383_v15 = vadd.f32 %v574_v6, %v382_v13  ;;  %v640_v17 = vpop.f32.mrb[2].mxu1 }
  0xec   : > { %v378_v16 = vadd.f32 %v636_v14, %v574_v6  ;;  %v369_v18 = vpop.f32.mrb[3].mxu0  ;;  %v394_v19 = vadd.f32 %v640_v17, %v574_v6  ;;  %v385_v21 = vpop.f32.mrb[3].mxu1 }
  0xed   : > { %v370_v20 = vadd.f32 %v574_v6, %v369_v18  ;;  %v386_v23 = vadd.f32 %v574_v6, %v385_v21 }
  0xee   : > { %v611_v22 = vpack.c.bf16 %v378_v16, %v375_v8  ;;  %v621_v24 = vpack.c.bf16 %v394_v19, %v391_v11 }
  0xef   : > { %v606_v25 = vpack.c.bf16 %v370_v20, %v367_v12  ;;  %v616_v26 = vpack.c.bf16 %v386_v23, %v383_v15 }
  0xf0   : > { %623 = vst [vmem:[%s276_s29 + $0x8] sm:$0xff] %v611_v22   ;;  %625 = vst [vmem:[%s276_s29 + $0x18] sm:$0xff] %v621_v24  }
  0xf1   : > { %607 = vst [vmem:[%s276_s29] sm:$0xff] %v606_v25   ;;  %624 = vst [vmem:[%s276_s29 + $0x10] sm:$0xff] %v616_v26  }
  0xf2 PF: > { %s13_s14 = sadd.s32 1, %s695_s14   ;;  %s769_s12 = smov %s691_s13 }
  0xf3   : > { %p10_p5 = scmp.ge.s32.totalorder %s13_s14, 10   ;;  %s770_s13 = smov %s772_s15 }
  0xf5   :  { %12 = sbr.rel (!%p10_p5) target bundleno = 2 (0x2), region = 68 }

// kernel: deeplab3_forward.20
= control target key start
LH: loop header
LB: loop body
LE: loop exit
PB: predicated region body
PF: predicated region fallthrough
CT: control target
= control target key end

     0   :  { %vm372_vm0 = vcmask 523264   ;;  %s913_s1 = inlined_call_operand.vmem [shape: bf16[1,576,128], index: 1, kind: input, shape index: {}]   ;;  %s914_s0 = inlined_call_operand.vmem [shape: bf16[1,32,576], index: 0, kind: input, shape index: {}]   ;;  %s915_s2 = inlined_call_operand.vmem [shape: f32[1,1,128], index: 2, kind: input, shape index: {}]   ;;  %s916_s3 = inlined_call_operand.vmem [shape: bf16[1,32,128], index: 3, kind: output, shape index: {}]  }
   0x1   :  { %v696_v0 = vld [vmem:[%s913_s1 + $0x40] sm:$0xff]   ;;  %v700_v4 = vld [vmem:[%s913_s1 + $0x48] sm:$0xff]   ;;  %v704_v8 = vld [vmem:[%s913_s1 + $0x50] sm:$0xff]  }
   0x2   :  { %v697_v1 = vld [vmem:[%s913_s1] sm:$0xff]   ;;  %622 = vmatprep.subr.bf16.mxu0 %v696_v0  ;;  %v701_v5 = vld [vmem:[%s913_s1 + $0x8] sm:$0xff]   ;;  %v705_v9 = vld [vmem:[%s913_s1 + $0x10] sm:$0xff]  }
   0x3   :  { %v698_v2 = vld [vmem:[%s913_s1 + $0xc0] sm:$0xff]   ;;  %623 = vmatpush3.bf16.msra.mxu0 %v697_v1  ;;  %v702_v6 = vld [vmem:[%s913_s1 + $0xc8] sm:$0xff]   ;;  %v706_v10 = vld [vmem:[%s913_s1 + $0xd0] sm:$0xff]  }
   0x4   :  { %v699_v3 = vld [vmem:[%s913_s1 + $0x80] sm:$0xff]   ;;  %650 = vmatprep.subr.bf16.mxu1 %v698_v2  ;;  %624 = vmatprep.subr.bf16.mxu0 %v700_v4  ;;  %v703_v7 = vld [vmem:[%s913_s1 + $0x88] sm:$0xff]   ;;  %v707_v11 = vld [vmem:[%s913_s1 + $0x90] sm:$0xff]  }
   0x5   :  { %651 = vmatpush3.bf16.msra.mxu1 %v699_v3  ;;  %v708_v12 = vld [vmem:[%s913_s1 + $0x58] sm:$0xff]   ;;  %v712_v16 = vld [vmem:[%s913_s1 + $0x60] sm:$0xff]   ;;  %v716_v20 = vld [vmem:[%s913_s1 + $0x68] sm:$0xff]  }
   0x6   :  { %652 = vmatprep.subr.bf16.mxu1 %v702_v6  ;;  %v709_v13 = vld [vmem:[%s913_s1 + $0x18] sm:$0xff]   ;;  %v713_v17 = vld [vmem:[%s913_s1 + $0x20] sm:$0xff]   ;;  %v717_v21 = vld [vmem:[%s913_s1 + $0x28] sm:$0xff]  }
   0x7   :  { %625 = vmatpush3.bf16.msra.mxu0 %v701_v5  ;;  %v710_v14 = vld [vmem:[%s913_s1 + $0xd8] sm:$0xff]   ;;  %v714_v18 = vld [vmem:[%s913_s1 + $0xe0] sm:$0xff]   ;;  %v718_v22 = vld [vmem:[%s913_s1 + $0xe8] sm:$0xff]  }
   0x8   :  { %626 = vmatprep.subr.bf16.mxu0 %v704_v8  ;;  %v711_v15 = vld [vmem:[%s913_s1 + $0x98] sm:$0xff]   ;;  %v715_v19 = vld [vmem:[%s913_s1 + $0xa0] sm:$0xff]   ;;  %v719_v23 = vld [vmem:[%s913_s1 + $0xa8] sm:$0xff]  }
   0x9   :  { %653 = vmatpush3.bf16.msra.mxu1 %v703_v7  ;;  %v720_v24 = vld [vmem:[%s913_s1 + $0x70] sm:$0xff]   ;;  %v724_v28 = vld [vmem:[%s913_s1 + $0x78] sm:$0xff]   ;;  %v731_v34 = vld [vmem:[%s913_s1 + $0x100] sm:$0xff]  }
   0xa   :  { %654 = vmatprep.subr.bf16.mxu1 %v706_v10  ;;  %v721_v25 = vld [vmem:[%s913_s1 + $0x30] sm:$0xff]   ;;  %v725_v29 = vld [vmem:[%s913_s1 + $0x38] sm:$0xff]   ;;  %v734_v36 = vld [vmem:[%s914_s0 + $0xc] ss:$20 sps:$4 sm:$0xff]  }
   0xb   :  { %627 = vmatpush3.bf16.msra.mxu0 %v705_v9  ;;  %v722_v26 = vld [vmem:[%s913_s1 + $0xf0] sm:$0xff]   ;;  %v726_v30 = vld [vmem:[%s913_s1 + $0xf8] sm:$0xff]   ;;  %v735_v37 = vld [vmem:[%s913_s1 + $0x108] sm:$0xff]   ;;  %460 = vmatprep.mubr.bf16.mxu1 %v734_v36 }
   0xc   :  { %628 = vmatprep.subr.bf16.mxu0 %v708_v12  ;;  %v723_v27 = vld [vmem:[%s913_s1 + $0xb0] sm:$0xff]   ;;  %v729_v32 = vld [vmem:[%s914_s0 + $0x4] ss:$20 sps:$4 sm:$0xff]   ;;  %v732_v35 = vld [vmem:[%s914_s0 + $0x8] ss:$20 sps:$4 sm:$0xff]  }
   0xd   :  { %655 = vmatpush3.bf16.msra.mxu1 %v707_v11  ;;  %v727_v31 = vld [vmem:[%s914_s0] ss:$20 sps:$4 sm:$0xff]   ;;  %v730_v33 = vld [vmem:[%s913_s1 + $0xb8] sm:$0xff]   ;;  %411 = vmatprep.mubr.bf16.mxu0 %v729_v32  ;;  %v742_v42 = vld [vmem:[%s914_s0 + $0x30] ss:$20 sps:$4 sm:$0xff]  }
   0xe   :  { %656 = vmatprep.subr.bf16.mxu1 %v710_v14  ;;  %v736_v38 = vld [vmem:[%s914_s0 + $0x2c] ss:$20 sps:$4 sm:$0xff]   ;;  %v738_v39 = vld [vmem:[%s914_s0 + $0x28] ss:$20 sps:$4 sm:$0xff]   ;;  %v739_v40 = vld [vmem:[%s913_s1 + $0x110] sm:$0xff]  }
   0xf   :  { %629 = vmatpush3.bf16.msra.mxu0 %v709_v13  ;;  %v740_v41 = vld [vmem:[%s914_s0 + $0x34] ss:$20 sps:$4 sm:$0xff]   ;;  %v743_v43 = vld [vmem:[%s913_s1 + $0x118] sm:$0xff]   ;;  %v744_v44 = vld [vmem:[%s914_s0 + $0x10] ss:$20 sps:$4 sm:$0xff]  }
  0x10   :  { %630 = vmatprep.subr.bf16.mxu0 %v712_v16  ;;  %v745_v45 = vld [vmem:[%s914_s0 + $0x38] ss:$20 sps:$4 sm:$0xff]   ;;  %v554_v47 = vld [vmem:[%s915_s2] ss:$0 sm:$0xff] }
  0x11   :  { %657 = vmatpush3.bf16.msra.mxu1 %v711_v15 }
  0x12   :  { %658 = vmatprep.subr.bf16.mxu1 %v714_v18 }
  0x13   :  { %631 = vmatpush3.bf16.msra.mxu0 %v713_v17 }
  0x14   :  { %632 = vmatprep.subr.bf16.mxu0 %v716_v20 }
  0x15   :  { %659 = vmatpush3.bf16.msra.mxu1 %v715_v19 }
  0x16   :  { %660 = vmatprep.subr.bf16.mxu1 %v718_v22 }
  0x17   :  { %633 = vmatpush3.bf16.msra.mxu0 %v717_v21 }
  0x18   :  { %634 = vmatprep.subr.bf16.mxu0 %v720_v24 }
  0x19   :  { %661 = vmatpush3.bf16.msra.mxu1 %v719_v23 }
  0x1a   :  { %662 = vmatprep.subr.bf16.mxu1 %v722_v26 }
  0x1b   :  { %635 = vmatpush3.bf16.msra.mxu0 %v721_v25 }
  0x1c   :  { %636 = vmatprep.subr.bf16.mxu0 %v724_v28 }
  0x1d   :  { %663 = vmatpush3.bf16.msra.mxu1 %v723_v27 }
  0x1e   :  { %664 = vmatprep.subr.bf16.mxu1 %v726_v30 }
  0x1f   :  { %637 = vmatpush3.bf16.msra.mxu0 %v725_v29 }
  0x20   :  { %684 = vmatprep.subr.bf16.mxu0 %v731_v34 }
  0x21   :  { %665 = vmatpush3.bf16.msra.mxu1 %v730_v33 }
  0x22   :  { %412 = vmatmul.mubr.bf16.vlgmr.msra.gmra.mrb[0].mxu0 %v727_v31 }
  0x23   :  { %685 = vmatpush3.bf16.msra.mxu0 %v731_v34  ;;  %419 = vmatprep.mubr.bf16.mxu0 %v736_v38 }
  0x24   :  { %461 = vmatmul.mubr.bf16.vlgmr.msra.gmra.mrb[0].mxu1 %v732_v35  ;;  %686 = vmatprep.subr.bf16.mxu0 %v735_v37 }
  0x25   :  { %468 = vmatprep.mubr.bf16.mxu1 %v740_v41 }
  0x27   :  { %687 = vmatpush3.bf16.msra.mxu0 %v735_v37 }
  0x28   :  { %688 = vmatprep.subr.bf16.mxu0 %v739_v40 }
  0x2a   :  { %420 = vmatmul.mubr.bf16.gmra.mrb[4].mxu0 %v738_v39 }
  0x2b   :  { %692 = vmatprep.mubr.msk.bf16.mxu0 %vm372_vm0, %v744_v44  ;;  %689 = vmatpush3.bf16.msra.mxu0 %v739_v40 }
  0x2c   :  { %469 = vmatmul.mubr.bf16.gmra.mrb[4].mxu1 %v742_v42  ;;  %690 = vmatprep.subr.bf16.mxu0 %v743_v43 }
  0x2f   :  { %691 = vmatpush3.bf16.msra.mxu0 %v743_v43 }
  0x32   :  { %693 = vmatmul.mubr.msk.bf16.vlgmr.msra.gmra.mrb[8].mxu0 %vm372_vm0, %v745_v45 }
  0xf5   :  { %v638_v46 = vpop.f32.mrb[0].mxu0 }
  0xf6   :  { %v639_v48 = vpop.f32.mrb[1].mxu0 }
  0xf7   :  { %v640_v49 = vadd.f32 %v639_v48, %v638_v46  ;;  %v641_v50 = vpop.f32.mrb[2].mxu0  ;;  %v666_v51 = vpop.f32.mrb[0].mxu1 }
  0xf8   :  { %v642_v52 = vpop.f32.mrb[3].mxu0  ;;  %v667_v55 = vpop.f32.mrb[1].mxu1 }
  0xf9   :  { %v414_v53 = vadd.f32 %v640_v49, %v554_v47  ;;  %v643_v54 = vadd.f32 %v642_v52, %v641_v50  ;;  %v668_v56 = vadd.f32 %v667_v55, %v666_v51  ;;  %v669_v57 = vpop.f32.mrb[2].mxu1 }
  0xfa   :  { %v670_v59 = vpop.f32.mrb[3].mxu1 }
  0xfb   :  { %v417_v58 = vadd.f32 %v643_v54, %v554_v47  ;;  %v671_v60 = vadd.f32 %v670_v59, %v669_v57  ;;  %v463_v61 = vadd.f32 %v668_v56, %v414_v53 }
  0xfd   :  { %v644_v62 = vpop.f32.mrb[4].mxu0  ;;  %v466_v0 = vadd.f32 %v671_v60, %v417_v58 }
  0xfe   :  { %v645_v63 = vpop.f32.mrb[5].mxu0 }
  0xff   :  { %v646_v1 = vadd.f32 %v645_v63, %v644_v62  ;;  %v647_v2 = vpop.f32.mrb[6].mxu0  ;;  %v672_v3 = vpop.f32.mrb[4].mxu1 }
 0x100   :  { %v648_v4 = vpop.f32.mrb[7].mxu0  ;;  %v673_v7 = vpop.f32.mrb[5].mxu1 }
 0x101   :  { %v422_v5 = vadd.f32 %v646_v1, %v554_v47  ;;  %v649_v6 = vadd.f32 %v648_v4, %v647_v2  ;;  %v674_v8 = vadd.f32 %v673_v7, %v672_v3  ;;  %v675_v9 = vpop.f32.mrb[6].mxu1 }
 0x102   :  { %v676_v11 = vpop.f32.mrb[7].mxu1 }
 0x103   :  { %v425_v10 = vadd.f32 %v649_v6, %v554_v47  ;;  %v677_v12 = vadd.f32 %v676_v11, %v675_v9  ;;  %v471_v13 = vadd.f32 %v674_v8, %v422_v5 }
 0x105   :  { %v694_v14 = vpop.f32.mrb[8].mxu0  ;;  %v474_v15 = vadd.f32 %v677_v12, %v425_v10 }
 0x106   :  { %v520_v16 = vadd.f32 %v694_v14, %v471_v13  ;;  %v511_v17 = vpop.f32.mrb[9].mxu0 }
 0x107   :  { %v512_v18 = vadd.f32 %v511_v17, %v463_v61  ;;  %v695_v19 = vpop.f32.mrb[10].mxu0 }
 0x108   :  { %v523_v20 = vadd.f32 %v695_v19, %v474_v15  ;;  %v514_v21 = vpop.f32.mrb[11].mxu0  ;;  %v528_v23 = vmax.f32 %v520_v16, 0.0 }
 0x109   :  { %v515_v22 = vadd.f32 %v514_v21, %v466_v0  ;;  %v526_v25 = vmax.f32 %v512_v18, 0.0 }
 0x10a   :  { %v529_v24 = vmax.f32 %v523_v20, 0.0 }
 0x10b   :  { %v527_v26 = vmax.f32 %v515_v22, 0.0 }
 0x10c   :  { %v619_v27 = vpack.c.bf16 %v529_v24, %v528_v23 }
 0x10d   :  { %v614_v28 = vpack.c.bf16 %v527_v26, %v526_v25 }
 0x10e   :  { %621 = vst [vmem:[%s916_s3 + $0x8] sm:$0xff] %v619_v27  }
 0x10f   :  { %615 = vst [vmem:[%s916_s3] sm:$0xff] %v614_v28  }

// kernel: deeplab3_forward.23
= control target key start
LH: loop header
LB: loop body
LE: loop exit
PB: predicated region body
PF: predicated region fallthrough
CT: control target
= control target key end

     0   :  { %s753_s12 = smov 0   ;;  %s755_s13 = smov 0   ;;  %s858_s0 = inlined_call_operand.vmem [shape: bf16[2,64,8], index: 0, kind: input, shape index: {}]   ;;  %s859_s1 = inlined_call_operand.vmem [shape: bf16[2,8,1408], index: 1, kind: input, shape index: {}]   ;;  %s860_s2 = inlined_call_operand.vmem [shape: f32[2,1,1408], index: 2, kind: input, shape index: {}]   ;;  %s861_s3 = inlined_call_operand.vmem [shape: f32[2,64,1408], index: 3, kind: output, shape index: {}]  }
   0x1   :  { %s757_s14 = smov 0   ;;  %s759_s15 = smov 0  }
   0x2   :  { %s761_s16 = smov 0   ;;  %s763_s17 = smov 0  }
   0x3   :  { %s765_s18 = smov 0  }
   0x4 LB: > { %s25_s19 = sadd.s32 1, %s723_s16  ;;  %s32_s20 = sadd.s32 1, %s727_s17  ;;  %s731_s18 = sphi %s765_s18, %s13_s18   ;;  %s727_s17 = sphi %s763_s17, %s868_s17   ;;  %s723_s16 = sphi %s761_s16, %s867_s16   ;;  %s719_s15 = sphi %s759_s15, %s866_s15   ;;  %s715_s14 = sphi %s757_s14, %s865_s14   ;;  %s711_s13 = sphi %s755_s13, %s864_s13   ;;  %s707_s12 = sphi %s753_s12, %s863_s12  }
   0x5   : > { %p26_p0 = scmp.ge.s32.totalorder %s25_s19, 11  ;;  %s573_s21 = sadd.s32 4294967295, %s731_s18  }
   0x6   : > { %p137_p1 = scmp.ne.s32.totalorder %s711_s13, %s707_s12  ;;  %p138_p2 = scmp.eq.s32.totalorder %s573_s21, 21 }
   0x7   : > { %s870_s19 = smov (%p26_p0, %s25_s19), 0  ;;  %s872_s20 = smov (!%p26_p0, %s32_s20), %s727_s17 }
   0x8   : > { %s123_s22 = ssub.s32 %s723_s16, %s870_s19  ;;  %p34_p3 = scmp.ge.s32.totalorder %s872_s20, 2 }
   0x9   : > { %p577_p4 = scmp.ge.s32.totalorder %s731_s18, 1  ;;  %p799_p5 = por %p138_p2, %p137_p1 }
   0xa   : > { %p196_p6 = scmp.lt.s32.totalorder %s731_s18, 23  ;;  %s874_s20 = smov (%p34_p3, %s872_s20), 0 }
   0xb   : > { %s120_s24 = ssub.s32 %s727_s17, %s874_s20  ;;  %s127_s26 = sadd.s32 1, %s711_s13 }
   0xc   : > { %p197_p7 = pnand %p577_p4, %p196_p6  ;;  %s124_s25 = sor.u32 %s123_s22, %s120_s24 }
   0xd   : > { %p125_p8 = scmp.eq.s32.totalorder %s124_s25, 0  ;;  %p239_p9 = scmp.lt.s32.totalorder (!%p197_p7), %s719_s15, 1  ;;  %vm301_vm0 = vcmask (!%p197_p7), 64512   ;;  %vm314_vm1 = vcmask (!%p197_p7), 1043456  }
   0xe   : > { %200 = sbr.rel (%p197_p7) target bundleno = 260 (0x104), region = 32  ;;  %p250_p10 = scmp.lt.s32.totalorder (!%p197_p7), %s715_s14, 10 }
   0xf   : > { %s810_s27 = scalar_select %p125_p8, %s711_s13, %s127_s26  }
  0x10   : > { %s235_s22 = sand.u32 (!%p197_p7), 1, %s707_s12  }
  0x15   : > { %s240_s28 = scalar_select %p239_p9, %s719_s15, 1 }
  0x16   : > { %s251_s29 = scalar_select %p250_p10, %s715_s14, 10 }
  0x17   : > { %s595_s30 = sshll.u32 %s240_s28, 5  ;;  %s615_s4 = smul.u32 11, %s240_s28 }
  0x18   : > { %s246_s7 = scalar_lea.vmem %s858_s0, %s595_s30  ;;  %s578_s28 = sshll.u32 %s235_s22, 6 }
  0x19   : > { %s253_s8 = sadd.s32 %s615_s4, %s251_s29  ;;  %v673_v0 = vld [vmem:[%s246_s7] sm:$0xff]   ;;  %v674_v1 = vld [vmem:[%s246_s7 + $0x10] sm:$0xff]   ;;  %v675_v4 = vld [vmem:[%s246_s7 + $0x8] sm:$0xff]   ;;  %s237_s29 = scalar_lea.vmem [#allocation2], %s578_s28 }
  0x1a   : > { %s581_s9 = sshll.u32 %s253_s8, 2  ;;  %603 = vmatprep.mubr.msk.bf16.mxu0 %vm301_vm0, %v673_v0  ;;  %607 = vmatprep.mubr.msk.bf16.mxu1 %vm301_vm0, %v674_v1  ;;  %v676_v5 = vld [vmem:[%s246_s7 + $0x18] sm:$0xff]   ;;  %s262_s26 = scalar_lea.vmem %s860_s2, %s253_s8 }
  0x1b   : > { %s255_s21 = scalar_lea.vmem %s859_s1, %s581_s9  ;;  %v582_v6 = vld [vmem:[%s262_s26] ss:$0 sm:$0xff]  ;;  %s616_s12 = smul.u32 (%p799_p5), 88, %s719_s15 }
  0x1c   : > { %v273_v2 = vld [vmem:[%s255_s21] sm:$0xf] }
  0x1d   : > { %613 = vmatprep.subr.msk.bf16.mxu0 %vm314_vm1, %v273_v2  ;;  %614 = vmatprep.subr.msk.bf16.mxu1 %vm314_vm1, %v273_v2  ;;  %v316_v3 = vsel %vm314_vm1, %v273_v2, 0  ;;  %s402_s30 = sadd.s32 (%p799_p5), %s715_s14, %s616_s12 }
  0x1e   : > { %602 = vmatpush3.bf16.msra.mxu0 %v316_v3  ;;  %612 = vmatpush3.bf16.msra.mxu1 %v316_v3  ;;  %s592_s4 = sshll.u32 (%p799_p5), %s402_s30, 3 }
  0x1f   : > { %s404_s7 = scalar_lea.vmem (%p799_p5), %s861_s3, %s592_s4 }
  0x21   : > { %604 = vmatmul.mubr.msk.bf16.vlgmr.msra.gmra.mrb[0].mxu0 %vm301_vm0, %v675_v4  ;;  %608 = vmatmul.mubr.msk.bf16.vlgmr.msra.gmra.mrb[0].mxu1 %vm301_vm0, %v676_v5 }
  0xf4   : > { %v605_v7 = vpop.f32.mrb[0].mxu0  ;;  %v609_v8 = vpop.f32.mrb[0].mxu1  ;;  %397 = sbr.rel (!%p799_p5) target bundleno = 260 (0x104), region = 36 }
  0xf5   : > { %v361_v9 = vadd.f32 %v605_v7, %v582_v6  ;;  %v377_v10 = vadd.f32 %v609_v8, %v582_v6  ;;  %v352_v11 = vpop.f32.mrb[1].mxu0  ;;  %v368_v12 = vpop.f32.mrb[1].mxu1 }
  0xf6   : > { %v353_v13 = vadd.f32 %v582_v6, %v352_v11  ;;  %v369_v14 = vadd.f32 %v582_v6, %v368_v12  ;;  %v606_v15 = vpop.f32.mrb[2].mxu0  ;;  %v610_v16 = vpop.f32.mrb[2].mxu1 }
  0xf7   : > { %385 = vst [vmem:[%s237_s29 + $0x10] sm:$0xff] %v361_v9  ;;  %389 = vst [vmem:[%s237_s29 + $0x30] sm:$0xff] %v377_v10  ;;  %v364_v17 = vadd.f32 %v606_v15, %v582_v6  ;;  %v380_v18 = vadd.f32 %v610_v16, %v582_v6  ;;  %v355_v19 = vpop.f32.mrb[3].mxu0  ;;  %v371_v20 = vpop.f32.mrb[3].mxu1 }
  0xf8   : > { %383 = vst [vmem:[%s237_s29] sm:$0xff] %v353_v13  ;;  %387 = vst [vmem:[%s237_s29 + $0x20] sm:$0xff] %v369_v14  ;;  %v356_v21 = vadd.f32 %v582_v6, %v355_v19  ;;  %v372_v22 = vadd.f32 %v582_v6, %v371_v20 }
  0xf9   : > { %386 = vst [vmem:[%s237_s29 + $0x18] sm:$0xff] %v364_v17  ;;  %390 = vst [vmem:[%s237_s29 + $0x38] sm:$0xff] %v380_v18 }
  0xfa   : > { %384 = vst [vmem:[%s237_s29 + $0x8] sm:$0xff] %v356_v21  ;;  %388 = vst [vmem:[%s237_s29 + $0x28] sm:$0xff] %v372_v22 }
  0xfe   : > { %v450_v25 = vld [vmem:[%s237_s29 + $0x10] sm:$0xff] }
  0xff   : > { %v446_v23 = vld [vmem:[%s237_s29] sm:$0xff]  ;;  %v458_v29 = vld [vmem:[%s237_s29 + $0x30] sm:$0xff]  ;;  %451 = vst [vmem:[%s404_s7 + $0xb0] sm:$0xff] %v450_v25 }
 0x100   : > { %v452_v26 = vld [vmem:[%s237_s29 + $0x18] sm:$0xff]  ;;  %v454_v27 = vld [vmem:[%s237_s29 + $0x20] sm:$0xff]  ;;  %447 = vst [vmem:[%s404_s7] sm:$0xff] %v446_v23  ;;  %459 = vst [vmem:[%s404_s7 + $0x210] sm:$0xff] %v458_v29 }
 0x101   : > { %v448_v24 = vld [vmem:[%s237_s29 + $0x8] sm:$0xff]  ;;  %v460_v30 = vld [vmem:[%s237_s29 + $0x38] sm:$0xff]  ;;  %453 = vst [vmem:[%s404_s7 + $0x108] sm:$0xff] %v452_v26  ;;  %455 = vst [vmem:[%s404_s7 + $0x160] sm:$0xff] %v454_v27 }
 0x102   : > { %v456_v28 = vld [vmem:[%s237_s29 + $0x28] sm:$0xff]  ;;  %449 = vst [vmem:[%s404_s7 + $0x58] sm:$0xff] %v448_v24  ;;  %461 = vst [vmem:[%s404_s7 + $0x268] sm:$0xff] %v460_v30 }
 0x103   : > { %457 = vst [vmem:[%s404_s7 + $0x1b8] sm:$0xff] %v456_v28 }
 0x104 PF: > { %s13_s18 = sadd.s32 1, %s731_s18   ;;  %s863_s12 = smov %s711_s13 }
 0x105   : > { %p10_p11 = scmp.ge.s32.totalorder %s13_s18, 24   ;;  %s864_s13 = smov %s810_s27 }
 0x106   : > { %s865_s14 = smov %s723_s16  ;;  %s866_s15 = smov %s727_s17 }
 0x107   : > { %s867_s16 = smov %s870_s19  ;;  %s868_s17 = smov %s874_s20 }
 0x108   :  { %12 = sbr.rel (!%p10_p11) target bundleno = 4 (0x4), region = 106 }

</bundles_post_ra>
